<compile_context>
chip_gen: v6e
topology: v6e:2x2x1
jax: 0.10.0
libtpu: 0.0.40
codegen_flags: <defaults>
</compile_context>

<pallas_src>
import numpy as np
import jax
import jax.numpy as jnp
from jax.experimental import pallas as pl
from jax.experimental.pallas import tpu as pltpu


# ----------------------------------------------------------------------------
# Synthetic parameter construction (deterministic). Linear weights are stored
# pre-transposed as (in, out) so all matmuls are x @ W. GRU gate order: r,z,n.
# ----------------------------------------------------------------------------
def _uniform(key, shape, lim):
    return jax.random.uniform(key, shape, jnp.float32, -lim, lim)


def _linear(key, fin, fout):
    k1, k2 = jax.random.split(key)
    lim = 1.0 / np.sqrt(fin)
    return _uniform(k1, (fin, fout), lim), _uniform(k2, (fout,), lim)


def _mlp(key, fin, hidden, n_layers):
    layers = []
    dims = [fin] + [hidden] * n_layers
    for i in range(n_layers):
        key, sub = jax.random.split(key)
        w, b = _linear(sub, dims[i], dims[i + 1])
        layers.append(dict(w=w, b=b,
                           g=jnp.ones((dims[i + 1],), jnp.float32),
                           be=jnp.zeros((dims[i + 1],), jnp.float32)))
    return layers


def build_params(key, hidden, n_filter_bank, deepness, param_per_env):
    H, D = hidden, deepness
    P16 = 16 * param_per_env
    keys = jax.random.split(key, 8)
    params = {}
    params['f_enc'] = _mlp(keys[0], 1, H, D)
    params['l_enc'] = _mlp(keys[1], n_filter_bank, H, D)
    lim = 1.0 / np.sqrt(H)
    gk = jax.random.split(keys[2], 4)
    params['w_ih'] = _uniform(gk[0], (2 * H, 3 * H), lim)   # (in, 3H), gates r|z|n
    params['w_hh'] = _uniform(gk[1], (H, 3 * H), lim)
    params['b_ih'] = _uniform(gk[2], (3 * H,), lim)
    params['b_hh'] = _uniform(gk[3], (3 * H,), lim)
    params['a_dec1'] = _mlp(keys[3], 3 * H, H, D)
    params['a_dec2'] = _linear(keys[4], H, P16)
    params['p_dec1'] = _mlp(keys[5], 3 * H, H, D)
    params['p_dec2'] = _linear(keys[6], H, P16)
    return params


# ----------------------------------------------------------------------------
# Host-side packing into 3 flat buffers + static layout (python-int offsets).
#   wbuf : bf16 (Rw, 128)       matmul weights, zero-padded to full 128 lanes
#   whbuf: bf16 (128, 2*P16)    [Wa_head | Wp_head], rows zero-padded H -> 128
#   vbuf : f32  (Rv, VW)        biases / LN gamma,beta / folded GRU biases
# Invariant: every weight column / bias lane beyond its logical width is ZERO,
# so 128-lane activations keep exact zeros in padded lanes.
# ----------------------------------------------------------------------------
def pack_params(params, *, hidden, deepness, param_per_env):
    H, D = hidden, deepness
    P16 = 16 * param_per_env
    WLANE = 128
    VW = max(128, P16)
    assert 3 * H <= WLANE, "gate-packed GRU layout requires 3*H <= 128"

    w_parts, v_parts = [], []
    w_row = 0
    layout = {}

    def add_w(mat, rows):
        # `rows` = contraction size the kernel will slice (== lane width of the
        # activation feeding this block).  Allocation is 16-row aligned for bf16.
        nonlocal w_row
        fin, fout = mat.shape
        assert fin <= rows and fout <= WLANE
        alloc = ((rows + 15) // 16) * 16
        blk = jnp.zeros((alloc, WLANE), jnp.float32).at[:fin, :fout].set(mat)
        w_parts.append(blk)
        off = w_row
        w_row += alloc
        return (off, rows)

    def add_v(vec):
        n = vec.shape[0]
        v_parts.append(jnp.zeros((1, VW), jnp.float32).at[0, :n].set(vec))
        return len(v_parts) - 1

    def pack_mlp(name, layers, first_rows=None, split_first=None):
        packed = []
        for i, lyr in enumerate(layers):
            entry = {}
            w = lyr['w']
            if i == 0 and split_first is not None:
                off = 0
                for part_name, part_in, part_rows in split_first:
                    entry['w_' + part_name] = add_w(w[off:off + part_in, :], part_rows)
                    off += part_in
            elif w.shape[0] == 1:
                entry['w_vec'] = add_v(w[0])      # degenerate K=1 layer stays f32
            else:
                rows = first_rows if (i == 0 and first_rows is not None) else WLANE
                entry['w'] = add_w(w, rows)
            entry['b'] = add_v(lyr['b'])
            entry['g'] = add_v(lyr['g'])
            entry['be'] = add_v(lyr['be'])
            packed.append(entry)
        layout[name] = packed

    pack_mlp('f_enc', params['f_enc'])                                 # layer0 is K=1
    pack_mlp('l_enc', params['l_enc'],
             first_rows=params['l_enc'][0]['w'].shape[0])              # raw loudness in

    # GRU: gate-packed slabs, gate order r|z|n along lanes (0:H | H:2H | 2H:3H).
    w_ih, w_hh = params['w_ih'], params['w_hh']
    b_ih, b_hh = params['b_ih'], params['b_hh']
    gl = {
        'wih_f': add_w(w_ih[:H, :], WLANE),          # f activation is 128-lane
        'wih_l': add_w(w_ih[H:2 * H, :], WLANE),     # l activation is 128-lane
        'whh': add_w(w_hh, H),                       # h stays (1, H)
        # fold b_ih + b_hh for r,z into xi; n keeps only b_ih (b_hh_n stays in r*(.))
        'bias_x': add_v(jnp.concatenate([b_ih[:2 * H] + b_hh[:2 * H],
                                         b_ih[2 * H:3 * H]])),
        'b_hn': add_v(b_hh[2 * H:3 * H]),
    }
    layout['gru'] = gl

    sf = [('f', H, WLANE), ('l', H, WLANE), ('z', H, H)]
    pack_mlp('a_dec1', params['a_dec1'], split_first=sf)
    pack_mlp('p_dec1', params['p_dec1'], split_first=sf)

    wa, ba = params['a_dec2']
    wp, bp = params['p_dec2']
    layout['ba'] = add_v(ba)
    layout['bp'] = add_v(bp)

    wbuf = jnp.concatenate(w_parts, axis=0).astype(jnp.bfloat16)
    # Heads: one lane-dense (128, 2*P16) slab, rows padded H -> 128 (zeros) so the
    # head dots take full-width (T,128) operands without lane-slicing a_h / p_h.
    whbuf = (jnp.zeros((WLANE, 2 * P16), jnp.float32)
             .at[:H, :P16].set(wa)
             .at[:H, P16:].set(wp)
             .astype(jnp.bfloat16))
    pad = (-len(v_parts)) % 8
    v_parts += [jnp.zeros((1, VW), jnp.float32)] * pad
    vbuf = jnp.concatenate(v_parts, axis=0)
    return wbuf, whbuf, vbuf, layout


# ----------------------------------------------------------------------------
# Pallas kernel + wrapper
# ----------------------------------------------------------------------------
def ddsp_textenv_gru_forward(sc, loud, packed, *, hidden, deepness, param_per_env):
    wbuf, whbuf, vbuf, layout = packed
    T = sc.shape[0]
    H, D = hidden, deepness
    P16 = 16 * param_per_env
    f32, bf16 = jnp.float32, jnp.bfloat16

    def kernel(sc_ref, loud_ref, w_ref, wh_ref, v_ref, real_ref, imag_ref):

        def getw(meta):                       # bf16 (rows, 128), full lane width
            off, rows = meta
            return w_ref[off:off + rows, :]

        def getv(row, width=128):             # f32 (1, width)
            return v_ref[row:row + 1, 0:width]

        def mm(x, meta):                      # bf16 matmul, f32 MXU accumulation
            return jnp.dot(x.astype(bf16), getw(meta), preferred_element_type=f32)

        def ln_lrelu(y, lyr):
            # One-pass LayerNorm over the H real features.  Padded lanes of y are
            # exactly 0, so full-width sums divided by H are exact; gamma/beta are
            # zero beyond lane H so padded lanes stay exactly 0 after LN+LeakyReLU.
            inv_n = 1.0 / H
            mu = jnp.sum(y, axis=-1, keepdims=True) * inv_n
            ms = jnp.sum(y * y, axis=-1, keepdims=True) * inv_n
            var = ms - mu * mu
            yh = (y - mu) * jax.lax.rsqrt(var + 1e-5) * getv(lyr['g']) + getv(lyr['be'])
            return jnp.where(yh >= 0.0, yh, 0.01 * yh)

        def run_encoder(x, name):
            for li in range(D):
                lyr = layout[name][li]
                if 'w_vec' in lyr:            # (T,1) * (1,128) degenerate layer, f32
                    y = x * getv(lyr['w_vec']) + getv(lyr['b'])
                else:
                    y = mm(x, lyr['w']) + getv(lyr['b'])
                x = ln_lrelu(y, lyr)
            return x

        # ---------------- encoders: (T,128) activations, real lanes 0:H ----------
        f = run_encoder(sc_ref[...], 'f_enc')
        l = run_encoder(loud_ref[...], 'l_enc')
        f_b, l_b = f.astype(bf16), l.astype(bf16)

        # ---------------- GRU (h0 = 0), fully unrolled, lane-packed gates ---------
        gl = layout['gru']
        xi = (jnp.dot(f_b, getw(gl['wih_f']), preferred_element_type=f32)
              + jnp.dot(l_b, getw(gl['wih_l']), preferred_element_type=f32)
              + getv(gl['bias_x']))                  # (T,128): [xi_r | xi_z | xi_n | 0]
        xi_n = xi[:, 2 * H:3 * H]                    # one-time lane extract, off-chain
        whh = getw(gl['whh'])                        # (H,128) bf16, gate-packed cols
        b_hn = getv(gl['b_hn'], H)                   # (1,H), must stay inside r*(.)

        h = jnp.zeros((1, H), f32)
        hs = []
        for t in range(T):                           # static unroll; h stays in vregs
            hh = jnp.dot(h.astype(bf16), whh, preferred_element_type=f32)   # one MXU dot
            pre = xi[t:t + 1, :] + hh                                       # one full add
            sg = jax.nn.sigmoid(pre)                                        # r and z fused
            r = sg[:, 0:H]
            zg = sg[:, H:2 * H]
            n = jnp.tanh(xi_n[t:t + 1, :] + r * (hh[:, 2 * H:3 * H] + b_hn))
            h = n + zg * (h - n)                     # == (1-z)*n + z*h
            hs.append(h)
        z_b = jnp.concatenate(hs, axis=0).astype(bf16)      # (T,H), no VMEM scratch

        # ---------------- decoders: split-weight sums (no lane concat) ------------
        def decoder_hidden(name):
            lyr0 = layout[name][0]
            y = (jnp.dot(f_b, getw(lyr0['w_f']), preferred_element_type=f32)
                 + jnp.dot(l_b, getw(lyr0['w_l']), preferred_element_type=f32)
                 + jnp.dot(z_b, getw(lyr0['w_z']), preferred_element_type=f32)
                 + getv(lyr0['b']))
            x = ln_lrelu(y, lyr0)
            for li in range(1, D):
                lyr = layout[name][li]
                x = ln_lrelu(mm(x, lyr['w']) + getv(lyr['b']), lyr)
            return x.astype(bf16)

        a_h = decoder_hidden('a_dec1')               # (T,128)
        p_h = decoder_hidden('p_dec1')               # (T,128)

        # heads: one packed (128, 2*P16) slab, 128-aligned column slices
        a_lin = jnp.dot(a_h, wh_ref[:, 0:P16], preferred_element_type=f32) \
            + getv(layout['ba'], P16)
        p_lin = jnp.dot(p_h, wh_ref[:, P16:2 * P16], preferred_element_type=f32) \
            + getv(layout['bp'], P16)
        a = jax.nn.sigmoid(a_lin)
        p = (2.0 * jnp.pi) * jax.nn.sigmoid(p_lin)
        real_ref[...] = a * jnp.cos(p)
        imag_ref[...] = a * jnp.sin(p)

    # Advisory cost estimate so XLA can overlap surrounding HLO with this
    # latency-bound custom call.
    n128 = 2 * (D - 1) + 2 + 2 * (D + 1)                    # 128-contraction bulk dots
    flops = int(2 * T * 128 * 128 * n128
                + 2 * T * loud.shape[1] * 128               # l_enc layer 0
                + 2 * 2 * T * H * 128                       # decoder w_z dots
                + T * 2 * H * 128                           # GRU recurrent dots
                + 2 * 2 * T * 128 * P16)                    # heads
    transcendentals = int(T * 128 + T * H + 6 * T * P16 + 4 * D * T)
    bytes_accessed = int(sum(a.size * a.dtype.itemsize
                             for a in (sc, loud, wbuf, whbuf, vbuf))
                         + 2 * T * P16 * 4)

    vmem = pl.BlockSpec(memory_space=pltpu.MemorySpace.VMEM)
    fn = pl.pallas_call(
        kernel,
        out_shape=(jax.ShapeDtypeStruct((T, P16), jnp.float32),
                   jax.ShapeDtypeStruct((T, P16), jnp.float32)),
        in_specs=[vmem] * 5,
        out_specs=(vmem, vmem),
        cost_estimate=pl.CostEstimate(flops=flops,
                                      transcendentals=transcendentals,
                                      bytes_accessed=bytes_accessed),
    )
    return fn(sc, loud, wbuf, whbuf, vbuf)


# ----------------------------------------------------------------------------
# Pure-JAX reference (same bf16-rounded weights / bf16 matmul activations)
# ----------------------------------------------------------------------------
def reference_forward(sc, loud, params, *, hidden, deepness, param_per_env):
    H = hidden
    T = sc.shape[0]

    def _bm(x, w):
        return jnp.dot(x.astype(jnp.bfloat16), w.astype(jnp.bfloat16),
                       preferred_element_type=jnp.float32)

    def mlp_apply(x, layers):
        for lyr in layers:
            w = lyr['w']
            if w.shape[0] == 1:
                y = x @ w + lyr['b']                     # degenerate layer stays f32
            else:
                y = _bm(x, w) + lyr['b']
            mu = jnp.mean(y, -1, keepdims=True)
            var = jnp.mean((y - mu) ** 2, -1, keepdims=True)
            y = (y - mu) * jax.lax.rsqrt(var + 1e-5) * lyr['g'] + lyr['be']
            x = jnp.where(y >= 0, y, 0.01 * y)
        return x

    f = mlp_apply(sc, params['f_enc'])
    l = mlp_apply(loud, params['l_enc'])
    x = jnp.concatenate([f, l], -1)
    w_ih, w_hh = params['w_ih'], params['w_hh']
    b_ih, b_hh = params['b_ih'], params['b_hh']
    h = jnp.zeros((1, H), jnp.float32)
    zs = []
    for t in range(T):
        gi = _bm(x[t:t + 1], w_ih) + b_ih
        gh = _bm(h, w_hh) + b_hh
        r = jax.nn.sigmoid(gi[:, :H] + gh[:, :H])
        z = jax.nn.sigmoid(gi[:, H:2 * H] + gh[:, H:2 * H])
        n = jnp.tanh(gi[:, 2 * H:] + r * gh[:, 2 * H:])
        h = (1.0 - z) * n + z * h
        zs.append(h)
    z_seq = jnp.concatenate(zs, 0)
    latent = jnp.concatenate([f, l, z_seq], -1)
    a = mlp_apply(latent, params['a_dec1'])
    wa, ba = params['a_dec2']
    a = jax.nn.sigmoid(_bm(a, wa) + ba)
    p = mlp_apply(latent, params['p_dec1'])
    wp, bp = params['p_dec2']
    p = 2.0 * jnp.pi * jax.nn.sigmoid(_bm(p, wp) + bp)
    return a * jnp.cos(p), a * jnp.sin(p)


if __name__ == "__main__":
    hidden_size = 32
    N_filter_bank = 16
    deepness = 2
    compression = 2
    frame_size = 1024
    param_per_env = frame_size // (2 * N_filter_bank * compression)   # 16 -> P16=256
    T = 8

    key = jax.random.PRNGKey(0)
    k_sc, k_ld, k_par = jax.random.split(key, 3)
    spectral_centroid = jax.random.uniform(k_sc, (T, 1), jnp.float32)
    loudness = jax.random.uniform(k_ld, (T, N_filter_bank), jnp.float32)

    params = build_params(k_par, hidden_size, N_filter_bank, deepness, param_per_env)
    packed = pack_params(params, hidden=hidden_size, deepness=deepness,
                         param_per_env=param_per_env)

    real_param, imag_param = ddsp_textenv_gru_forward(
        spectral_centroid, loudness, packed,
        hidden=hidden_size, deepness=deepness, param_per_env=param_per_env)
    jax.block_until_ready((real_param, imag_param))

    ref_real, ref_imag = reference_forward(
        spectral_centroid, loudness, params,
        hidden=hidden_size, deepness=deepness, param_per_env=param_per_env)

    assert real_param.shape == (T, 16 * param_per_env)
    assert imag_param.shape == (T, 16 * param_per_env)
    assert bool(jnp.all(jnp.isfinite(real_param)))
    assert bool(jnp.all(jnp.isfinite(imag_param)))
    max_err = max(float(jnp.max(jnp.abs(real_param - ref_real))),
                  float(jnp.max(jnp.abs(imag_param - ref_imag))))
    assert max_err < 1e-2, f"mismatch vs reference: {max_err}"
    print("KERNEL_OK")
</pallas_src>

<mosaic_0001>
module attributes {stable_mosaic.version = 11 : i64} {
  func.func @kernel(%arg0: memref<8x1xf32, #tpu.memory_space<vmem>>, %arg1: memref<8x16xf32, #tpu.memory_space<vmem>>, %arg2: memref<1392x128xbf16, #tpu.memory_space<vmem>>, %arg3: memref<128x512xbf16, #tpu.memory_space<vmem>>, %arg4: memref<32x256xf32, #tpu.memory_space<vmem>>, %arg5: memref<8x256xf32, #tpu.memory_space<vmem>>, %arg6: memref<8x256xf32, #tpu.memory_space<vmem>>) attributes {dimension_semantics = [], scalar_prefetch = 0 : i64, scratch_operands = 0 : i64, tpu.core_type = #tpu.core_type<tc>} {
    %c0 = arith.constant 0 : index
    %c0_0 = arith.constant 0 : index
    %0 = vector.load %arg0[%c0, %c0_0] : memref<8x1xf32, #tpu.memory_space<vmem>>, vector<8x1xf32>
    %c0_1 = arith.constant 0 : index
    %c0_2 = arith.constant 0 : index
    %1 = vector.load %arg4[%c0_1, %c0_2] : memref<32x256xf32, #tpu.memory_space<vmem>>, vector<1x128xf32>
    %2 = vector.broadcast %0 : vector<8x1xf32> to vector<8x128xf32>
    %3 = vector.broadcast %1 : vector<1x128xf32> to vector<8x128xf32>
    %4 = arith.mulf %2, %3 : vector<8x128xf32>
    %c1 = arith.constant 1 : index
    %c0_3 = arith.constant 0 : index
    %5 = vector.load %arg4[%c1, %c0_3] : memref<32x256xf32, #tpu.memory_space<vmem>>, vector<1x128xf32>
    %6 = vector.broadcast %5 : vector<1x128xf32> to vector<8x128xf32>
    %7 = arith.addf %4, %6 : vector<8x128xf32>
    %cst = arith.constant dense<0.000000e+00> : vector<8xf32>
    %8 = vector.multi_reduction <add>, %7, %cst [1] : vector<8x128xf32> to vector<8xf32>
    %9 = vector.shape_cast %8 : vector<8xf32> to vector<8x1xf32>
    %cst_4 = arith.constant 3.125000e-02 : f32
    %10 = vector.broadcast %cst_4 : f32 to vector<8x1xf32>
    %11 = arith.mulf %9, %10 : vector<8x1xf32>
    %12 = arith.mulf %7, %7 : vector<8x128xf32>
    %cst_5 = arith.constant dense<0.000000e+00> : vector<8xf32>
    %13 = vector.multi_reduction <add>, %12, %cst_5 [1] : vector<8x128xf32> to vector<8xf32>
    %14 = vector.shape_cast %13 : vector<8xf32> to vector<8x1xf32>
    %cst_6 = arith.constant 3.125000e-02 : f32
    %15 = vector.broadcast %cst_6 : f32 to vector<8x1xf32>
    %16 = arith.mulf %14, %15 : vector<8x1xf32>
    %17 = arith.mulf %11, %11 : vector<8x1xf32>
    %18 = arith.subf %16, %17 : vector<8x1xf32>
    %19 = vector.broadcast %11 : vector<8x1xf32> to vector<8x128xf32>
    %20 = arith.subf %7, %19 : vector<8x128xf32>
    %cst_7 = arith.constant 9.99999974E-6 : f32
    %21 = vector.broadcast %cst_7 : f32 to vector<8x1xf32>
    %22 = arith.addf %18, %21 : vector<8x1xf32>
    %23 = math.rsqrt %22 : vector<8x1xf32>
    %24 = vector.broadcast %23 : vector<8x1xf32> to vector<8x128xf32>
    %25 = arith.mulf %20, %24 : vector<8x128xf32>
    %c2 = arith.constant 2 : index
    %c0_8 = arith.constant 0 : index
    %26 = vector.load %arg4[%c2, %c0_8] : memref<32x256xf32, #tpu.memory_space<vmem>>, vector<1x128xf32>
    %27 = vector.broadcast %26 : vector<1x128xf32> to vector<8x128xf32>
    %28 = arith.mulf %25, %27 : vector<8x128xf32>
    %c3 = arith.constant 3 : index
    %c0_9 = arith.constant 0 : index
    %29 = vector.load %arg4[%c3, %c0_9] : memref<32x256xf32, #tpu.memory_space<vmem>>, vector<1x128xf32>
    %30 = vector.broadcast %29 : vector<1x128xf32> to vector<8x128xf32>
    %31 = arith.addf %28, %30 : vector<8x128xf32>
    %cst_10 = arith.constant 0.000000e+00 : f32
    %32 = vector.broadcast %cst_10 : f32 to vector<8x128xf32>
    %33 = arith.cmpf oge, %31, %32 : vector<8x128xf32>
    %cst_11 = arith.constant 0.00999999977 : f32
    %34 = vector.broadcast %cst_11 : f32 to vector<8x128xf32>
    %35 = arith.mulf %34, %31 : vector<8x128xf32>
    %36 = arith.select %33, %31, %35 : vector<8x128xi1>, vector<8x128xf32>
    %37 = arith.truncf %36 : vector<8x128xf32> to vector<8x128xbf16>
    %c0_12 = arith.constant 0 : index
    %c0_13 = arith.constant 0 : index
    %38 = vector.load %arg2[%c0_12, %c0_13] : memref<1392x128xbf16, #tpu.memory_space<vmem>>, vector<128x128xbf16>
    %cst_14 = arith.constant dense<0.000000e+00> : vector<8x128xf32>
    %39 = tpu.matmul %37, %38, %cst_14 {dimension_numbers = #tpu.dot_dimension_numbers<[1], [0], [0], [1], [0, 0, 1, 1], [], []>} : vector<8x128xbf16>, vector<128x128xbf16>, vector<8x128xf32> -> vector<8x128xf32>
    %c4 = arith.constant 4 : index
    %c0_15 = arith.constant 0 : index
    %40 = vector.load %arg4[%c4, %c0_15] : memref<32x256xf32, #tpu.memory_space<vmem>>, vector<1x128xf32>
    %41 = vector.broadcast %40 : vector<1x128xf32> to vector<8x128xf32>
    %42 = arith.addf %39, %41 : vector<8x128xf32>
    %cst_16 = arith.constant dense<0.000000e+00> : vector<8xf32>
    %43 = vector.multi_reduction <add>, %42, %cst_16 [1] : vector<8x128xf32> to vector<8xf32>
    %44 = vector.shape_cast %43 : vector<8xf32> to vector<8x1xf32>
    %cst_17 = arith.constant 3.125000e-02 : f32
    %45 = vector.broadcast %cst_17 : f32 to vector<8x1xf32>
    %46 = arith.mulf %44, %45 : vector<8x1xf32>
    %47 = arith.mulf %42, %42 : vector<8x128xf32>
    %cst_18 = arith.constant dense<0.000000e+00> : vector<8xf32>
    %48 = vector.multi_reduction <add>, %47, %cst_18 [1] : vector<8x128xf32> to vector<8xf32>
    %49 = vector.shape_cast %48 : vector<8xf32> to vector<8x1xf32>
    %cst_19 = arith.constant 3.125000e-02 : f32
    %50 = vector.broadcast %cst_19 : f32 to vector<8x1xf32>
    %51 = arith.mulf %49, %50 : vector<8x1xf32>
    %52 = arith.mulf %46, %46 : vector<8x1xf32>
    %53 = arith.subf %51, %52 : vector<8x1xf32>
    %54 = vector.broadcast %46 : vector<8x1xf32> to vector<8x128xf32>
    %55 = arith.subf %42, %54 : vector<8x128xf32>
    %cst_20 = arith.constant 9.99999974E-6 : f32
    %56 = vector.broadcast %cst_20 : f32 to vector<8x1xf32>
    %57 = arith.addf %53, %56 : vector<8x1xf32>
    %58 = math.rsqrt %57 : vector<8x1xf32>
    %59 = vector.broadcast %58 : vector<8x1xf32> to vector<8x128xf32>
    %60 = arith.mulf %55, %59 : vector<8x128xf32>
    %c5 = arith.constant 5 : index
    %c0_21 = arith.constant 0 : index
    %61 = vector.load %arg4[%c5, %c0_21] : memref<32x256xf32, #tpu.memory_space<vmem>>, vector<1x128xf32>
    %62 = vector.broadcast %61 : vector<1x128xf32> to vector<8x128xf32>
    %63 = arith.mulf %60, %62 : vector<8x128xf32>
    %c6 = arith.constant 6 : index
    %c0_22 = arith.constant 0 : index
    %64 = vector.load %arg4[%c6, %c0_22] : memref<32x256xf32, #tpu.memory_space<vmem>>, vector<1x128xf32>
    %65 = vector.broadcast %64 : vector<1x128xf32> to vector<8x128xf32>
    %66 = arith.addf %63, %65 : vector<8x128xf32>
    %cst_23 = arith.constant 0.000000e+00 : f32
    %67 = vector.broadcast %cst_23 : f32 to vector<8x128xf32>
    %68 = arith.cmpf oge, %66, %67 : vector<8x128xf32>
    %cst_24 = arith.constant 0.00999999977 : f32
    %69 = vector.broadcast %cst_24 : f32 to vector<8x128xf32>
    %70 = arith.mulf %69, %66 : vector<8x128xf32>
    %71 = arith.select %68, %66, %70 : vector<8x128xi1>, vector<8x128xf32>
    %c0_25 = arith.constant 0 : index
    %c0_26 = arith.constant 0 : index
    %72 = vector.load %arg1[%c0_25, %c0_26] : memref<8x16xf32, #tpu.memory_space<vmem>>, vector<8x16xf32>
    %73 = arith.truncf %72 : vector<8x16xf32> to vector<8x16xbf16>
    %c128 = arith.constant 128 : index
    %c0_27 = arith.constant 0 : index
    %74 = vector.load %arg2[%c128, %c0_27] : memref<1392x128xbf16, #tpu.memory_space<vmem>>, vector<16x128xbf16>
    %cst_28 = arith.constant dense<0.000000e+00> : vector<8x128xf32>
    %75 = tpu.matmul %73, %74, %cst_28 {dimension_numbers = #tpu.dot_dimension_numbers<[1], [0], [0], [1], [0, 0, 1, 1], [], []>} : vector<8x16xbf16>, vector<16x128xbf16>, vector<8x128xf32> -> vector<8x128xf32>
    %c7 = arith.constant 7 : index
    %c0_29 = arith.constant 0 : index
    %76 = vector.load %arg4[%c7, %c0_29] : memref<32x256xf32, #tpu.memory_space<vmem>>, vector<1x128xf32>
    %77 = vector.broadcast %76 : vector<1x128xf32> to vector<8x128xf32>
    %78 = arith.addf %75, %77 : vector<8x128xf32>
    %cst_30 = arith.constant dense<0.000000e+00> : vector<8xf32>
    %79 = vector.multi_reduction <add>, %78, %cst_30 [1] : vector<8x128xf32> to vector<8xf32>
    %80 = vector.shape_cast %79 : vector<8xf32> to vector<8x1xf32>
    %cst_31 = arith.constant 3.125000e-02 : f32
    %81 = vector.broadcast %cst_31 : f32 to vector<8x1xf32>
    %82 = arith.mulf %80, %81 : vector<8x1xf32>
    %83 = arith.mulf %78, %78 : vector<8x128xf32>
    %cst_32 = arith.constant dense<0.000000e+00> : vector<8xf32>
    %84 = vector.multi_reduction <add>, %83, %cst_32 [1] : vector<8x128xf32> to vector<8xf32>
    %85 = vector.shape_cast %84 : vector<8xf32> to vector<8x1xf32>
    %cst_33 = arith.constant 3.125000e-02 : f32
    %86 = vector.broadcast %cst_33 : f32 to vector<8x1xf32>
    %87 = arith.mulf %85, %86 : vector<8x1xf32>
    %88 = arith.mulf %82, %82 : vector<8x1xf32>
    %89 = arith.subf %87, %88 : vector<8x1xf32>
    %90 = vector.broadcast %82 : vector<8x1xf32> to vector<8x128xf32>
    %91 = arith.subf %78, %90 : vector<8x128xf32>
    %cst_34 = arith.constant 9.99999974E-6 : f32
    %92 = vector.broadcast %cst_34 : f32 to vector<8x1xf32>
    %93 = arith.addf %89, %92 : vector<8x1xf32>
    %94 = math.rsqrt %93 : vector<8x1xf32>
    %95 = vector.broadcast %94 : vector<8x1xf32> to vector<8x128xf32>
    %96 = arith.mulf %91, %95 : vector<8x128xf32>
    %c8 = arith.constant 8 : index
    %c0_35 = arith.constant 0 : index
    %97 = vector.load %arg4[%c8, %c0_35] : memref<32x256xf32, #tpu.memory_space<vmem>>, vector<1x128xf32>
    %98 = vector.broadcast %97 : vector<1x128xf32> to vector<8x128xf32>
    %99 = arith.mulf %96, %98 : vector<8x128xf32>
    %c9 = arith.constant 9 : index
    %c0_36 = arith.constant 0 : index
    %100 = vector.load %arg4[%c9, %c0_36] : memref<32x256xf32, #tpu.memory_space<vmem>>, vector<1x128xf32>
    %101 = vector.broadcast %100 : vector<1x128xf32> to vector<8x128xf32>
    %102 = arith.addf %99, %101 : vector<8x128xf32>
    %cst_37 = arith.constant 0.000000e+00 : f32
    %103 = vector.broadcast %cst_37 : f32 to vector<8x128xf32>
    %104 = arith.cmpf oge, %102, %103 : vector<8x128xf32>
    %cst_38 = arith.constant 0.00999999977 : f32
    %105 = vector.broadcast %cst_38 : f32 to vector<8x128xf32>
    %106 = arith.mulf %105, %102 : vector<8x128xf32>
    %107 = arith.select %104, %102, %106 : vector<8x128xi1>, vector<8x128xf32>
    %108 = arith.truncf %107 : vector<8x128xf32> to vector<8x128xbf16>
    %c144 = arith.constant 144 : index
    %c0_39 = arith.constant 0 : index
    %109 = vector.load %arg2[%c144, %c0_39] : memref<1392x128xbf16, #tpu.memory_space<vmem>>, vector<128x128xbf16>
    %cst_40 = arith.constant dense<0.000000e+00> : vector<8x128xf32>
    %110 = tpu.matmul %108, %109, %cst_40 {dimension_numbers = #tpu.dot_dimension_numbers<[1], [0], [0], [1], [0, 0, 1, 1], [], []>} : vector<8x128xbf16>, vector<128x128xbf16>, vector<8x128xf32> -> vector<8x128xf32>
    %c10 = arith.constant 10 : index
    %c0_41 = arith.constant 0 : index
    %111 = vector.load %arg4[%c10, %c0_41] : memref<32x256xf32, #tpu.memory_space<vmem>>, vector<1x128xf32>
    %112 = vector.broadcast %111 : vector<1x128xf32> to vector<8x128xf32>
    %113 = arith.addf %110, %112 : vector<8x128xf32>
    %cst_42 = arith.constant dense<0.000000e+00> : vector<8xf32>
    %114 = vector.multi_reduction <add>, %113, %cst_42 [1] : vector<8x128xf32> to vector<8xf32>
    %115 = vector.shape_cast %114 : vector<8xf32> to vector<8x1xf32>
    %cst_43 = arith.constant 3.125000e-02 : f32
    %116 = vector.broadcast %cst_43 : f32 to vector<8x1xf32>
    %117 = arith.mulf %115, %116 : vector<8x1xf32>
    %118 = arith.mulf %113, %113 : vector<8x128xf32>
    %cst_44 = arith.constant dense<0.000000e+00> : vector<8xf32>
    %119 = vector.multi_reduction <add>, %118, %cst_44 [1] : vector<8x128xf32> to vector<8xf32>
    %120 = vector.shape_cast %119 : vector<8xf32> to vector<8x1xf32>
    %cst_45 = arith.constant 3.125000e-02 : f32
    %121 = vector.broadcast %cst_45 : f32 to vector<8x1xf32>
    %122 = arith.mulf %120, %121 : vector<8x1xf32>
    %123 = arith.mulf %117, %117 : vector<8x1xf32>
    %124 = arith.subf %122, %123 : vector<8x1xf32>
    %125 = vector.broadcast %117 : vector<8x1xf32> to vector<8x128xf32>
    %126 = arith.subf %113, %125 : vector<8x128xf32>
    %cst_46 = arith.constant 9.99999974E-6 : f32
    %127 = vector.broadcast %cst_46 : f32 to vector<8x1xf32>
    %128 = arith.addf %124, %127 : vector<8x1xf32>
    %129 = math.rsqrt %128 : vector<8x1xf32>
    %130 = vector.broadcast %129 : vector<8x1xf32> to vector<8x128xf32>
    %131 = arith.mulf %126, %130 : vector<8x128xf32>
    %c11 = arith.constant 11 : index
    %c0_47 = arith.constant 0 : index
    %132 = vector.load %arg4[%c11, %c0_47] : memref<32x256xf32, #tpu.memory_space<vmem>>, vector<1x128xf32>
    %133 = vector.broadcast %132 : vector<1x128xf32> to vector<8x128xf32>
    %134 = arith.mulf %131, %133 : vector<8x128xf32>
    %c12 = arith.constant 12 : index
    %c0_48 = arith.constant 0 : index
    %135 = vector.load %arg4[%c12, %c0_48] : memref<32x256xf32, #tpu.memory_space<vmem>>, vector<1x128xf32>
    %136 = vector.broadcast %135 : vector<1x128xf32> to vector<8x128xf32>
    %137 = arith.addf %134, %136 : vector<8x128xf32>
    %cst_49 = arith.constant 0.000000e+00 : f32
    %138 = vector.broadcast %cst_49 : f32 to vector<8x128xf32>
    %139 = arith.cmpf oge, %137, %138 : vector<8x128xf32>
    %cst_50 = arith.constant 0.00999999977 : f32
    %140 = vector.broadcast %cst_50 : f32 to vector<8x128xf32>
    %141 = arith.mulf %140, %137 : vector<8x128xf32>
    %142 = arith.select %139, %137, %141 : vector<8x128xi1>, vector<8x128xf32>
    %143 = arith.truncf %71 : vector<8x128xf32> to vector<8x128xbf16>
    %144 = arith.truncf %142 : vector<8x128xf32> to vector<8x128xbf16>
    %c272 = arith.constant 272 : index
    %c0_51 = arith.constant 0 : index
    %145 = vector.load %arg2[%c272, %c0_51] : memref<1392x128xbf16, #tpu.memory_space<vmem>>, vector<128x128xbf16>
    %cst_52 = arith.constant dense<0.000000e+00> : vector<8x128xf32>
    %146 = tpu.matmul %143, %145, %cst_52 {dimension_numbers = #tpu.dot_dimension_numbers<[1], [0], [0], [1], [0, 0, 1, 1], [], []>} : vector<8x128xbf16>, vector<128x128xbf16>, vector<8x128xf32> -> vector<8x128xf32>
    %c400 = arith.constant 400 : index
    %c0_53 = arith.constant 0 : index
    %147 = vector.load %arg2[%c400, %c0_53] : memref<1392x128xbf16, #tpu.memory_space<vmem>>, vector<128x128xbf16>
    %cst_54 = arith.constant dense<0.000000e+00> : vector<8x128xf32>
    %148 = tpu.matmul %144, %147, %cst_54 {dimension_numbers = #tpu.dot_dimension_numbers<[1], [0], [0], [1], [0, 0, 1, 1], [], []>} : vector<8x128xbf16>, vector<128x128xbf16>, vector<8x128xf32> -> vector<8x128xf32>
    %149 = arith.addf %146, %148 : vector<8x128xf32>
    %c13 = arith.constant 13 : index
    %c0_55 = arith.constant 0 : index
    %150 = vector.load %arg4[%c13, %c0_55] : memref<32x256xf32, #tpu.memory_space<vmem>>, vector<1x128xf32>
    %151 = vector.broadcast %150 : vector<1x128xf32> to vector<8x128xf32>
    %152 = arith.addf %149, %151 : vector<8x128xf32>
    %153 = vector.extract_strided_slice %152 {offsets = [0, 64], sizes = [8, 32], strides = [1, 1]} : vector<8x128xf32> to vector<8x32xf32>
    %c528 = arith.constant 528 : index
    %c0_56 = arith.constant 0 : index
    %154 = vector.load %arg2[%c528, %c0_56] : memref<1392x128xbf16, #tpu.memory_space<vmem>>, vector<32x128xbf16>
    %c14 = arith.constant 14 : index
    %c0_57 = arith.constant 0 : index
    %155 = vector.load %arg4[%c14, %c0_57] : memref<32x256xf32, #tpu.memory_space<vmem>>, vector<1x32xf32>
    %cst_58 = arith.constant 0.000000e+00 : f32
    %156 = vector.broadcast %cst_58 : f32 to vector<1x32xf32>
    %157 = arith.truncf %156 : vector<1x32xf32> to vector<1x32xbf16>
    %cst_59 = arith.constant dense<0.000000e+00> : vector<1x128xf32>
    %158 = tpu.matmul %157, %154, %cst_59 {dimension_numbers = #tpu.dot_dimension_numbers<[1], [0], [0], [1], [0, 0, 1, 1], [], []>} : vector<1x32xbf16>, vector<32x128xbf16>, vector<1x128xf32> -> vector<1x128xf32>
    %159 = vector.extract_strided_slice %152 {offsets = [0, 0], sizes = [1, 128], strides = [1, 1]} : vector<8x128xf32> to vector<1x128xf32>
    %160 = arith.addf %159, %158 : vector<1x128xf32>
    %161 = arith.negf %160 : vector<1x128xf32>
    %162 = math.exp %161 : vector<1x128xf32>
    %cst_60 = arith.constant 1.000000e+00 : f32
    %163 = vector.broadcast %cst_60 : f32 to vector<1x128xf32>
    %164 = arith.addf %163, %162 : vector<1x128xf32>
    %165 = arith.divf %163, %164 : vector<1x128xf32>
    %166 = vector.extract_strided_slice %165 {offsets = [0, 0], sizes = [1, 32], strides = [1, 1]} : vector<1x128xf32> to vector<1x32xf32>
    %167 = vector.extract_strided_slice %165 {offsets = [0, 32], sizes = [1, 32], strides = [1, 1]} : vector<1x128xf32> to vector<1x32xf32>
    %168 = vector.extract_strided_slice %153 {offsets = [0, 0], sizes = [1, 32], strides = [1, 1]} : vector<8x32xf32> to vector<1x32xf32>
    %169 = vector.extract_strided_slice %158 {offsets = [0, 64], sizes = [1, 32], strides = [1, 1]} : vector<1x128xf32> to vector<1x32xf32>
    %170 = arith.addf %169, %155 : vector<1x32xf32>
    %171 = arith.mulf %166, %170 : vector<1x32xf32>
    %172 = arith.addf %168, %171 : vector<1x32xf32>
    %173 = math.tanh %172 : vector<1x32xf32>
    %174 = arith.subf %156, %173 : vector<1x32xf32>
    %175 = arith.mulf %167, %174 : vector<1x32xf32>
    %176 = arith.addf %173, %175 : vector<1x32xf32>
    %177 = arith.truncf %176 : vector<1x32xf32> to vector<1x32xbf16>
    %cst_61 = arith.constant dense<0.000000e+00> : vector<1x128xf32>
    %178 = tpu.matmul %177, %154, %cst_61 {dimension_numbers = #tpu.dot_dimension_numbers<[1], [0], [0], [1], [0, 0, 1, 1], [], []>} : vector<1x32xbf16>, vector<32x128xbf16>, vector<1x128xf32> -> vector<1x128xf32>
    %179 = vector.extract_strided_slice %152 {offsets = [1, 0], sizes = [1, 128], strides = [1, 1]} : vector<8x128xf32> to vector<1x128xf32>
    %180 = arith.addf %179, %178 : vector<1x128xf32>
    %181 = arith.negf %180 : vector<1x128xf32>
    %182 = math.exp %181 : vector<1x128xf32>
    %cst_62 = arith.constant 1.000000e+00 : f32
    %183 = vector.broadcast %cst_62 : f32 to vector<1x128xf32>
    %184 = arith.addf %183, %182 : vector<1x128xf32>
    %185 = arith.divf %183, %184 : vector<1x128xf32>
    %186 = vector.extract_strided_slice %185 {offsets = [0, 0], sizes = [1, 32], strides = [1, 1]} : vector<1x128xf32> to vector<1x32xf32>
    %187 = vector.extract_strided_slice %185 {offsets = [0, 32], sizes = [1, 32], strides = [1, 1]} : vector<1x128xf32> to vector<1x32xf32>
    %188 = vector.extract_strided_slice %153 {offsets = [1, 0], sizes = [1, 32], strides = [1, 1]} : vector<8x32xf32> to vector<1x32xf32>
    %189 = vector.extract_strided_slice %178 {offsets = [0, 64], sizes = [1, 32], strides = [1, 1]} : vector<1x128xf32> to vector<1x32xf32>
    %190 = arith.addf %189, %155 : vector<1x32xf32>
    %191 = arith.mulf %186, %190 : vector<1x32xf32>
    %192 = arith.addf %188, %191 : vector<1x32xf32>
    %193 = math.tanh %192 : vector<1x32xf32>
    %194 = arith.subf %176, %193 : vector<1x32xf32>
    %195 = arith.mulf %187, %194 : vector<1x32xf32>
    %196 = arith.addf %193, %195 : vector<1x32xf32>
    %197 = arith.truncf %196 : vector<1x32xf32> to vector<1x32xbf16>
    %cst_63 = arith.constant dense<0.000000e+00> : vector<1x128xf32>
    %198 = tpu.matmul %197, %154, %cst_63 {dimension_numbers = #tpu.dot_dimension_numbers<[1], [0], [0], [1], [0, 0, 1, 1], [], []>} : vector<1x32xbf16>, vector<32x128xbf16>, vector<1x128xf32> -> vector<1x128xf32>
    %199 = vector.extract_strided_slice %152 {offsets = [2, 0], sizes = [1, 128], strides = [1, 1]} : vector<8x128xf32> to vector<1x128xf32>
    %200 = arith.addf %199, %198 : vector<1x128xf32>
    %201 = arith.negf %200 : vector<1x128xf32>
    %202 = math.exp %201 : vector<1x128xf32>
    %cst_64 = arith.constant 1.000000e+00 : f32
    %203 = vector.broadcast %cst_64 : f32 to vector<1x128xf32>
    %204 = arith.addf %203, %202 : vector<1x128xf32>
    %205 = arith.divf %203, %204 : vector<1x128xf32>
    %206 = vector.extract_strided_slice %205 {offsets = [0, 0], sizes = [1, 32], strides = [1, 1]} : vector<1x128xf32> to vector<1x32xf32>
    %207 = vector.extract_strided_slice %205 {offsets = [0, 32], sizes = [1, 32], strides = [1, 1]} : vector<1x128xf32> to vector<1x32xf32>
    %208 = vector.extract_strided_slice %153 {offsets = [2, 0], sizes = [1, 32], strides = [1, 1]} : vector<8x32xf32> to vector<1x32xf32>
    %209 = vector.extract_strided_slice %198 {offsets = [0, 64], sizes = [1, 32], strides = [1, 1]} : vector<1x128xf32> to vector<1x32xf32>
    %210 = arith.addf %209, %155 : vector<1x32xf32>
    %211 = arith.mulf %206, %210 : vector<1x32xf32>
    %212 = arith.addf %208, %211 : vector<1x32xf32>
    %213 = math.tanh %212 : vector<1x32xf32>
    %214 = arith.subf %196, %213 : vector<1x32xf32>
    %215 = arith.mulf %207, %214 : vector<1x32xf32>
    %216 = arith.addf %213, %215 : vector<1x32xf32>
    %217 = arith.truncf %216 : vector<1x32xf32> to vector<1x32xbf16>
    %cst_65 = arith.constant dense<0.000000e+00> : vector<1x128xf32>
    %218 = tpu.matmul %217, %154, %cst_65 {dimension_numbers = #tpu.dot_dimension_numbers<[1], [0], [0], [1], [0, 0, 1, 1], [], []>} : vector<1x32xbf16>, vector<32x128xbf16>, vector<1x128xf32> -> vector<1x128xf32>
    %219 = vector.extract_strided_slice %152 {offsets = [3, 0], sizes = [1, 128], strides = [1, 1]} : vector<8x128xf32> to vector<1x128xf32>
    %220 = arith.addf %219, %218 : vector<1x128xf32>
    %221 = arith.negf %220 : vector<1x128xf32>
    %222 = math.exp %221 : vector<1x128xf32>
    %cst_66 = arith.constant 1.000000e+00 : f32
    %223 = vector.broadcast %cst_66 : f32 to vector<1x128xf32>
    %224 = arith.addf %223, %222 : vector<1x128xf32>
    %225 = arith.divf %223, %224 : vector<1x128xf32>
    %226 = vector.extract_strided_slice %225 {offsets = [0, 0], sizes = [1, 32], strides = [1, 1]} : vector<1x128xf32> to vector<1x32xf32>
    %227 = vector.extract_strided_slice %225 {offsets = [0, 32], sizes = [1, 32], strides = [1, 1]} : vector<1x128xf32> to vector<1x32xf32>
    %228 = vector.extract_strided_slice %153 {offsets = [3, 0], sizes = [1, 32], strides = [1, 1]} : vector<8x32xf32> to vector<1x32xf32>
    %229 = vector.extract_strided_slice %218 {offsets = [0, 64], sizes = [1, 32], strides = [1, 1]} : vector<1x128xf32> to vector<1x32xf32>
    %230 = arith.addf %229, %155 : vector<1x32xf32>
    %231 = arith.mulf %226, %230 : vector<1x32xf32>
    %232 = arith.addf %228, %231 : vector<1x32xf32>
    %233 = math.tanh %232 : vector<1x32xf32>
    %234 = arith.subf %216, %233 : vector<1x32xf32>
    %235 = arith.mulf %227, %234 : vector<1x32xf32>
    %236 = arith.addf %233, %235 : vector<1x32xf32>
    %237 = arith.truncf %236 : vector<1x32xf32> to vector<1x32xbf16>
    %cst_67 = arith.constant dense<0.000000e+00> : vector<1x128xf32>
    %238 = tpu.matmul %237, %154, %cst_67 {dimension_numbers = #tpu.dot_dimension_numbers<[1], [0], [0], [1], [0, 0, 1, 1], [], []>} : vector<1x32xbf16>, vector<32x128xbf16>, vector<1x128xf32> -> vector<1x128xf32>
    %239 = vector.extract_strided_slice %152 {offsets = [4, 0], sizes = [1, 128], strides = [1, 1]} : vector<8x128xf32> to vector<1x128xf32>
    %240 = arith.addf %239, %238 : vector<1x128xf32>
    %241 = arith.negf %240 : vector<1x128xf32>
    %242 = math.exp %241 : vector<1x128xf32>
    %cst_68 = arith.constant 1.000000e+00 : f32
    %243 = vector.broadcast %cst_68 : f32 to vector<1x128xf32>
    %244 = arith.addf %243, %242 : vector<1x128xf32>
    %245 = arith.divf %243, %244 : vector<1x128xf32>
    %246 = vector.extract_strided_slice %245 {offsets = [0, 0], sizes = [1, 32], strides = [1, 1]} : vector<1x128xf32> to vector<1x32xf32>
    %247 = vector.extract_strided_slice %245 {offsets = [0, 32], sizes = [1, 32], strides = [1, 1]} : vector<1x128xf32> to vector<1x32xf32>
    %248 = vector.extract_strided_slice %153 {offsets = [4, 0], sizes = [1, 32], strides = [1, 1]} : vector<8x32xf32> to vector<1x32xf32>
    %249 = vector.extract_strided_slice %238 {offsets = [0, 64], sizes = [1, 32], strides = [1, 1]} : vector<1x128xf32> to vector<1x32xf32>
    %250 = arith.addf %249, %155 : vector<1x32xf32>
    %251 = arith.mulf %246, %250 : vector<1x32xf32>
    %252 = arith.addf %248, %251 : vector<1x32xf32>
    %253 = math.tanh %252 : vector<1x32xf32>
    %254 = arith.subf %236, %253 : vector<1x32xf32>
    %255 = arith.mulf %247, %254 : vector<1x32xf32>
    %256 = arith.addf %253, %255 : vector<1x32xf32>
    %257 = arith.truncf %256 : vector<1x32xf32> to vector<1x32xbf16>
    %cst_69 = arith.constant dense<0.000000e+00> : vector<1x128xf32>
    %258 = tpu.matmul %257, %154, %cst_69 {dimension_numbers = #tpu.dot_dimension_numbers<[1], [0], [0], [1], [0, 0, 1, 1], [], []>} : vector<1x32xbf16>, vector<32x128xbf16>, vector<1x128xf32> -> vector<1x128xf32>
    %259 = vector.extract_strided_slice %152 {offsets = [5, 0], sizes = [1, 128], strides = [1, 1]} : vector<8x128xf32> to vector<1x128xf32>
    %260 = arith.addf %259, %258 : vector<1x128xf32>
    %261 = arith.negf %260 : vector<1x128xf32>
    %262 = math.exp %261 : vector<1x128xf32>
    %cst_70 = arith.constant 1.000000e+00 : f32
    %263 = vector.broadcast %cst_70 : f32 to vector<1x128xf32>
    %264 = arith.addf %263, %262 : vector<1x128xf32>
    %265 = arith.divf %263, %264 : vector<1x128xf32>
    %266 = vector.extract_strided_slice %265 {offsets = [0, 0], sizes = [1, 32], strides = [1, 1]} : vector<1x128xf32> to vector<1x32xf32>
    %267 = vector.extract_strided_slice %265 {offsets = [0, 32], sizes = [1, 32], strides = [1, 1]} : vector<1x128xf32> to vector<1x32xf32>
    %268 = vector.extract_strided_slice %153 {offsets = [5, 0], sizes = [1, 32], strides = [1, 1]} : vector<8x32xf32> to vector<1x32xf32>
    %269 = vector.extract_strided_slice %258 {offsets = [0, 64], sizes = [1, 32], strides = [1, 1]} : vector<1x128xf32> to vector<1x32xf32>
    %270 = arith.addf %269, %155 : vector<1x32xf32>
    %271 = arith.mulf %266, %270 : vector<1x32xf32>
    %272 = arith.addf %268, %271 : vector<1x32xf32>
    %273 = math.tanh %272 : vector<1x32xf32>
    %274 = arith.subf %256, %273 : vector<1x32xf32>
    %275 = arith.mulf %267, %274 : vector<1x32xf32>
    %276 = arith.addf %273, %275 : vector<1x32xf32>
    %277 = arith.truncf %276 : vector<1x32xf32> to vector<1x32xbf16>
    %cst_71 = arith.constant dense<0.000000e+00> : vector<1x128xf32>
    %278 = tpu.matmul %277, %154, %cst_71 {dimension_numbers = #tpu.dot_dimension_numbers<[1], [0], [0], [1], [0, 0, 1, 1], [], []>} : vector<1x32xbf16>, vector<32x128xbf16>, vector<1x128xf32> -> vector<1x128xf32>
    %279 = vector.extract_strided_slice %152 {offsets = [6, 0], sizes = [1, 128], strides = [1, 1]} : vector<8x128xf32> to vector<1x128xf32>
    %280 = arith.addf %279, %278 : vector<1x128xf32>
    %281 = arith.negf %280 : vector<1x128xf32>
    %282 = math.exp %281 : vector<1x128xf32>
    %cst_72 = arith.constant 1.000000e+00 : f32
    %283 = vector.broadcast %cst_72 : f32 to vector<1x128xf32>
    %284 = arith.addf %283, %282 : vector<1x128xf32>
    %285 = arith.divf %283, %284 : vector<1x128xf32>
    %286 = vector.extract_strided_slice %285 {offsets = [0, 0], sizes = [1, 32], strides = [1, 1]} : vector<1x128xf32> to vector<1x32xf32>
    %287 = vector.extract_strided_slice %285 {offsets = [0, 32], sizes = [1, 32], strides = [1, 1]} : vector<1x128xf32> to vector<1x32xf32>
    %288 = vector.extract_strided_slice %153 {offsets = [6, 0], sizes = [1, 32], strides = [1, 1]} : vector<8x32xf32> to vector<1x32xf32>
    %289 = vector.extract_strided_slice %278 {offsets = [0, 64], sizes = [1, 32], strides = [1, 1]} : vector<1x128xf32> to vector<1x32xf32>
    %290 = arith.addf %289, %155 : vector<1x32xf32>
    %291 = arith.mulf %286, %290 : vector<1x32xf32>
    %292 = arith.addf %288, %291 : vector<1x32xf32>
    %293 = math.tanh %292 : vector<1x32xf32>
    %294 = arith.subf %276, %293 : vector<1x32xf32>
    %295 = arith.mulf %287, %294 : vector<1x32xf32>
    %296 = arith.addf %293, %295 : vector<1x32xf32>
    %297 = arith.truncf %296 : vector<1x32xf32> to vector<1x32xbf16>
    %cst_73 = arith.constant dense<0.000000e+00> : vector<1x128xf32>
    %298 = tpu.matmul %297, %154, %cst_73 {dimension_numbers = #tpu.dot_dimension_numbers<[1], [0], [0], [1], [0, 0, 1, 1], [], []>} : vector<1x32xbf16>, vector<32x128xbf16>, vector<1x128xf32> -> vector<1x128xf32>
    %299 = vector.extract_strided_slice %152 {offsets = [7, 0], sizes = [1, 128], strides = [1, 1]} : vector<8x128xf32> to vector<1x128xf32>
    %300 = arith.addf %299, %298 : vector<1x128xf32>
    %301 = arith.negf %300 : vector<1x128xf32>
    %302 = math.exp %301 : vector<1x128xf32>
    %cst_74 = arith.constant 1.000000e+00 : f32
    %303 = vector.broadcast %cst_74 : f32 to vector<1x128xf32>
    %304 = arith.addf %303, %302 : vector<1x128xf32>
    %305 = arith.divf %303, %304 : vector<1x128xf32>
    %306 = vector.extract_strided_slice %305 {offsets = [0, 0], sizes = [1, 32], strides = [1, 1]} : vector<1x128xf32> to vector<1x32xf32>
    %307 = vector.extract_strided_slice %305 {offsets = [0, 32], sizes = [1, 32], strides = [1, 1]} : vector<1x128xf32> to vector<1x32xf32>
    %308 = vector.extract_strided_slice %153 {offsets = [7, 0], sizes = [1, 32], strides = [1, 1]} : vector<8x32xf32> to vector<1x32xf32>
    %309 = vector.extract_strided_slice %298 {offsets = [0, 64], sizes = [1, 32], strides = [1, 1]} : vector<1x128xf32> to vector<1x32xf32>
    %310 = arith.addf %309, %155 : vector<1x32xf32>
    %311 = arith.mulf %306, %310 : vector<1x32xf32>
    %312 = arith.addf %308, %311 : vector<1x32xf32>
    %313 = math.tanh %312 : vector<1x32xf32>
    %314 = arith.subf %296, %313 : vector<1x32xf32>
    %315 = arith.mulf %307, %314 : vector<1x32xf32>
    %316 = arith.addf %313, %315 : vector<1x32xf32>
    %317 = tpu.concatenate %176, %196, %216, %236, %256, %276, %296, %316 in 0 : vector<1x32xf32>, vector<1x32xf32>, vector<1x32xf32>, vector<1x32xf32>, vector<1x32xf32>, vector<1x32xf32>, vector<1x32xf32>, vector<1x32xf32> -> vector<8x32xf32>
    %318 = arith.truncf %317 : vector<8x32xf32> to vector<8x32xbf16>
    %c560 = arith.constant 560 : index
    %c0_75 = arith.constant 0 : index
    %319 = vector.load %arg2[%c560, %c0_75] : memref<1392x128xbf16, #tpu.memory_space<vmem>>, vector<128x128xbf16>
    %cst_76 = arith.constant dense<0.000000e+00> : vector<8x128xf32>
    %320 = tpu.matmul %143, %319, %cst_76 {dimension_numbers = #tpu.dot_dimension_numbers<[1], [0], [0], [1], [0, 0, 1, 1], [], []>} : vector<8x128xbf16>, vector<128x128xbf16>, vector<8x128xf32> -> vector<8x128xf32>
    %c688 = arith.constant 688 : index
    %c0_77 = arith.constant 0 : index
    %321 = vector.load %arg2[%c688, %c0_77] : memref<1392x128xbf16, #tpu.memory_space<vmem>>, vector<128x128xbf16>
    %cst_78 = arith.constant dense<0.000000e+00> : vector<8x128xf32>
    %322 = tpu.matmul %144, %321, %cst_78 {dimension_numbers = #tpu.dot_dimension_numbers<[1], [0], [0], [1], [0, 0, 1, 1], [], []>} : vector<8x128xbf16>, vector<128x128xbf16>, vector<8x128xf32> -> vector<8x128xf32>
    %323 = arith.addf %320, %322 : vector<8x128xf32>
    %c816 = arith.constant 816 : index
    %c0_79 = arith.constant 0 : index
    %324 = vector.load %arg2[%c816, %c0_79] : memref<1392x128xbf16, #tpu.memory_space<vmem>>, vector<32x128xbf16>
    %cst_80 = arith.constant dense<0.000000e+00> : vector<8x128xf32>
    %325 = tpu.matmul %318, %324, %cst_80 {dimension_numbers = #tpu.dot_dimension_numbers<[1], [0], [0], [1], [0, 0, 1, 1], [], []>} : vector<8x32xbf16>, vector<32x128xbf16>, vector<8x128xf32> -> vector<8x128xf32>
    %326 = arith.addf %323, %325 : vector<8x128xf32>
    %c15 = arith.constant 15 : index
    %c0_81 = arith.constant 0 : index
    %327 = vector.load %arg4[%c15, %c0_81] : memref<32x256xf32, #tpu.memory_space<vmem>>, vector<1x128xf32>
    %328 = vector.broadcast %327 : vector<1x128xf32> to vector<8x128xf32>
    %329 = arith.addf %326, %328 : vector<8x128xf32>
    %cst_82 = arith.constant dense<0.000000e+00> : vector<8xf32>
    %330 = vector.multi_reduction <add>, %329, %cst_82 [1] : vector<8x128xf32> to vector<8xf32>
    %331 = vector.shape_cast %330 : vector<8xf32> to vector<8x1xf32>
    %cst_83 = arith.constant 3.125000e-02 : f32
    %332 = vector.broadcast %cst_83 : f32 to vector<8x1xf32>
    %333 = arith.mulf %331, %332 : vector<8x1xf32>
    %334 = arith.mulf %329, %329 : vector<8x128xf32>
    %cst_84 = arith.constant dense<0.000000e+00> : vector<8xf32>
    %335 = vector.multi_reduction <add>, %334, %cst_84 [1] : vector<8x128xf32> to vector<8xf32>
    %336 = vector.shape_cast %335 : vector<8xf32> to vector<8x1xf32>
    %cst_85 = arith.constant 3.125000e-02 : f32
    %337 = vector.broadcast %cst_85 : f32 to vector<8x1xf32>
    %338 = arith.mulf %336, %337 : vector<8x1xf32>
    %339 = arith.mulf %333, %333 : vector<8x1xf32>
    %340 = arith.subf %338, %339 : vector<8x1xf32>
    %341 = vector.broadcast %333 : vector<8x1xf32> to vector<8x128xf32>
    %342 = arith.subf %329, %341 : vector<8x128xf32>
    %cst_86 = arith.constant 9.99999974E-6 : f32
    %343 = vector.broadcast %cst_86 : f32 to vector<8x1xf32>
    %344 = arith.addf %340, %343 : vector<8x1xf32>
    %345 = math.rsqrt %344 : vector<8x1xf32>
    %346 = vector.broadcast %345 : vector<8x1xf32> to vector<8x128xf32>
    %347 = arith.mulf %342, %346 : vector<8x128xf32>
    %c16 = arith.constant 16 : index
    %c0_87 = arith.constant 0 : index
    %348 = vector.load %arg4[%c16, %c0_87] : memref<32x256xf32, #tpu.memory_space<vmem>>, vector<1x128xf32>
    %349 = vector.broadcast %348 : vector<1x128xf32> to vector<8x128xf32>
    %350 = arith.mulf %347, %349 : vector<8x128xf32>
    %c17 = arith.constant 17 : index
    %c0_88 = arith.constant 0 : index
    %351 = vector.load %arg4[%c17, %c0_88] : memref<32x256xf32, #tpu.memory_space<vmem>>, vector<1x128xf32>
    %352 = vector.broadcast %351 : vector<1x128xf32> to vector<8x128xf32>
    %353 = arith.addf %350, %352 : vector<8x128xf32>
    %cst_89 = arith.constant 0.000000e+00 : f32
    %354 = vector.broadcast %cst_89 : f32 to vector<8x128xf32>
    %355 = arith.cmpf oge, %353, %354 : vector<8x128xf32>
    %cst_90 = arith.constant 0.00999999977 : f32
    %356 = vector.broadcast %cst_90 : f32 to vector<8x128xf32>
    %357 = arith.mulf %356, %353 : vector<8x128xf32>
    %358 = arith.select %355, %353, %357 : vector<8x128xi1>, vector<8x128xf32>
    %359 = arith.truncf %358 : vector<8x128xf32> to vector<8x128xbf16>
    %c848 = arith.constant 848 : index
    %c0_91 = arith.constant 0 : index
    %360 = vector.load %arg2[%c848, %c0_91] : memref<1392x128xbf16, #tpu.memory_space<vmem>>, vector<128x128xbf16>
    %cst_92 = arith.constant dense<0.000000e+00> : vector<8x128xf32>
    %361 = tpu.matmul %359, %360, %cst_92 {dimension_numbers = #tpu.dot_dimension_numbers<[1], [0], [0], [1], [0, 0, 1, 1], [], []>} : vector<8x128xbf16>, vector<128x128xbf16>, vector<8x128xf32> -> vector<8x128xf32>
    %c18 = arith.constant 18 : index
    %c0_93 = arith.constant 0 : index
    %362 = vector.load %arg4[%c18, %c0_93] : memref<32x256xf32, #tpu.memory_space<vmem>>, vector<1x128xf32>
    %363 = vector.broadcast %362 : vector<1x128xf32> to vector<8x128xf32>
    %364 = arith.addf %361, %363 : vector<8x128xf32>
    %cst_94 = arith.constant dense<0.000000e+00> : vector<8xf32>
    %365 = vector.multi_reduction <add>, %364, %cst_94 [1] : vector<8x128xf32> to vector<8xf32>
    %366 = vector.shape_cast %365 : vector<8xf32> to vector<8x1xf32>
    %cst_95 = arith.constant 3.125000e-02 : f32
    %367 = vector.broadcast %cst_95 : f32 to vector<8x1xf32>
    %368 = arith.mulf %366, %367 : vector<8x1xf32>
    %369 = arith.mulf %364, %364 : vector<8x128xf32>
    %cst_96 = arith.constant dense<0.000000e+00> : vector<8xf32>
    %370 = vector.multi_reduction <add>, %369, %cst_96 [1] : vector<8x128xf32> to vector<8xf32>
    %371 = vector.shape_cast %370 : vector<8xf32> to vector<8x1xf32>
    %cst_97 = arith.constant 3.125000e-02 : f32
    %372 = vector.broadcast %cst_97 : f32 to vector<8x1xf32>
    %373 = arith.mulf %371, %372 : vector<8x1xf32>
    %374 = arith.mulf %368, %368 : vector<8x1xf32>
    %375 = arith.subf %373, %374 : vector<8x1xf32>
    %376 = vector.broadcast %368 : vector<8x1xf32> to vector<8x128xf32>
    %377 = arith.subf %364, %376 : vector<8x128xf32>
    %cst_98 = arith.constant 9.99999974E-6 : f32
    %378 = vector.broadcast %cst_98 : f32 to vector<8x1xf32>
    %379 = arith.addf %375, %378 : vector<8x1xf32>
    %380 = math.rsqrt %379 : vector<8x1xf32>
    %381 = vector.broadcast %380 : vector<8x1xf32> to vector<8x128xf32>
    %382 = arith.mulf %377, %381 : vector<8x128xf32>
    %c19 = arith.constant 19 : index
    %c0_99 = arith.constant 0 : index
    %383 = vector.load %arg4[%c19, %c0_99] : memref<32x256xf32, #tpu.memory_space<vmem>>, vector<1x128xf32>
    %384 = vector.broadcast %383 : vector<1x128xf32> to vector<8x128xf32>
    %385 = arith.mulf %382, %384 : vector<8x128xf32>
    %c20 = arith.constant 20 : index
    %c0_100 = arith.constant 0 : index
    %386 = vector.load %arg4[%c20, %c0_100] : memref<32x256xf32, #tpu.memory_space<vmem>>, vector<1x128xf32>
    %387 = vector.broadcast %386 : vector<1x128xf32> to vector<8x128xf32>
    %388 = arith.addf %385, %387 : vector<8x128xf32>
    %cst_101 = arith.constant 0.000000e+00 : f32
    %389 = vector.broadcast %cst_101 : f32 to vector<8x128xf32>
    %390 = arith.cmpf oge, %388, %389 : vector<8x128xf32>
    %cst_102 = arith.constant 0.00999999977 : f32
    %391 = vector.broadcast %cst_102 : f32 to vector<8x128xf32>
    %392 = arith.mulf %391, %388 : vector<8x128xf32>
    %393 = arith.select %390, %388, %392 : vector<8x128xi1>, vector<8x128xf32>
    %394 = arith.truncf %393 : vector<8x128xf32> to vector<8x128xbf16>
    %c976 = arith.constant 976 : index
    %c0_103 = arith.constant 0 : index
    %395 = vector.load %arg2[%c976, %c0_103] : memref<1392x128xbf16, #tpu.memory_space<vmem>>, vector<128x128xbf16>
    %cst_104 = arith.constant dense<0.000000e+00> : vector<8x128xf32>
    %396 = tpu.matmul %143, %395, %cst_104 {dimension_numbers = #tpu.dot_dimension_numbers<[1], [0], [0], [1], [0, 0, 1, 1], [], []>} : vector<8x128xbf16>, vector<128x128xbf16>, vector<8x128xf32> -> vector<8x128xf32>
    %c1104 = arith.constant 1104 : index
    %c0_105 = arith.constant 0 : index
    %397 = vector.load %arg2[%c1104, %c0_105] : memref<1392x128xbf16, #tpu.memory_space<vmem>>, vector<128x128xbf16>
    %cst_106 = arith.constant dense<0.000000e+00> : vector<8x128xf32>
    %398 = tpu.matmul %144, %397, %cst_106 {dimension_numbers = #tpu.dot_dimension_numbers<[1], [0], [0], [1], [0, 0, 1, 1], [], []>} : vector<8x128xbf16>, vector<128x128xbf16>, vector<8x128xf32> -> vector<8x128xf32>
    %399 = arith.addf %396, %398 : vector<8x128xf32>
    %c1232 = arith.constant 1232 : index
    %c0_107 = arith.constant 0 : index
    %400 = vector.load %arg2[%c1232, %c0_107] : memref<1392x128xbf16, #tpu.memory_space<vmem>>, vector<32x128xbf16>
    %cst_108 = arith.constant dense<0.000000e+00> : vector<8x128xf32>
    %401 = tpu.matmul %318, %400, %cst_108 {dimension_numbers = #tpu.dot_dimension_numbers<[1], [0], [0], [1], [0, 0, 1, 1], [], []>} : vector<8x32xbf16>, vector<32x128xbf16>, vector<8x128xf32> -> vector<8x128xf32>
    %402 = arith.addf %399, %401 : vector<8x128xf32>
    %c21 = arith.constant 21 : index
    %c0_109 = arith.constant 0 : index
    %403 = vector.load %arg4[%c21, %c0_109] : memref<32x256xf32, #tpu.memory_space<vmem>>, vector<1x128xf32>
    %404 = vector.broadcast %403 : vector<1x128xf32> to vector<8x128xf32>
    %405 = arith.addf %402, %404 : vector<8x128xf32>
    %cst_110 = arith.constant dense<0.000000e+00> : vector<8xf32>
    %406 = vector.multi_reduction <add>, %405, %cst_110 [1] : vector<8x128xf32> to vector<8xf32>
    %407 = vector.shape_cast %406 : vector<8xf32> to vector<8x1xf32>
    %cst_111 = arith.constant 3.125000e-02 : f32
    %408 = vector.broadcast %cst_111 : f32 to vector<8x1xf32>
    %409 = arith.mulf %407, %408 : vector<8x1xf32>
    %410 = arith.mulf %405, %405 : vector<8x128xf32>
    %cst_112 = arith.constant dense<0.000000e+00> : vector<8xf32>
    %411 = vector.multi_reduction <add>, %410, %cst_112 [1] : vector<8x128xf32> to vector<8xf32>
    %412 = vector.shape_cast %411 : vector<8xf32> to vector<8x1xf32>
    %cst_113 = arith.constant 3.125000e-02 : f32
    %413 = vector.broadcast %cst_113 : f32 to vector<8x1xf32>
    %414 = arith.mulf %412, %413 : vector<8x1xf32>
    %415 = arith.mulf %409, %409 : vector<8x1xf32>
    %416 = arith.subf %414, %415 : vector<8x1xf32>
    %417 = vector.broadcast %409 : vector<8x1xf32> to vector<8x128xf32>
    %418 = arith.subf %405, %417 : vector<8x128xf32>
    %cst_114 = arith.constant 9.99999974E-6 : f32
    %419 = vector.broadcast %cst_114 : f32 to vector<8x1xf32>
    %420 = arith.addf %416, %419 : vector<8x1xf32>
    %421 = math.rsqrt %420 : vector<8x1xf32>
    %422 = vector.broadcast %421 : vector<8x1xf32> to vector<8x128xf32>
    %423 = arith.mulf %418, %422 : vector<8x128xf32>
    %c22 = arith.constant 22 : index
    %c0_115 = arith.constant 0 : index
    %424 = vector.load %arg4[%c22, %c0_115] : memref<32x256xf32, #tpu.memory_space<vmem>>, vector<1x128xf32>
    %425 = vector.broadcast %424 : vector<1x128xf32> to vector<8x128xf32>
    %426 = arith.mulf %423, %425 : vector<8x128xf32>
    %c23 = arith.constant 23 : index
    %c0_116 = arith.constant 0 : index
    %427 = vector.load %arg4[%c23, %c0_116] : memref<32x256xf32, #tpu.memory_space<vmem>>, vector<1x128xf32>
    %428 = vector.broadcast %427 : vector<1x128xf32> to vector<8x128xf32>
    %429 = arith.addf %426, %428 : vector<8x128xf32>
    %cst_117 = arith.constant 0.000000e+00 : f32
    %430 = vector.broadcast %cst_117 : f32 to vector<8x128xf32>
    %431 = arith.cmpf oge, %429, %430 : vector<8x128xf32>
    %cst_118 = arith.constant 0.00999999977 : f32
    %432 = vector.broadcast %cst_118 : f32 to vector<8x128xf32>
    %433 = arith.mulf %432, %429 : vector<8x128xf32>
    %434 = arith.select %431, %429, %433 : vector<8x128xi1>, vector<8x128xf32>
    %435 = arith.truncf %434 : vector<8x128xf32> to vector<8x128xbf16>
    %c1264 = arith.constant 1264 : index
    %c0_119 = arith.constant 0 : index
    %436 = vector.load %arg2[%c1264, %c0_119] : memref<1392x128xbf16, #tpu.memory_space<vmem>>, vector<128x128xbf16>
    %cst_120 = arith.constant dense<0.000000e+00> : vector<8x128xf32>
    %437 = tpu.matmul %435, %436, %cst_120 {dimension_numbers = #tpu.dot_dimension_numbers<[1], [0], [0], [1], [0, 0, 1, 1], [], []>} : vector<8x128xbf16>, vector<128x128xbf16>, vector<8x128xf32> -> vector<8x128xf32>
    %c24 = arith.constant 24 : index
    %c0_121 = arith.constant 0 : index
    %438 = vector.load %arg4[%c24, %c0_121] : memref<32x256xf32, #tpu.memory_space<vmem>>, vector<1x128xf32>
    %439 = vector.broadcast %438 : vector<1x128xf32> to vector<8x128xf32>
    %440 = arith.addf %437, %439 : vector<8x128xf32>
    %cst_122 = arith.constant dense<0.000000e+00> : vector<8xf32>
    %441 = vector.multi_reduction <add>, %440, %cst_122 [1] : vector<8x128xf32> to vector<8xf32>
    %442 = vector.shape_cast %441 : vector<8xf32> to vector<8x1xf32>
    %cst_123 = arith.constant 3.125000e-02 : f32
    %443 = vector.broadcast %cst_123 : f32 to vector<8x1xf32>
    %444 = arith.mulf %442, %443 : vector<8x1xf32>
    %445 = arith.mulf %440, %440 : vector<8x128xf32>
    %cst_124 = arith.constant dense<0.000000e+00> : vector<8xf32>
    %446 = vector.multi_reduction <add>, %445, %cst_124 [1] : vector<8x128xf32> to vector<8xf32>
    %447 = vector.shape_cast %446 : vector<8xf32> to vector<8x1xf32>
    %cst_125 = arith.constant 3.125000e-02 : f32
    %448 = vector.broadcast %cst_125 : f32 to vector<8x1xf32>
    %449 = arith.mulf %447, %448 : vector<8x1xf32>
    %450 = arith.mulf %444, %444 : vector<8x1xf32>
    %451 = arith.subf %449, %450 : vector<8x1xf32>
    %452 = vector.broadcast %444 : vector<8x1xf32> to vector<8x128xf32>
    %453 = arith.subf %440, %452 : vector<8x128xf32>
    %cst_126 = arith.constant 9.99999974E-6 : f32
    %454 = vector.broadcast %cst_126 : f32 to vector<8x1xf32>
    %455 = arith.addf %451, %454 : vector<8x1xf32>
    %456 = math.rsqrt %455 : vector<8x1xf32>
    %457 = vector.broadcast %456 : vector<8x1xf32> to vector<8x128xf32>
    %458 = arith.mulf %453, %457 : vector<8x128xf32>
    %c25 = arith.constant 25 : index
    %c0_127 = arith.constant 0 : index
    %459 = vector.load %arg4[%c25, %c0_127] : memref<32x256xf32, #tpu.memory_space<vmem>>, vector<1x128xf32>
    %460 = vector.broadcast %459 : vector<1x128xf32> to vector<8x128xf32>
    %461 = arith.mulf %458, %460 : vector<8x128xf32>
    %c26 = arith.constant 26 : index
    %c0_128 = arith.constant 0 : index
    %462 = vector.load %arg4[%c26, %c0_128] : memref<32x256xf32, #tpu.memory_space<vmem>>, vector<1x128xf32>
    %463 = vector.broadcast %462 : vector<1x128xf32> to vector<8x128xf32>
    %464 = arith.addf %461, %463 : vector<8x128xf32>
    %cst_129 = arith.constant 0.000000e+00 : f32
    %465 = vector.broadcast %cst_129 : f32 to vector<8x128xf32>
    %466 = arith.cmpf oge, %464, %465 : vector<8x128xf32>
    %cst_130 = arith.constant 0.00999999977 : f32
    %467 = vector.broadcast %cst_130 : f32 to vector<8x128xf32>
    %468 = arith.mulf %467, %464 : vector<8x128xf32>
    %469 = arith.select %466, %464, %468 : vector<8x128xi1>, vector<8x128xf32>
    %470 = arith.truncf %469 : vector<8x128xf32> to vector<8x128xbf16>
    %c0_131 = arith.constant 0 : index
    %c0_132 = arith.constant 0 : index
    %471 = vector.load %arg3[%c0_131, %c0_132] : memref<128x512xbf16, #tpu.memory_space<vmem>>, vector<128x256xbf16>
    %cst_133 = arith.constant dense<0.000000e+00> : vector<8x256xf32>
    %472 = tpu.matmul %394, %471, %cst_133 {dimension_numbers = #tpu.dot_dimension_numbers<[1], [0], [0], [1], [0, 0, 1, 1], [], []>} : vector<8x128xbf16>, vector<128x256xbf16>, vector<8x256xf32> -> vector<8x256xf32>
    %c27 = arith.constant 27 : index
    %c0_134 = arith.constant 0 : index
    %473 = vector.load %arg4[%c27, %c0_134] : memref<32x256xf32, #tpu.memory_space<vmem>>, vector<1x256xf32>
    %474 = vector.broadcast %473 : vector<1x256xf32> to vector<8x256xf32>
    %475 = arith.addf %472, %474 : vector<8x256xf32>
    %c0_135 = arith.constant 0 : index
    %c256 = arith.constant 256 : index
    %476 = vector.load %arg3[%c0_135, %c256] : memref<128x512xbf16, #tpu.memory_space<vmem>>, vector<128x256xbf16>
    %cst_136 = arith.constant dense<0.000000e+00> : vector<8x256xf32>
    %477 = tpu.matmul %470, %476, %cst_136 {dimension_numbers = #tpu.dot_dimension_numbers<[1], [0], [0], [1], [0, 0, 1, 1], [], []>} : vector<8x128xbf16>, vector<128x256xbf16>, vector<8x256xf32> -> vector<8x256xf32>
    %c28 = arith.constant 28 : index
    %c0_137 = arith.constant 0 : index
    %478 = vector.load %arg4[%c28, %c0_137] : memref<32x256xf32, #tpu.memory_space<vmem>>, vector<1x256xf32>
    %479 = vector.broadcast %478 : vector<1x256xf32> to vector<8x256xf32>
    %480 = arith.addf %477, %479 : vector<8x256xf32>
    %481 = arith.negf %475 : vector<8x256xf32>
    %482 = math.exp %481 : vector<8x256xf32>
    %cst_138 = arith.constant 1.000000e+00 : f32
    %483 = vector.broadcast %cst_138 : f32 to vector<8x256xf32>
    %484 = arith.addf %483, %482 : vector<8x256xf32>
    %485 = arith.divf %483, %484 : vector<8x256xf32>
    %486 = arith.negf %480 : vector<8x256xf32>
    %487 = math.exp %486 : vector<8x256xf32>
    %cst_139 = arith.constant 1.000000e+00 : f32
    %488 = vector.broadcast %cst_139 : f32 to vector<8x256xf32>
    %489 = arith.addf %488, %487 : vector<8x256xf32>
    %490 = arith.divf %488, %489 : vector<8x256xf32>
    %cst_140 = arith.constant 6.28318548 : f32
    %491 = vector.broadcast %cst_140 : f32 to vector<8x256xf32>
    %492 = arith.mulf %491, %490 : vector<8x256xf32>
    %493 = math.cos %492 : vector<8x256xf32>
    %494 = arith.mulf %485, %493 : vector<8x256xf32>
    %c0_141 = arith.constant 0 : index
    %c0_142 = arith.constant 0 : index
    %495 = vector.load %arg5[%c0_141, %c0_142] : memref<8x256xf32, #tpu.memory_space<vmem>>, vector<8x256xf32>
    tpu.vector_store %arg5[%c0_141, %c0_142], %494 {strides = array<i32>} : memref<8x256xf32, #tpu.memory_space<vmem>>, vector<8x256xf32>,
    %496 = math.sin %492 : vector<8x256xf32>
    %497 = arith.mulf %485, %496 : vector<8x256xf32>
    %c0_143 = arith.constant 0 : index
    %c0_144 = arith.constant 0 : index
    %498 = vector.load %arg6[%c0_143, %c0_144] : memref<8x256xf32, #tpu.memory_space<vmem>>, vector<8x256xf32>
    tpu.vector_store %arg6[%c0_143, %c0_144], %497 {strides = array<i32>} : memref<8x256xf32, #tpu.memory_space<vmem>>, vector<8x256xf32>,
    return
  }
}

</mosaic_0001>

<bundles_post_ra>
// kernel: tpu_custom_call.1
= control target key start
LH: loop header
LB: loop body
LE: loop exit
PB: predicated region body
PF: predicated region fallthrough
CT: control target
= control target key end

     0   :  { %12 = vsyncpa [#allocation3], 0  ;;  %s4399_s0 = inlined_call_operand.vmem [shape: f32[8,1], index: 0, kind: input, shape index: {}]   ;;  %s4400_s1 = inlined_call_operand.vmem [shape: f32[8,16], index: 1, kind: input, shape index: {}]   ;;  %s4401_s2 = inlined_call_operand.hbm [shape: bf16[1392,128], index: 2, kind: input, shape index: {}]   ;;  %s4402_s3 = inlined_call_operand.hbm [shape: bf16[128,512], index: 3, kind: input, shape index: {}]   ;;  %s4403_s4 = inlined_call_operand.hbm [shape: f32[32,256], index: 4, kind: input, shape index: {}]   ;;  %s4404_s5 = inlined_call_operand.hbm [shape: f32[8,256], index: 5, kind: output, shape index: {0}]   ;;  %s4405_s6 = inlined_call_operand.hbm [shape: f32[8,256], index: 6, kind: output, shape index: {1}]  }
   0x1   :  { %13 = vsyncpa [#allocation6], 0 }
   0x2   :  { %14 = vsyncpa [#allocation4], 0 }
   0x3   :  { %15 = vsyncpa [#allocation10], 0  ;;  %s3888_s21 = smov [#allocation5]  }
   0x4   :  { %s37_s22 = sshll.u32 %s3888_s21, 4  ;;  %s38_s22 = int_to_ptr.vmem [resolvable:$true] %s37_s22 }
   0x5   :  { %s3788_s23 = scalar_lea.vmem %s38_s22, 4096  ;;  %p3793_p1 = scmp.lt.s32.totalorder %s38_s22, %s38_s22 }
   0x6   :  { %p3789_p0 = scmp.ne.s32.totalorder %s38_s22, %s3788_s23  ;;  %p3794_p2 = scmp.lt.s32.totalorder %s3788_s23, %s3788_s23 }
   0x8   :  { %p3795_p3 = por %p3794_p2, %p3793_p1 }
   0xa   :  { %p3796_p4 = pnand %p3795_p3, %p3789_p0 }
   0xc   :  { %3799 = shalt.err (!%p3796_p4)
}
   0xd   :  { %s3889_s24 = smov 256   ;;  %s3890_s25 = smov 16  }
   0xe   :  { %43 = dma.hbm_to_vmem [thread:$0]  %s4402_s3, 4096, %s38_s22, [#allocation6], %s3889_s24, %s3889_s24, %s3890_s25  }
   0xf   :  { %s3891_s28 = smov [#allocation2]  }
  0x10   :  { %s25_s29 = sshll.u32 %s3891_s28, 4  ;;  %s26_s29 = int_to_ptr.vmem [resolvable:$true] %s25_s29 }
  0x11   :  { %s3808_s30 = scalar_lea.vmem %s26_s29, 11136  ;;  %p3813_p6 = scmp.lt.s32.totalorder %s26_s29, %s26_s29 }
  0x12   :  { %p3809_p5 = scmp.ne.s32.totalorder %s26_s29, %s3808_s30  ;;  %p3814_p7 = scmp.lt.s32.totalorder %s3808_s30, %s3808_s30 }
  0x14   :  { %p3815_p8 = por %p3814_p7, %p3813_p6 }
  0x16   :  { %p3816_p9 = pnand %p3815_p8, %p3809_p5 }
  0x18   :  { %3819 = shalt.err (!%p3816_p9)
}
  0x19   :  { %s3892_s7 = smov 64   ;;  %s3893_s8 = smov 4  }
  0x1a   :  { %31 = dma.hbm_to_vmem [thread:$0]  %s4401_s2, 11136, %s26_s29, [#allocation3], %s3892_s7, %s3892_s7, %s3893_s8  }
  0x1b   :  { %s3894_s11 = smov [#allocation7]  }
  0x1c   :  { %s49_s3 = sshll.u32 %s3894_s11, 4  ;;  %s50_s3 = int_to_ptr.vmem [resolvable:$true] %s49_s3 }
  0x1d   :  { %s3828_s12 = scalar_lea.vmem %s50_s3, 1024  ;;  %p3833_p11 = scmp.lt.s32.totalorder %s50_s3, %s50_s3 }
  0x1e   :  { %p3829_p10 = scmp.ne.s32.totalorder %s50_s3, %s3828_s12  ;;  %p3834_p12 = scmp.lt.s32.totalorder %s3828_s12, %s3828_s12 }
  0x20   :  { %p3835_p13 = por %p3834_p12, %p3833_p11 }
  0x22   :  { %p3836_p0 = pnand %p3835_p13, %p3829_p10 }
  0x24   :  { %3839 = shalt.err (!%p3836_p0)
}
  0x25   :  { %55 = dma.hbm_to_vmem [thread:$0]  %s4403_s4, 1024, %s50_s3, [#allocation6], %s3889_s24, %s3889_s24, %s3890_s25  }
  0x26   :  { %3880 = dma.done.wait [#allocation3], 11136  }
  0x27   :  { %3881 = vsyncadd [#allocation3], 4294956160 }
  0x28   :  { %3882 = dma.done.wait [#allocation6], 5120  }
  0x29   :  { %3883 = vsyncadd [#allocation6], 4294962176  ;;  %v3895_v0 = vmov 0   ;;  %v3896_v1 = vmov 0.0   ;;  %vm3897_vm0 = vmmov 0   ;;  %v66_v2 = vld [vmem:[%s4399_s0] sm:$0xff] }
  0x2a   :  { %3556 = vset.pattern.permute.xlu0 %v3895_v0  ;;  %3262 = vmatprep.subr.bf16.mxu1 %v3896_v1  ;;  %v3557_v3 = vld [vmem:[#allocation2 + $0x40] sm:$0xff]   ;;  %vm233_vm1 = vcmask 130048   ;;  %v67_v6 = vld [vmem:[#allocation7] ss:$0 sm:$0xff]  ;;  %v74_v7 = vld [vmem:[#allocation7 + $0x1] ss:$0 sm:$0xff] }
  0x2b   :  { %3264 = vmatprep.mubr.msk.bf16.mxu1 %vm3897_vm0, %v3896_v1  ;;  %3242 = vmatprep.subr.bf16.mxu0 %v3896_v1  ;;  %v222_v4 = vld [vmem:[%s4400_s1] sm:$0xff]  ;;  %v3558_v12 = vld [vmem:[#allocation2 + $0x38] sm:$0xff]   ;;  %v3559_v13 = vld [vmem:[#allocation2 + $0x30] sm:$0xff]   ;;  %s3898_s0 = smov 96   ;;  %s3899_s1 = smov 32   ;;  %vm652_vm6 = vcmask 261120  }
  0x2c   :  { %3258 = vmatprep.mubr.msk.bf16.mxu0 %vm3897_vm0, %v3896_v1  ;;  %70 = vperm.xlu0 %3556, %v66_v2   ;;  %v223_v5 = vpack.c.bf16 %v222_v4, %v222_v4  ;;  %v3560_v14 = vld [vmem:[#allocation2 + $0x28] sm:$0xff]   ;;  %v3561_v15 = vld [vmem:[#allocation2 + $0x20] sm:$0xff]   ;;  %v3562_v16 = vld [vmem:[#allocation2 + $0x18] sm:$0xff]   ;;  %vm1336_vm7 = vcmask 1040384   ;;  %vm1338_vm8 = vcmask 1041408   ;;  %vm1340_vm9 = vcmask 1042432  }
  0x2d   :  { %3263 = vmatpush3.bf16.msra.mxu1 %v3557_v3  ;;  %3243 = vmatpush3.bf16.msra.mxu0 %v3558_v12  ;;  %v3563_v17 = vld [vmem:[#allocation2 + $0x10] sm:$0xff]   ;;  %v3564_v18 = vld [vmem:[#allocation2 + $0x8] sm:$0xff]   ;;  %v3565_v19 = vld [vmem:[#allocation2] sm:$0xff]   ;;  %vm1342_vm10 = vcmask 1043456   ;;  %vm1344_vm11 = vcmask 1044480   ;;  %vm1346_vm12 = vcmask 1045504  }
  0x2e   :  { %3268 = vmatprep.subr.bf16.mxu1 %v3896_v1  ;;  %3244 = vmatprep.subr.bf16.mxu0 %v3896_v1  ;;  %v226_v20 = vld [vmem:[#allocation7 + $0x7] ss:$0 sm:$0xff]  ;;  %v3566_v27 = vld [vmem:[#allocation2 + $0x80] sm:$0xff]   ;;  %v3568_v29 = vld [vmem:[#allocation2 + $0x70] sm:$0xff]   ;;  %vm1348_vm13 = vcmask 1046528   ;;  %s3906_s17 = smov [#allocation8]  }
  0x2f   :  { %v3567_v28 = vld [vmem:[#allocation2 + $0x78] sm:$0xff]   ;;  %v3569_v30 = vld [vmem:[#allocation2 + $0x68] sm:$0xff]   ;;  %v3570_v31 = vld [vmem:[#allocation2 + $0x60] sm:$0xff]   ;;  %s2939_s18 = sshll.u32 %s3906_s17, 4  ;;  %s3907_s19 = smov [#allocation9]   ;;  %s2940_s18 = int_to_ptr.vmem [resolvable:$true] %s2939_s18 }
  0x30   :  { %3265 = vmatmul.mubr.msk.bf16.vlgmr.msra.gmra.mxu1 %vm233_vm1, %v223_v5  ;;  %v3571_v32 = vld [vmem:[#allocation2 + $0x58] sm:$0xff]   ;;  %v3572_v33 = vld [vmem:[#allocation2 + $0x50] sm:$0xff]   ;;  %v3573_v34 = vld [vmem:[#allocation2 + $0x48] sm:$0xff]   ;;  %s2949_s20 = sshll.u32 %s3907_s19, 4  ;;  %s3840_s21 = scalar_lea.vmem %s2940_s18, 256  ;;  %s2950_s20 = int_to_ptr.vmem [resolvable:$true] %s2949_s20 }
  0x31   :  { %3284 = vmatprep.mubr.msk.bf16.mxu1 %vm3897_vm0, %v3896_v1  ;;  %3245 = vmatpush3.bf16.msra.mxu0 %v3559_v13  ;;  %v89_v44 = vld [vmem:[#allocation7 + $0x2] ss:$0 sm:$0xff]  ;;  %v91_v46 = vld [vmem:[#allocation7 + $0x3] ss:$0 sm:$0xff]  ;;  %v290_v61 = vld [vmem:[#allocation7 + $0x10] ss:$0 sm:$0xff]  ;;  %p3841_p1 = scmp.ne.s32.totalorder %s2940_s18, %s3840_s21  ;;  %p3845_p2 = scmp.lt.s32.totalorder %s2940_s18, %s2940_s18 }
  0x32   :  { %3246 = vmatprep.subr.bf16.mxu0 %v3896_v1  ;;  %3269 = vmatpush3.bf16.msra.mxu1 %v3566_v27  ;;  %v292_v63 = vld [vmem:[#allocation7 + $0x11] ss:$0 sm:$0xff]  ;;  %p3846_p3 = scmp.lt.s32.totalorder %s3840_s21, %s3840_s21 }
  0x33   :  { %3270 = vmatprep.subr.bf16.mxu1 %v3896_v1 }
  0x34   :  { %p3847_p4 = por %p3846_p3, %p3845_p2 }
  0x35   :  { %3247 = vmatpush3.bf16.msra.mxu0 %v3560_v14  ;;  %v3574_v14 = vld [vmem:[#allocation2 + $0xc0] sm:$0xff]  }
  0x36   :  { %3248 = vmatprep.subr.bf16.mxu0 %v3896_v1  ;;  %3271 = vmatpush3.bf16.msra.mxu1 %v3567_v28  ;;  %p3848_p5 = pnand %p3847_p4, %p3841_p1 }
  0x37   :  { %3272 = vmatprep.subr.bf16.mxu1 %v3896_v1 }
  0x39   :  { %3249 = vmatpush3.bf16.msra.mxu0 %v3561_v15  ;;  %v3575_v15 = vld [vmem:[#allocation2 + $0xb8] sm:$0xff]  }
  0x3a   :  { %3250 = vmatprep.subr.bf16.mxu0 %v3896_v1  ;;  %3273 = vmatpush3.bf16.msra.mxu1 %v3568_v29  ;;  %v3584_v29 = vld [vmem:[#allocation2 + $0x100] sm:$0xff]  }
  0x3b   :  { %3274 = vmatprep.subr.bf16.mxu1 %v3896_v1 }
  0x3d   :  { %3251 = vmatpush3.bf16.msra.mxu0 %v3562_v16  ;;  %v3576_v16 = vld [vmem:[#allocation2 + $0xb0] sm:$0xff]  }
  0x3e   :  { %3252 = vmatprep.subr.bf16.mxu0 %v3896_v1  ;;  %3275 = vmatpush3.bf16.msra.mxu1 %v3569_v30  ;;  %v3585_v30 = vld [vmem:[#allocation2 + $0xf8] sm:$0xff]  }
  0x3f   :  { %3276 = vmatprep.subr.bf16.mxu1 %v3896_v1 }
  0x41   :  { %3253 = vmatpush3.bf16.msra.mxu0 %v3563_v17  ;;  %v3577_v17 = vld [vmem:[#allocation2 + $0xa8] sm:$0xff]  }
  0x42   :  { %3254 = vmatprep.subr.bf16.mxu0 %v3896_v1  ;;  %3277 = vmatpush3.bf16.msra.mxu1 %v3570_v31  ;;  %v3586_v31 = vld [vmem:[#allocation2 + $0xf0] sm:$0xff]  }
  0x43   :  { %3278 = vmatprep.subr.bf16.mxu1 %v3896_v1 }
  0x45   :  { %3255 = vmatpush3.bf16.msra.mxu0 %v3564_v18  ;;  %v3578_v18 = vld [vmem:[#allocation2 + $0xa0] sm:$0xff]  }
  0x46   :  { %3256 = vmatprep.subr.bf16.mxu0 %v3896_v1  ;;  %3279 = vmatpush3.bf16.msra.mxu1 %v3571_v32  ;;  %v3587_v32 = vld [vmem:[#allocation2 + $0xe8] sm:$0xff]  }
  0x47   :  { %3280 = vmatprep.subr.bf16.mxu1 %v3896_v1 }
  0x49   :  { %3257 = vmatpush3.bf16.msra.mxu0 %v3565_v19  ;;  %v3579_v19 = vld [vmem:[#allocation2 + $0x98] sm:$0xff]  }
  0x4a   :  { %3288 = vmatprep.subr.bf16.mxu0 %v3896_v1  ;;  %3281 = vmatpush3.bf16.msra.mxu1 %v3572_v33  ;;  %v3588_v33 = vld [vmem:[#allocation2 + $0xe0] sm:$0xff]  }
  0x4b   :  { %3282 = vmatprep.subr.bf16.mxu1 %v3896_v1 }
  0x4e   :  { %3283 = vmatpush3.bf16.msra.mxu1 %v3573_v34  ;;  %v3589_v34 = vld [vmem:[#allocation2 + $0xd8] sm:$0xff]  }
  0x4f   :  { %3308 = vmatprep.subr.bf16.mxu1 %v3896_v1 }
  0xa7   :  { %v71_v8 = vpop.permute.xlu0 %70 }
  0xa8   :  { %v73_v9 = vmul.f32 %v71_v8, %v67_v6 }
  0xaa   :  { %v3970_v10 = vadd.f32 %v74_v7, %v73_v9  ;;  %v113_v7 = vld [vmem:[#allocation7 + $0x4] ss:$0 sm:$0xff] }
  0xac   :  { %76 = vadd.xlane.f32.xlu0 %v3970_v10  ;;  %v79_v11 = vmul.f32 %v3970_v10, %v3970_v10 }
  0xae   :  { %80 = vadd.xlane.f32.xlu1 %v79_v11 }
  0xf0   :  { %v271_v21 = vpop.f32.mrf.mxu1 }
  0xf1   :  { %v3983_v22 = vadd.f32 %v271_v21, %v226_v20  ;;  %v3580_v20 = vld [vmem:[#allocation2 + $0x90] sm:$0xff]   ;;  %v3581_v21 = vld [vmem:[#allocation2 + $0x88] sm:$0xff]  }
  0xf2   :  { %v3266_v23 = vpop.f32.mrf.mxu1 }
  0xf3   :  { %277 = vadd.xlane.f32.xlu1 %v3983_v22  ;;  %v280_v24 = vmul.f32 %v3983_v22, %v3983_v22 }
  0xf4   :  { %v274_v25 = vpop.f32.mrf.mxu1 }
  0xf6   :  { %v3267_v26 = vpop.f32.mrf.mxu1 }
  0xf7   :  { %281 = vadd.xlane.f32.xlu1 %v280_v24 }
 0x135   :  { %v77_v35 = vpop.xlane.xlu0 %76 }
 0x136   :  { %v78_v36 = vmul.f32 0.03125, %v77_v35  ;;  %v3590_v35 = vld [vmem:[#allocation2 + $0xd0] sm:$0xff]  }
 0x137   :  { %v81_v37 = vpop.xlane.xlu1 %80 }
 0x138   :  { %v83_v38 = vmul.f32 %v78_v36, %v78_v36  ;;  %v82_v39 = vmul.f32 0.03125, %v81_v37  ;;  %v85_v42 = vsub.f32 %v3970_v10, %v78_v36  ;;  %v3591_v36 = vld [vmem:[#allocation2 + $0xc8] sm:$0xff]  }
 0x139   :  { %v639_v37 = vld [vmem:[#allocation7 + $0x16] ss:$0 sm:$0xff] }
 0x13a   :  { %v84_v40 = vsub.f32 %v82_v39, %v83_v38 }
 0x13c   :  { %v86_v41 = vadd.f32 1e-05, %v84_v40 }
 0x13e   :  { %3692 = vrsqrt.f32 %v86_v41 }
 0x14b   :  { %v3693_v43 = vpop.eup %3692 }
 0x14c   :  { %v88_v45 = vmul.f32 %v3693_v43, %v85_v42 }
 0x14e   :  { %v90_v47 = vmul.f32 %v89_v44, %v88_v45 }
 0x150   :  { %v92_v48 = vadd.f32 %v91_v46, %v90_v47  ;;  %v215_v47 = vld [vmem:[#allocation7 + $0x5] ss:$0 sm:$0xff] }
 0x152   :  { %vm93_vm2 = vcmp.ge.f32.partialorder %v92_v48, 0.0  ;;  %v94_v49 = vmul.f32 0.01, %v92_v48 }
 0x154   :  { %v95_v50 = vsel %vm93_vm2, %v92_v48, %v94_v49  ;;  %v217_v49 = vld [vmem:[#allocation7 + $0x6] ss:$0 sm:$0xff] }
 0x155   :  { %v96_v51 = vpack.c.bf16 %v95_v50, %v95_v50 }
 0x157   :  { %3259 = vmatmul.mubr.bf16.vlgmr.msra.gmra.mxu0 %v96_v51 }
 0x158   :  { %3304 = vmatprep.mubr.msk.bf16.mxu0 %vm3897_vm0, %v3896_v1  ;;  %3289 = vmatpush3.bf16.msra.mxu0 %v3584_v29 }
 0x159   :  { %3290 = vmatprep.subr.bf16.mxu0 %v3896_v1 }
 0x15c   :  { %3291 = vmatpush3.bf16.msra.mxu0 %v3585_v30 }
 0x15d   :  { %3292 = vmatprep.subr.bf16.mxu0 %v3896_v1 }
 0x160   :  { %3293 = vmatpush3.bf16.msra.mxu0 %v3586_v31 }
 0x161   :  { %3294 = vmatprep.subr.bf16.mxu0 %v3896_v1 }
 0x164   :  { %3295 = vmatpush3.bf16.msra.mxu0 %v3587_v32 }
 0x165   :  { %3296 = vmatprep.subr.bf16.mxu0 %v3896_v1 }
 0x168   :  { %3297 = vmatpush3.bf16.msra.mxu0 %v3588_v33 }
 0x169   :  { %3298 = vmatprep.subr.bf16.mxu0 %v3896_v1 }
 0x16c   :  { %3299 = vmatpush3.bf16.msra.mxu0 %v3589_v34 }
 0x16d   :  { %3300 = vmatprep.subr.bf16.mxu0 %v3896_v1 }
 0x170   :  { %3301 = vmatpush3.bf16.msra.mxu0 %v3590_v35 }
 0x171   :  { %3302 = vmatprep.subr.bf16.mxu0 %v3896_v1 }
 0x174   :  { %3303 = vmatpush3.bf16.msra.mxu0 %v3591_v36 }
 0x175   :  { %3344 = vmatprep.subr.bf16.mxu0 %v3896_v1 }
 0x17c   :  { %v278_v52 = vpop.xlane.xlu1 %277 }
 0x17d   :  { %v279_v53 = vmul.f32 0.03125, %v278_v52 }
 0x17f   :  { %v284_v54 = vmul.f32 %v279_v53, %v279_v53  ;;  %v286_v59 = vsub.f32 %v3983_v22, %v279_v53  ;;  %v314_v22 = vld [vmem:[#allocation7 + $0x12] ss:$0 sm:$0xff] }
 0x180   :  { %v282_v55 = vpop.xlane.xlu1 %281 }
 0x181   :  { %v283_v56 = vmul.f32 0.03125, %v282_v55 }
 0x183   :  { %v285_v57 = vsub.f32 %v283_v56, %v284_v54  ;;  %v4030_v54 = vld [vmem:[#allocation2 + $0x110] sm:$0xff]   ;;  %v4036_v56 = vld [vmem:[#allocation2 + $0x108] sm:$0xff]  }
 0x185   :  { %v287_v58 = vadd.f32 1e-05, %v285_v57 }
 0x187   :  { %3694 = vrsqrt.f32 %v287_v58 }
 0x194   :  { %v3695_v60 = vpop.eup %3694 }
 0x195   :  { %v289_v62 = vmul.f32 %v3695_v60, %v286_v59 }
 0x197   :  { %v291_v2 = vmul.f32 %v290_v61, %v289_v62 }
 0x199   :  { %v293_v3 = vadd.f32 %v292_v63, %v291_v2 }
 0x19b   :  { %vm294_vm3 = vcmp.ge.f32.partialorder %v293_v3, 0.0  ;;  %v295_v4 = vmul.f32 0.01, %v293_v3 }
 0x19d   :  { %v296_v5 = vsel %vm294_vm3, %v293_v3, %v295_v4  ;;  %v416_v4 = vld [vmem:[#allocation7 + $0x13] ss:$0 sm:$0xff] }
 0x19e   :  { %v297_v6 = vpack.c.bf16 %v296_v5, %v296_v5 }
 0x1a0   :  { %3285 = vmatmul.mubr.bf16.vlgmr.msra.gmra.mxu1 %v297_v6  ;;  %v418_v6 = vld [vmem:[#allocation7 + $0x14] ss:$0 sm:$0xff] }
 0x1a1   :  { %3324 = vmatprep.mubr.msk.bf16.mxu1 %vm3897_vm0, %v3896_v1  ;;  %3309 = vmatpush3.bf16.msra.mxu1 %v3574_v14 }
 0x1a2   :  { %3310 = vmatprep.subr.bf16.mxu1 %v3896_v1 }
 0x1a5   :  { %3311 = vmatpush3.bf16.msra.mxu1 %v3575_v15 }
 0x1a6   :  { %3312 = vmatprep.subr.bf16.mxu1 %v3896_v1 }
 0x1a9   :  { %3313 = vmatpush3.bf16.msra.mxu1 %v3576_v16 }
 0x1aa   :  { %3314 = vmatprep.subr.bf16.mxu1 %v3896_v1 }
 0x1ad   :  { %3315 = vmatpush3.bf16.msra.mxu1 %v3577_v17 }
 0x1ae   :  { %3316 = vmatprep.subr.bf16.mxu1 %v3896_v1 }
 0x1b1   :  { %3317 = vmatpush3.bf16.msra.mxu1 %v3578_v18 }
 0x1b2   :  { %3318 = vmatprep.subr.bf16.mxu1 %v3896_v1 }
 0x1b5   :  { %3319 = vmatpush3.bf16.msra.mxu1 %v3579_v19 }
 0x1b6   :  { %3320 = vmatprep.subr.bf16.mxu1 %v3896_v1 }
 0x1b9   :  { %3321 = vmatpush3.bf16.msra.mxu1 %v3580_v20 }
 0x1ba   :  { %3322 = vmatprep.subr.bf16.mxu1 %v3896_v1 }
 0x1bd   :  { %3323 = vmatpush3.bf16.msra.mxu1 %v3581_v21 }
 0x1be   :  { %3328 = vmatprep.subr.bf16.mxu1 %v3896_v1 }
 0x217   :  { %v196_v8 = vpop.f32.mrf.mxu0 }
 0x218   :  { %v4002_v9 = vadd.f32 %v196_v8, %v113_v7 }
 0x219   :  { %v3260_v10 = vpop.f32.mrf.mxu0 }
 0x21a   :  { %202 = vadd.xlane.f32.xlu1 %v4002_v9  ;;  %v205_v12 = vmul.f32 %v4002_v9, %v4002_v9 }
 0x21b   :  { %v199_v11 = vpop.f32.mrf.mxu0 }
 0x21d   :  { %v3261_v13 = vpop.f32.mrf.mxu0 }
 0x21e   :  { %206 = vadd.xlane.f32.xlu1 %v205_v12 }
 0x260   :  { %v397_v23 = vpop.f32.mrf.mxu1 }
 0x261   :  { %v4015_v24 = vadd.f32 %v397_v23, %v314_v22 }
 0x262   :  { %v3286_v25 = vpop.f32.mrf.mxu1 }
 0x263   :  { %403 = vadd.xlane.f32.xlu1 %v4015_v24  ;;  %v406_v27 = vmul.f32 %v4015_v24, %v4015_v24  ;;  %v633_v25 = vld [vmem:[#allocation7 + $0x15] ss:$0 sm:$0xff] }
 0x264   :  { %v400_v26 = vpop.f32.mrf.mxu1 }
 0x266   :  { %v3287_v28 = vpop.f32.mrf.mxu1 }
 0x267   :  { %407 = vadd.xlane.f32.xlu1 %v406_v27 }
 0x278   :  { %704 = vrot.lane.b32.xlu1 %v639_v37, %s3892_s7 }
 0x2a3   :  { %v203_v38 = vpop.xlane.xlu1 %202 }
 0x2a4   :  { %v204_v39 = vmul.f32 0.03125, %v203_v38 }
 0x2a6   :  { %v209_v41 = vmul.f32 %v204_v39, %v204_v39  ;;  %v211_v45 = vsub.f32 %v4002_v9, %v204_v39 }
 0x2a7   :  { %v207_v40 = vpop.xlane.xlu1 %206 }
 0x2a8   :  { %v208_v42 = vmul.f32 0.03125, %v207_v40 }
 0x2aa   :  { %v210_v43 = vsub.f32 %v208_v42, %v209_v41 }
 0x2ac   :  { %v212_v44 = vadd.f32 1e-05, %v210_v43 }
 0x2ae   :  { %3696 = vrsqrt.f32 %v212_v44 }
 0x2bb   :  { %v3697_v46 = vpop.eup %3696 }
 0x2bc   :  { %v214_v48 = vmul.f32 %v3697_v46, %v211_v45 }
 0x2be   :  { %v216_v50 = vmul.f32 %v215_v47, %v214_v48 }
 0x2c0   :  { %v218_v51 = vadd.f32 %v217_v49, %v216_v50 }
 0x2c2   :  { %vm219_vm4 = vcmp.ge.f32.partialorder %v218_v51, 0.0  ;;  %v220_v52 = vmul.f32 0.01, %v218_v51 }
 0x2c4   :  { %v221_v53 = vsel %vm219_vm4, %v218_v51, %v220_v52 }
 0x2c5   :  { %v4032_v55 = vpack.c.bf16 %v221_v53, %v221_v53 }
 0x2c7   :  { %3325 = vmatmul.mubr.bf16.vlgmr.msra.gmra.mxu1 %v4032_v55 }
 0x2c8   :  { %3329 = vmatpush3.bf16.msra.mxu1 %v4030_v54  ;;  %3332 = vmatprep.mubr.msk.bf16.mxu1 %vm3897_vm0, %v3896_v1 }
 0x2c9   :  { %3330 = vmatprep.subr.bf16.mxu1 %v3896_v1 }
 0x2cc   :  { %3331 = vmatpush3.bf16.msra.mxu1 %v4036_v56 }
 0x2cd   :  { %3336 = vmatprep.subr.bf16.mxu1 %v3896_v1 }
 0x2cf   :  { %3333 = vmatmul.mubr.bf16.vlgmr.msra.gmra.mxu1 %v3895_v0 }
 0x2d0   :  { %3337 = vmatpush3.bf16.msra.mxu1 %v4030_v54  ;;  %3340 = vmatprep.mubr.msk.bf16.mxu1 %vm3897_vm0, %v3896_v1 }
 0x2d1   :  { %3338 = vmatprep.subr.bf16.mxu1 %v3896_v1 }
 0x2d4   :  { %3339 = vmatpush3.bf16.msra.mxu1 %v4036_v56 }
 0x2d5   :  { %3352 = vmatprep.subr.bf16.mxu1 %v3896_v1 }
 0x2ec   :  { %v404_v57 = vpop.xlane.xlu1 %403 }
 0x2ed   :  { %v405_v58 = vmul.f32 0.03125, %v404_v57 }
 0x2ef   :  { %v410_v60 = vmul.f32 %v405_v58, %v405_v58  ;;  %v412_v2 = vsub.f32 %v4015_v24, %v405_v58 }
 0x2f0   :  { %v408_v59 = vpop.xlane.xlu1 %407 }
 0x2f1   :  { %v409_v61 = vmul.f32 0.03125, %v408_v59 }
 0x2f3   :  { %v411_v62 = vsub.f32 %v409_v61, %v410_v60 }
 0x2f4   :  { %v4060_v16 = vpop.permute.xlu1 %704 }
 0x2f5   :  { %v413_v63 = vadd.f32 1e-05, %v411_v62 }
 0x2f7   :  { %3698 = vrsqrt.f32 %v413_v63 }
 0x304   :  { %v3699_v3 = vpop.eup %3698 }
 0x305   :  { %v415_v5 = vmul.f32 %v3699_v3, %v412_v2 }
 0x307   :  { %v417_v7 = vmul.f32 %v416_v4, %v415_v5 }
 0x309   :  { %v419_v8 = vadd.f32 %v418_v6, %v417_v7 }
 0x30b   :  { %vm420_vm5 = vcmp.ge.f32.partialorder %v419_v8, 0.0  ;;  %v421_v9 = vmul.f32 0.01, %v419_v8 }
 0x30d   :  { %v422_v10 = vsel %vm420_vm5, %v419_v8, %v421_v9 }
 0x30e   :  { %v4051_v11 = vpack.c.bf16 %v422_v10, %v422_v10 }
 0x310   :  { %3305 = vmatmul.mubr.bf16.vlgmr.msra.gmra.mxu0 %v4051_v11 }
 0x311   :  { %3345 = vmatpush3.bf16.msra.mxu0 %v4030_v54  ;;  %3348 = vmatprep.mubr.msk.bf16.mxu0 %vm3897_vm0, %v3896_v1 }
 0x312   :  { %3346 = vmatprep.subr.bf16.mxu0 %v3896_v1 }
 0x315   :  { %3347 = vmatpush3.bf16.msra.mxu0 %v4036_v56 }
 0x316   :  { %3360 = vmatprep.subr.bf16.mxu0 %v3896_v1 }
 0x387   :  { %v627_v12 = vpop.f32.mrf.mxu1 }
 0x389   :  { %v3326_v13 = vpop.f32.mrf.mxu1 }
 0x38b   :  { %v630_v14 = vpop.f32.mrf.mxu1 }
 0x38d   :  { %v3327_v15 = vpop.f32.mrf.mxu1 }
 0x38f   :  { %v690_v17 = vpop.f32.mrf.mxu1 }
 0x390   :  { %v707_v18 = vadd.f32 %v4060_v16, %v690_v17 }
 0x391   :  { %v3334_v19 = vpop.f32.mrf.mxu1 }
 0x392   :  { %709 = vrot.lane.b32.xlu0 %v707_v18, %s3892_s7 }
 0x393   :  { %v693_v20 = vpop.f32.mrf.mxu1 }
 0x395   :  { %v3335_v21 = vpop.f32.mrf.mxu1 }
 0x3d0   :  { %v539_v22 = vpop.f32.mrf.mxu0 }
 0x3d1   :  { %v628_v23 = vadd.f32 %v627_v12, %v539_v22 }
 0x3d2   :  { %v3306_v24 = vpop.f32.mrf.mxu0 }
 0x3d3   :  { %v4064_v27 = vadd.f32 %v633_v25, %v628_v23 }
 0x3d4   :  { %v542_v26 = vpop.f32.mrf.mxu0 }
 0x3d5   :  { %v696_v29 = vadd.f32 %v690_v17, %v4064_v27 }
 0x3d6   :  { %v3307_v28 = vpop.f32.mrf.mxu0 }
 0x3d7   :  { %v2999_v30 = vmul.f32 -1.442695, %v696_v29 }
 0x3d9   :  { %3700 = vpow2.f32 %v2999_v30 }
 0x3e6   :  { %v3701_v31 = vpop.eup %3700 }
 0x3e7   :  { %v700_v32 = vadd.f32 1.0, %v3701_v31 }
 0x3e9   :  { %3702 = vrcp.f32 %v700_v32 }
 0x3f6   :  { %v3703_v33 = vpop.eup %3702 }
 0x404   :  { %v710_v34 = vpop.permute.xlu0 %709 }
 0x405   :  { %v712_v35 = vmul.f32 %v3703_v33, %v710_v34 }
 0x407   :  { %714 = vrot.lane.b32.xlu1 %v712_v35, %s3892_s7 }
 0x479   :  { %v715_v36 = vpop.permute.xlu1 %714 }
 0x47a   :  { %v717_v37 = vadd.f32 %v715_v36, %v4064_v27 }
 0x47c   :  { %3704 = vtanh.f32 %v717_v37 }
 0x489   :  { %v3705_v38 = vpop.eup %3704 }
 0x48a   :  { %v719_v39 = vsub.f32 0.0, %v3705_v38 }
 0x48c   :  { %721 = vrot.lane.b32.xlu1 %v719_v39, %s3898_s0 }
 0x4fe   :  { %v722_v40 = vpop.permute.xlu1 %721 }
 0x4ff   :  { %v724_v41 = vmul.f32 %v3703_v33, %v722_v40 }
 0x501   :  { %726 = vrot.lane.b32.xlu1 %v724_v41, %s3899_s1 }
 0x573   :  { %v727_v42 = vpop.permute.xlu1 %726 }
 0x574   :  { %v4071_v43 = vadd.f32 %v3705_v38, %v727_v42 }
 0x576   :  { %v730_v44 = vpack.c.bf16 %v4071_v43, %v4071_v43 }
 0x578   :  { %732 = vrot.lane.b32.xlu0 %v730_v44, %s3892_s7 }
 0x5ea   :  { %v733_v45 = vpop.permute.xlu0 %732 }
 0x5eb   :  { %3341 = vmatmul.mubr.msk.bf16.vlgmr.msra.gmra.mxu1 %vm652_vm6, %v733_v45 }
 0x5ec   :  { %3353 = vmatpush3.bf16.msra.mxu1 %v4030_v54  ;;  %3356 = vmatprep.mubr.msk.bf16.mxu1 %vm3897_vm0, %v3896_v1 }
 0x5ed   :  { %3354 = vmatprep.subr.bf16.mxu1 %v3896_v1 }
 0x5f0   :  { %3355 = vmatpush3.bf16.msra.mxu1 %v4036_v56 }
 0x5f1   :  { %3368 = vmatprep.subr.bf16.mxu1 %v3896_v1 }
 0x6ab   :  { %v771_v46 = vpop.f32.mrf.mxu1 }
 0x6ac   :  { %v787_v47 = vadd.f32 %v771_v46, %v4060_v16  ;;  %v778_v52 = vrot.slane %v771_v46, 7 }
 0x6ad   :  { %v3342_v48 = vpop.f32.mrf.mxu1 }
 0x6ae   :  { %v789_v49 = vrot.slane %v787_v47, 7  ;;  %v780_v53 = vadd.f32 %v778_v52, %v4064_v27 }
 0x6af   :  { %v774_v50 = vpop.f32.mrf.mxu1 }
 0x6b0   :  { %790 = vrot.lane.b32.xlu1 %v789_v49, %s3892_s7  ;;  %v3001_v57 = vmul.f32 -1.442695, %v780_v53 }
 0x6b1   :  { %v3343_v51 = vpop.f32.mrf.mxu1 }
 0x6b2   :  { %3706 = vpow2.f32 %v3001_v57 }
 0x6bf   :  { %v3707_v58 = vpop.eup %3706 }
 0x6c0   :  { %v784_v59 = vadd.f32 1.0, %v3707_v58 }
 0x6c2   :  { %3708 = vrcp.f32 %v784_v59 }
 0x6cf   :  { %v3709_v60 = vpop.eup %3708 }
 0x722   :  { %v791_v61 = vpop.permute.xlu1 %790 }
 0x723   :  { %v793_v62 = vmul.f32 %v3709_v60, %v791_v61 }
 0x725   :  { %795 = vrot.lane.b32.xlu0 %v793_v62, %s3892_s7 }
 0x797   :  { %v796_v63 = vpop.permute.xlu0 %795 }
 0x798   :  { %v798_v2 = vadd.f32 %v796_v63, %v4064_v27 }
 0x79a   :  { %3710 = vtanh.f32 %v798_v2 }
 0x7a7   :  { %v3711_v3 = vpop.eup %3710 }
 0x7a8   :  { %v801_v4 = vrot.slane %v3711_v3, 1 }
 0x7aa   :  { %v803_v5 = vsub.f32 %v4071_v43, %v801_v4 }
 0x7ac   :  { %v805_v6 = vrot.slane %v803_v5, 7 }
 0x7ae   :  { %806 = vrot.lane.b32.xlu1 %v805_v6, %s3898_s0 }
 0x820   :  { %v807_v7 = vpop.permute.xlu1 %806 }
 0x821   :  { %v809_v8 = vmul.f32 %v3709_v60, %v807_v7 }
 0x823   :  { %811 = vrot.lane.b32.xlu0 %v809_v8, %s3899_s1 }
 0x895   :  { %v812_v9 = vpop.permute.xlu0 %811 }
 0x896   :  { %v4091_v10 = vadd.f32 %v3711_v3, %v812_v9 }
 0x898   :  { %v815_v12 = vpack.c.bf16 %v4091_v10, %v4091_v10 }
 0x89a   :  { %v817_v13 = vshrl.u32 %v815_v12, 16 }
 0x89c   :  { %819 = vrot.lane.b32.xlu1 %v817_v13, %s3892_s7 }
 0x90e   :  { %v820_v14 = vpop.permute.xlu1 %819 }
 0x90f   :  { %3349 = vmatmul.mubr.msk.bf16.vlgmr.msra.gmra.mxu0 %vm652_vm6, %v820_v14 }
 0x910   :  { %3361 = vmatpush3.bf16.msra.mxu0 %v4030_v54  ;;  %3364 = vmatprep.mubr.msk.bf16.mxu0 %vm3897_vm0, %v3896_v1 }
 0x911   :  { %3362 = vmatprep.subr.bf16.mxu0 %v3896_v1 }
 0x914   :  { %3363 = vmatpush3.bf16.msra.mxu0 %v4036_v56 }
 0x915   :  { %3376 = vmatprep.subr.bf16.mxu0 %v3896_v1 }
 0x9cf   :  { %v858_v15 = vpop.f32.mrf.mxu0 }
 0x9d0   :  { %v874_v17 = vadd.f32 %v858_v15, %v4060_v16  ;;  %v865_v22 = vrot.slane %v858_v15, 6 }
 0x9d1   :  { %v3350_v18 = vpop.f32.mrf.mxu0 }
 0x9d2   :  { %v876_v19 = vrot.slane %v874_v17, 6  ;;  %v867_v23 = vadd.f32 %v865_v22, %v4064_v27 }
 0x9d3   :  { %v861_v20 = vpop.f32.mrf.mxu0 }
 0x9d4   :  { %877 = vrot.lane.b32.xlu0 %v876_v19, %s3892_s7  ;;  %v3003_v24 = vmul.f32 -1.442695, %v867_v23 }
 0x9d5   :  { %v3351_v21 = vpop.f32.mrf.mxu0 }
 0x9d6   :  { %3712 = vpow2.f32 %v3003_v24 }
 0x9e3   :  { %v3713_v25 = vpop.eup %3712 }
 0x9e4   :  { %v871_v26 = vadd.f32 1.0, %v3713_v25 }
 0x9e6   :  { %3714 = vrcp.f32 %v871_v26 }
 0x9f3   :  { %v3715_v28 = vpop.eup %3714 }
 0xa46   :  { %v878_v29 = vpop.permute.xlu0 %877 }
 0xa47   :  { %v880_v30 = vmul.f32 %v3715_v28, %v878_v29 }
 0xa49   :  { %882 = vrot.lane.b32.xlu1 %v880_v30, %s3892_s7 }
 0xabb   :  { %v883_v31 = vpop.permute.xlu1 %882 }
 0xabc   :  { %v885_v32 = vadd.f32 %v883_v31, %v4064_v27 }
 0xabe   :  { %3716 = vtanh.f32 %v885_v32 }
 0xacb   :  { %v3717_v33 = vpop.eup %3716 }
 0xacc   :  { %v888_v34 = vrot.slane %v3717_v33, 1 }
 0xace   :  { %v890_v35 = vsub.f32 %v4091_v10, %v888_v34 }
 0xad0   :  { %v892_v36 = vrot.slane %v890_v35, 7 }
 0xad2   :  { %893 = vrot.lane.b32.xlu0 %v892_v36, %s3898_s0 }
 0xb44   :  { %v894_v37 = vpop.permute.xlu0 %893 }
 0xb45   :  { %v896_v38 = vmul.f32 %v3715_v28, %v894_v37 }
 0xb47   :  { %898 = vrot.lane.b32.xlu1 %v896_v38, %s3899_s1 }
 0xbb9   :  { %v899_v39 = vpop.permute.xlu1 %898 }
 0xbba   :  { %v4111_v40 = vadd.f32 %v3717_v33, %v899_v39 }
 0xbbc   :  { %v902_v41 = vpack.c.bf16 %v4111_v40, %v4111_v40 }
 0xbbe   :  { %v904_v42 = vrot.slane %v902_v41, 1 }
 0xbc0   :  { %905 = vrot.lane.b32.xlu0 %v904_v42, %s3892_s7 }
 0xc32   :  { %v906_v44 = vpop.permute.xlu0 %905 }
 0xc33   :  { %3357 = vmatmul.mubr.msk.bf16.vlgmr.msra.gmra.mxu1 %vm652_vm6, %v906_v44 }
 0xc34   :  { %3369 = vmatpush3.bf16.msra.mxu1 %v4030_v54  ;;  %3372 = vmatprep.mubr.msk.bf16.mxu1 %vm3897_vm0, %v3896_v1 }
 0xc35   :  { %3370 = vmatprep.subr.bf16.mxu1 %v3896_v1 }
 0xc38   :  { %3371 = vmatpush3.bf16.msra.mxu1 %v4036_v56 }
 0xc39   :  { %3384 = vmatprep.subr.bf16.mxu1 %v3896_v1 }
 0xcf3   :  { %v944_v45 = vpop.f32.mrf.mxu1 }
 0xcf4   :  { %v960_v46 = vadd.f32 %v944_v45, %v4060_v16  ;;  %v951_v51 = vrot.slane %v944_v45, 5 }
 0xcf5   :  { %v3358_v47 = vpop.f32.mrf.mxu1 }
 0xcf6   :  { %v962_v48 = vrot.slane %v960_v46, 5  ;;  %v953_v52 = vadd.f32 %v951_v51, %v4064_v27 }
 0xcf7   :  { %v947_v49 = vpop.f32.mrf.mxu1 }
 0xcf8   :  { %963 = vrot.lane.b32.xlu1 %v962_v48, %s3892_s7  ;;  %v3005_v53 = vmul.f32 -1.442695, %v953_v52 }
 0xcf9   :  { %v3359_v50 = vpop.f32.mrf.mxu1 }
 0xcfa   :  { %3718 = vpow2.f32 %v3005_v53 }
 0xd07   :  { %v3719_v57 = vpop.eup %3718 }
 0xd08   :  { %v957_v58 = vadd.f32 1.0, %v3719_v57 }
 0xd0a   :  { %3720 = vrcp.f32 %v957_v58 }
 0xd17   :  { %v3721_v59 = vpop.eup %3720 }
 0xd6a   :  { %v964_v60 = vpop.permute.xlu1 %963 }
 0xd6b   :  { %v966_v61 = vmul.f32 %v3721_v59, %v964_v60 }
 0xd6d   :  { %968 = vrot.lane.b32.xlu0 %v966_v61, %s3892_s7 }
 0xddf   :  { %v969_v62 = vpop.permute.xlu0 %968 }
 0xde0   :  { %v971_v63 = vadd.f32 %v969_v62, %v4064_v27 }
 0xde2   :  { %3722 = vtanh.f32 %v971_v63 }
 0xdef   :  { %v3723_v2 = vpop.eup %3722 }
 0xdf0   :  { %v974_v3 = vrot.slane %v3723_v2, 1 }
 0xdf2   :  { %v976_v4 = vsub.f32 %v4111_v40, %v974_v3 }
 0xdf4   :  { %v978_v5 = vrot.slane %v976_v4, 7 }
 0xdf6   :  { %979 = vrot.lane.b32.xlu1 %v978_v5, %s3898_s0 }
 0xe68   :  { %v980_v6 = vpop.permute.xlu1 %979 }
 0xe69   :  { %v982_v7 = vmul.f32 %v3721_v59, %v980_v6 }
 0xe6b   :  { %984 = vrot.lane.b32.xlu0 %v982_v7, %s3899_s1 }
 0xedd   :  { %v985_v8 = vpop.permute.xlu0 %984 }
 0xede   :  { %v4131_v9 = vadd.f32 %v3723_v2, %v985_v8 }
 0xee0   :  { %v988_v12 = vpack.c.bf16 %v4131_v9, %v4131_v9 }
 0xee2   :  { %v990_v13 = vshrl.u32 %v988_v12, 16 }
 0xee4   :  { %v992_v14 = vrot.slane %v990_v13, 1 }
 0xee6   :  { %993 = vrot.lane.b32.xlu1 %v992_v14, %s3892_s7 }
 0xf58   :  { %v994_v15 = vpop.permute.xlu1 %993 }
 0xf59   :  { %3365 = vmatmul.mubr.msk.bf16.vlgmr.msra.gmra.mxu0 %vm652_vm6, %v994_v15 }
 0xf5a   :  { %3377 = vmatpush3.bf16.msra.mxu0 %v4030_v54  ;;  %3380 = vmatprep.mubr.msk.bf16.mxu0 %vm3897_vm0, %v3896_v1 }
 0xf5b   :  { %3378 = vmatprep.subr.bf16.mxu0 %v3896_v1 }
 0xf5e   :  { %3379 = vmatpush3.bf16.msra.mxu0 %v4036_v56 }
 0xf5f   :  { %3392 = vmatprep.subr.bf16.mxu0 %v3896_v1 }
0x1019   :  { %v1032_v17 = vpop.f32.mrf.mxu0 }
0x101a   :  { %v1048_v18 = vadd.f32 %v1032_v17, %v4060_v16  ;;  %v1039_v23 = vrot.slane %v1032_v17, 4  ;;  %v3592_v17 = vld [vmem:[#allocation2 + $0x190] sm:$0xff]  }
0x101b   :  { %v3366_v19 = vpop.f32.mrf.mxu0 }
0x101c   :  { %v1050_v20 = vrot.slane %v1048_v18, 4  ;;  %v1041_v24 = vadd.f32 %v1039_v23, %v4064_v27  ;;  %v3593_v19 = vld [vmem:[#allocation2 + $0x188] sm:$0xff]  }
0x101d   :  { %v1035_v21 = vpop.f32.mrf.mxu0  ;;  %v3597_v23 = vld [vmem:[#allocation2 + $0x168] sm:$0xff]  }
0x101e   :  { %1051 = vrot.lane.b32.xlu0 %v1050_v20, %s3892_s7  ;;  %v3007_v25 = vmul.f32 -1.442695, %v1041_v24  ;;  %v3594_v20 = vld [vmem:[#allocation2 + $0x180] sm:$0xff]   ;;  %v3595_v21 = vld [vmem:[#allocation2 + $0x178] sm:$0xff]  }
0x101f   :  { %v3367_v22 = vpop.f32.mrf.mxu0  ;;  %v3598_v24 = vld [vmem:[#allocation2 + $0x160] sm:$0xff]  }
0x1020   :  { %3724 = vpow2.f32 %v3007_v25  ;;  %v3596_v22 = vld [vmem:[#allocation2 + $0x170] sm:$0xff]   ;;  %v3599_v25 = vld [vmem:[#allocation2 + $0x158] sm:$0xff]  }
0x102d   :  { %v3725_v26 = vpop.eup %3724 }
0x102e   :  { %v1045_v28 = vadd.f32 1.0, %v3725_v26 }
0x1030   :  { %3726 = vrcp.f32 %v1045_v28 }
0x103d   :  { %v3727_v29 = vpop.eup %3726 }
0x1090   :  { %v1052_v30 = vpop.permute.xlu0 %1051 }
0x1091   :  { %v1054_v31 = vmul.f32 %v3727_v29, %v1052_v30 }
0x1093   :  { %1056 = vrot.lane.b32.xlu1 %v1054_v31, %s3892_s7 }
0x1105   :  { %v1057_v32 = vpop.permute.xlu1 %1056 }
0x1106   :  { %v1059_v33 = vadd.f32 %v1057_v32, %v4064_v27 }
0x1108   :  { %3728 = vtanh.f32 %v1059_v33 }
0x1115   :  { %v3729_v34 = vpop.eup %3728 }
0x1116   :  { %v1062_v35 = vrot.slane %v3729_v34, 1 }
0x1118   :  { %v1064_v36 = vsub.f32 %v4131_v9, %v1062_v35 }
0x111a   :  { %v1066_v37 = vrot.slane %v1064_v36, 7 }
0x111c   :  { %1067 = vrot.lane.b32.xlu0 %v1066_v37, %s3898_s0 }
0x118e   :  { %v1068_v38 = vpop.permute.xlu0 %1067 }
0x118f   :  { %v1070_v39 = vmul.f32 %v3727_v29, %v1068_v38 }
0x1191   :  { %1072 = vrot.lane.b32.xlu1 %v1070_v39, %s3899_s1 }
0x1203   :  { %v1073_v41 = vpop.permute.xlu1 %1072 }
0x1204   :  { %v4151_v42 = vadd.f32 %v3729_v34, %v1073_v41 }
0x1206   :  { %v1076_v44 = vpack.c.bf16 %v4151_v42, %v4151_v42 }
0x1208   :  { %v1078_v45 = vrot.slane %v1076_v44, 2 }
0x120a   :  { %1079 = vrot.lane.b32.xlu0 %v1078_v45, %s3892_s7 }
0x127c   :  { %v1080_v46 = vpop.permute.xlu0 %1079 }
0x127d   :  { %3373 = vmatmul.mubr.msk.bf16.vlgmr.msra.gmra.mxu1 %vm652_vm6, %v1080_v46 }
0x127e   :  { %3385 = vmatpush3.bf16.msra.mxu1 %v4030_v54  ;;  %3388 = vmatprep.mubr.msk.bf16.mxu1 %vm3897_vm0, %v3896_v1 }
0x127f   :  { %3386 = vmatprep.subr.bf16.mxu1 %v3896_v1 }
0x1282   :  { %3387 = vmatpush3.bf16.msra.mxu1 %v4036_v56 }
0x1283   :  { %3412 = vmatprep.subr.bf16.mxu1 %v3896_v1 }
0x133d   :  { %v1118_v47 = vpop.f32.mrf.mxu1 }
0x133e   :  { %v1134_v48 = vadd.f32 %v1118_v47, %v4060_v16  ;;  %v1125_v53 = vrot.slane %v1118_v47, 3 }
0x133f   :  { %v3374_v49 = vpop.f32.mrf.mxu1 }
0x1340   :  { %v1136_v50 = vrot.slane %v1134_v48, 3  ;;  %v1127_v54 = vadd.f32 %v1125_v53, %v4064_v27 }
0x1341   :  { %v1121_v51 = vpop.f32.mrf.mxu1 }
0x1342   :  { %1137 = vrot.lane.b32.xlu1 %v1136_v50, %s3892_s7  ;;  %v3009_v57 = vmul.f32 -1.442695, %v1127_v54 }
0x1343   :  { %v3375_v52 = vpop.f32.mrf.mxu1 }
0x1344   :  { %3730 = vpow2.f32 %v3009_v57 }
0x1351   :  { %v3731_v58 = vpop.eup %3730 }
0x1352   :  { %v1131_v59 = vadd.f32 1.0, %v3731_v58 }
0x1354   :  { %3732 = vrcp.f32 %v1131_v59 }
0x1361   :  { %v3733_v56 = vpop.eup %3732 }
0x13b4   :  { %v1138_v60 = vpop.permute.xlu1 %1137 }
0x13b5   :  { %v1140_v61 = vmul.f32 %v3733_v56, %v1138_v60 }
0x13b7   :  { %1142 = vrot.lane.b32.xlu0 %v1140_v61, %s3892_s7  ;;  %v3600_v61 = vld [vmem:[#allocation2 + $0x150] sm:$0xff]  }
0x1429   :  { %v1143_v62 = vpop.permute.xlu0 %1142 }
0x142a   :  { %v1145_v63 = vadd.f32 %v1143_v62, %v4064_v27 }
0x142c   :  { %3734 = vtanh.f32 %v1145_v63  ;;  %v3601_v63 = vld [vmem:[#allocation2 + $0x148] sm:$0xff]  }
0x1439   :  { %v3735_v2 = vpop.eup %3734 }
0x143a   :  { %v1148_v3 = vrot.slane %v3735_v2, 1 }
0x143c   :  { %v1150_v4 = vsub.f32 %v4151_v42, %v1148_v3  ;;  %v3603_v3 = vld [vmem:[#allocation2 + $0x138] sm:$0xff]  }
0x143e   :  { %v1152_v5 = vrot.slane %v1150_v4, 7  ;;  %v3604_v4 = vld [vmem:[#allocation2 + $0x130] sm:$0xff]  }
0x1440   :  { %1153 = vrot.lane.b32.xlu1 %v1152_v5, %s3898_s0  ;;  %v3605_v5 = vld [vmem:[#allocation2 + $0x128] sm:$0xff]  }
0x14b2   :  { %v1154_v6 = vpop.permute.xlu1 %1153 }
0x14b3   :  { %v1156_v7 = vmul.f32 %v3733_v56, %v1154_v6  ;;  %v3606_v6 = vld [vmem:[#allocation2 + $0x120] sm:$0xff]  }
0x14b5   :  { %1158 = vrot.lane.b32.xlu0 %v1156_v7, %s3899_s1  ;;  %v3607_v7 = vld [vmem:[#allocation2 + $0x118] sm:$0xff]  }
0x1527   :  { %v1159_v8 = vpop.permute.xlu0 %1158 }
0x1528   :  { %v4171_v12 = vadd.f32 %v3735_v2, %v1159_v8  ;;  %v3602_v2 = vld [vmem:[#allocation2 + $0x140] sm:$0xff]  }
0x152a   :  { %v1162_v13 = vpack.c.bf16 %v4171_v12, %v4171_v12 }
0x152c   :  { %v1164_v14 = vshrl.u32 %v1162_v13, 16 }
0x152e   :  { %v1166_v15 = vrot.slane %v1164_v14, 2 }
0x1530   :  { %1167 = vrot.lane.b32.xlu1 %v1166_v15, %s3892_s7 }
0x15a2   :  { %v1168_v18 = vpop.permute.xlu1 %1167 }
0x15a3   :  { %3381 = vmatmul.mubr.msk.bf16.vlgmr.msra.gmra.mxu0 %vm652_vm6, %v1168_v18 }
0x15a4   :  { %3393 = vmatpush3.bf16.msra.mxu0 %v3592_v17  ;;  %3408 = vmatprep.mubr.msk.bf16.mxu0 %vm3897_vm0, %v3896_v1 }
0x15a5   :  { %3394 = vmatprep.subr.bf16.mxu0 %v3896_v1 }
0x15a8   :  { %3395 = vmatpush3.bf16.msra.mxu0 %v3593_v19 }
0x15a9   :  { %3396 = vmatprep.subr.bf16.mxu0 %v3896_v1 }
0x15ac   :  { %3397 = vmatpush3.bf16.msra.mxu0 %v3594_v20 }
0x15ad   :  { %3398 = vmatprep.subr.bf16.mxu0 %v3896_v1 }
0x15b0   :  { %3399 = vmatpush3.bf16.msra.mxu0 %v3595_v21 }
0x15b1   :  { %3400 = vmatprep.subr.bf16.mxu0 %v3896_v1 }
0x15b4   :  { %3401 = vmatpush3.bf16.msra.mxu0 %v3596_v22 }
0x15b5   :  { %3402 = vmatprep.subr.bf16.mxu0 %v3896_v1 }
0x15b8   :  { %3403 = vmatpush3.bf16.msra.mxu0 %v3597_v23 }
0x15b9   :  { %3404 = vmatprep.subr.bf16.mxu0 %v3896_v1 }
0x15bc   :  { %3405 = vmatpush3.bf16.msra.mxu0 %v3598_v24 }
0x15bd   :  { %3406 = vmatprep.subr.bf16.mxu0 %v3896_v1 }
0x15c0   :  { %3407 = vmatpush3.bf16.msra.mxu0 %v3599_v25 }
0x15c1   :  { %3432 = vmatprep.subr.bf16.mxu0 %v3896_v1 }
0x15c3   :  { %3409 = vmatmul.mubr.bf16.vlgmr.msra.gmra.mxu0 %v4051_v11 }
0x15c4   :  { %3436 = vmatprep.mubr.msk.bf16.mxu0 %vm3897_vm0, %v3896_v1 }
0x1663   :  { %v1206_v26 = vpop.f32.mrf.mxu0 }
0x1664   :  { %v1222_v28 = vadd.f32 %v1206_v26, %v4060_v16  ;;  %v1213_v37 = vrot.slane %v1206_v26, 2 }
0x1665   :  { %v3382_v29 = vpop.f32.mrf.mxu0 }
0x1666   :  { %v1224_v30 = vrot.slane %v1222_v28, 2  ;;  %v1215_v38 = vadd.f32 %v1213_v37, %v4064_v27 }
0x1667   :  { %v1209_v31 = vpop.f32.mrf.mxu0 }
0x1668   :  { %1225 = vrot.lane.b32.xlu0 %v1224_v30, %s3892_s7  ;;  %v3011_v39 = vmul.f32 -1.442695, %v1215_v38  ;;  %v3608_v38 = vld [vmem:[#allocation2 + $0x1a0] sm:$0xff]  }
0x1669   :  { %v3383_v32 = vpop.f32.mrf.mxu0  ;;  %3433 = vmatpush3.bf16.msra.mxu0 %v3608_v38  ;;  %v1639_v38 = vld [vmem:[#allocation7 + $0x21] ss:$0 sm:$0xff] }
0x166a   :  { %3736 = vpow2.f32 %v3011_v39  ;;  %v3609_v39 = vld [vmem:[#allocation2 + $0x198] sm:$0xff]   ;;  %3434 = vmatprep.subr.bf16.mxu0 %v3896_v1 }
0x166d   :  { %3435 = vmatpush3.bf16.msra.mxu0 %v3609_v39 }
0x166e   :  { %3460 = vmatprep.subr.bf16.mxu0 %v3896_v1 }
0x1677   :  { %v3737_v41 = vpop.eup %3736 }
0x1678   :  { %v1219_v44 = vadd.f32 1.0, %v3737_v41 }
0x167a   :  { %3738 = vrcp.f32 %v1219_v44 }
0x1683   :  { %v4192_v33 = vpop.f32.mrf.mxu0 }
0x1685   :  { %v3410_v34 = vpop.f32.mrf.mxu0 }
0x1687   :  { %v1468_v35 = vpop.f32.mrf.mxu0  ;;  %v3739_v45 = vpop.eup %3738 }
0x1689   :  { %v3411_v36 = vpop.f32.mrf.mxu0 }
0x16da   :  { %v1226_v46 = vpop.permute.xlu0 %1225 }
0x16db   :  { %v1228_v47 = vmul.f32 %v3739_v45, %v1226_v46 }
0x16dd   :  { %1230 = vrot.lane.b32.xlu1 %v1228_v47, %s3892_s7 }
0x174f   :  { %v1231_v48 = vpop.permute.xlu1 %1230 }
0x1750   :  { %v1233_v49 = vadd.f32 %v1231_v48, %v4064_v27 }
0x1752   :  { %3740 = vtanh.f32 %v1233_v49 }
0x175f   :  { %v3741_v50 = vpop.eup %3740 }
0x1760   :  { %v1236_v51 = vrot.slane %v3741_v50, 1 }
0x1762   :  { %v1238_v52 = vsub.f32 %v4171_v12, %v1236_v51 }
0x1764   :  { %v1240_v53 = vrot.slane %v1238_v52, 7 }
0x1766   :  { %1241 = vrot.lane.b32.xlu0 %v1240_v53, %s3898_s0 }
0x17d8   :  { %v1242_v54 = vpop.permute.xlu0 %1241 }
0x17d9   :  { %v1244_v57 = vmul.f32 %v3739_v45, %v1242_v54  ;;  %v3615_v54 = vld [vmem:[#allocation2 + $0x238] sm:$0xff]  }
0x17db   :  { %1246 = vrot.lane.b32.xlu1 %v1244_v57, %s3899_s1  ;;  %v3616_v57 = vld [vmem:[#allocation2 + $0x230] sm:$0xff]  }
0x184d   :  { %v1247_v58 = vpop.permute.xlu1 %1246 }
0x184e   :  { %v4200_v59 = vadd.f32 %v3741_v50, %v1247_v58  ;;  %v3617_v58 = vld [vmem:[#allocation2 + $0x228] sm:$0xff]  }
0x1850   :  { %v1250_v56 = vpack.c.bf16 %v4200_v59, %v4200_v59 }
0x1852   :  { %v1252_v60 = vrot.slane %v1250_v56, 3  ;;  %v3619_v56 = vld [vmem:[#allocation2 + $0x268] sm:$0xff]  }
0x1854   :  { %1253 = vrot.lane.b32.xlu0 %v1252_v60, %s3892_s7 }
0x18c6   :  { %v1254_v62 = vpop.permute.xlu0 %1253 }
0x18c7   :  { %3389 = vmatmul.mubr.msk.bf16.vlgmr.msra.gmra.mxu1 %vm652_vm6, %v1254_v62 }
0x18c8   :  { %3413 = vmatpush3.bf16.msra.mxu1 %v3600_v61  ;;  %3428 = vmatprep.mubr.msk.bf16.mxu1 %vm3897_vm0, %v3896_v1 }
0x18c9   :  { %3414 = vmatprep.subr.bf16.mxu1 %v3896_v1 }
0x18cc   :  { %3415 = vmatpush3.bf16.msra.mxu1 %v3601_v63 }
0x18cd   :  { %3416 = vmatprep.subr.bf16.mxu1 %v3896_v1 }
0x18d0   :  { %3417 = vmatpush3.bf16.msra.mxu1 %v3602_v2 }
0x18d1   :  { %3418 = vmatprep.subr.bf16.mxu1 %v3896_v1 }
0x18d4   :  { %3419 = vmatpush3.bf16.msra.mxu1 %v3603_v3 }
0x18d5   :  { %3420 = vmatprep.subr.bf16.mxu1 %v3896_v1 }
0x18d8   :  { %3421 = vmatpush3.bf16.msra.mxu1 %v3604_v4 }
0x18d9   :  { %3422 = vmatprep.subr.bf16.mxu1 %v3896_v1 }
0x18dc   :  { %3423 = vmatpush3.bf16.msra.mxu1 %v3605_v5 }
0x18dd   :  { %3424 = vmatprep.subr.bf16.mxu1 %v3896_v1 }
0x18e0   :  { %3425 = vmatpush3.bf16.msra.mxu1 %v3606_v6  ;;  %v3620_v6 = vld [vmem:[#allocation2 + $0x1e0] sm:$0xff]  }
0x18e1   :  { %3426 = vmatprep.subr.bf16.mxu1 %v3896_v1 }
0x18e4   :  { %3427 = vmatpush3.bf16.msra.mxu1 %v3607_v7  ;;  %v3621_v7 = vld [vmem:[#allocation2 + $0x1d8] sm:$0xff]  }
0x18e5   :  { %3440 = vmatprep.subr.bf16.mxu1 %v3896_v1 }
0x18e7   :  { %3429 = vmatmul.mubr.bf16.vlgmr.msra.gmra.mxu1 %v4032_v55 }
0x18e8   :  { %3456 = vmatprep.mubr.msk.bf16.mxu1 %vm3897_vm0, %v3896_v1  ;;  %3441 = vmatpush3.bf16.msra.mxu1 %v3620_v6 }
0x18e9   :  { %3442 = vmatprep.subr.bf16.mxu1 %v3896_v1 }
0x18ec   :  { %3443 = vmatpush3.bf16.msra.mxu1 %v3621_v7 }
0x18ed   :  { %3444 = vmatprep.subr.bf16.mxu1 %v3896_v1 }
0x1987   :  { %v1292_v8 = vpop.f32.mrf.mxu1 }
0x1988   :  { %v1308_v13 = vadd.f32 %v1292_v8, %v4060_v16  ;;  %v1299_v23 = vrot.slane %v1292_v8, 1  ;;  %v3622_v8 = vld [vmem:[#allocation2 + $0x1d0] sm:$0xff]  }
0x1989   :  { %v3390_v14 = vpop.f32.mrf.mxu1  ;;  %3445 = vmatpush3.bf16.msra.mxu1 %v3622_v8 }
0x198a   :  { %v1310_v15 = vrot.slane %v1308_v13, 1  ;;  %v1301_v24 = vadd.f32 %v1299_v23, %v4064_v27  ;;  %3446 = vmatprep.subr.bf16.mxu1 %v3896_v1  ;;  %v3624_v13 = vld [vmem:[#allocation2 + $0x1c0] sm:$0xff]  }
0x198b   :  { %v1295_v17 = vpop.f32.mrf.mxu1 }
0x198c   :  { %1311 = vrot.lane.b32.xlu1 %v1310_v15, %s3892_s7  ;;  %v3013_v25 = vmul.f32 -1.442695, %v1301_v24  ;;  %v3625_v15 = vld [vmem:[#allocation2 + $0x1b8] sm:$0xff]  }
0x198d   :  { %v3391_v18 = vpop.f32.mrf.mxu1 }
0x198e   :  { %3742 = vpow2.f32 %v3013_v25 }
0x199b   :  { %v3743_v26 = vpop.eup %3742 }
0x199c   :  { %v1305_v28 = vadd.f32 1.0, %v3743_v26 }
0x199e   :  { %3744 = vrcp.f32 %v1305_v28 }
0x19a7   :  { %v4221_v19 = vpop.f32.mrf.mxu1 }
0x19a8   :  { %v1554_v60 = vadd.f32 %v4221_v19, %v4192_v33  ;;  %v3623_v33 = vld [vmem:[#allocation2 + $0x1c8] sm:$0xff]   ;;  %v3626_v19 = vld [vmem:[#allocation2 + $0x1b0] sm:$0xff]  }
0x19a9   :  { %v3430_v20 = vpop.f32.mrf.mxu1  ;;  %3447 = vmatpush3.bf16.msra.mxu1 %v3623_v33 }
0x19aa   :  { %3448 = vmatprep.subr.bf16.mxu1 %v3896_v1 }
0x19ab   :  { %v1556_v21 = vpop.f32.mrf.mxu1  ;;  %v3745_v16 = vpop.eup %3744 }
0x19ad   :  { %v3431_v22 = vpop.f32.mrf.mxu1  ;;  %3449 = vmatpush3.bf16.msra.mxu1 %v3624_v13 }
0x19ae   :  { %3450 = vmatprep.subr.bf16.mxu1 %v3896_v1  ;;  %v3627_v22 = vld [vmem:[#allocation2 + $0x1a8] sm:$0xff]  }
0x19b1   :  { %3451 = vmatpush3.bf16.msra.mxu1 %v3625_v15 }
0x19b2   :  { %3452 = vmatprep.subr.bf16.mxu1 %v3896_v1 }
0x19b5   :  { %3453 = vmatpush3.bf16.msra.mxu1 %v3626_v19  ;;  %v2051_v19 = vld [vmem:[#allocation7 + $0x26] ss:$0 sm:$0xff] }
0x19b6   :  { %3454 = vmatprep.subr.bf16.mxu1 %v3896_v1 }
0x19b9   :  { %3455 = vmatpush3.bf16.msra.mxu1 %v3627_v22 }
0x19ba   :  { %3480 = vmatprep.subr.bf16.mxu1 %v3896_v1 }
0x19fe   :  { %v1312_v29 = vpop.permute.xlu1 %1311 }
0x19ff   :  { %v1314_v30 = vmul.f32 %v3745_v16, %v1312_v29 }
0x1a01   :  { %1316 = vrot.lane.b32.xlu0 %v1314_v30, %s3892_s7 }
0x1a73   :  { %v1317_v31 = vpop.permute.xlu0 %1316 }
0x1a74   :  { %v1319_v32 = vadd.f32 %v1317_v31, %v4064_v27  ;;  %v1337_v27 = vsel %vm1336_vm7, %v4071_v43, %v4091_v10  ;;  %v3610_v43 = vld [vmem:[#allocation2 + $0x260] sm:$0xff]  }
0x1a75   :  { %v1339_v45 = vsel %vm1338_vm8, %v1337_v27, %v4111_v40  ;;  %v3611_v40 = vld [vmem:[#allocation2 + $0x258] sm:$0xff]  }
0x1a76   :  { %3746 = vtanh.f32 %v1319_v32  ;;  %v1341_v46 = vsel %vm1340_vm9, %v1339_v45, %v4131_v9  ;;  %v3612_v9 = vld [vmem:[#allocation2 + $0x250] sm:$0xff]   ;;  %v3628_v45 = vld [vmem:[#allocation2 + $0x220] sm:$0xff]  }
0x1a77   :  { %v1343_v47 = vsel %vm1342_vm10, %v1341_v46, %v4151_v42  ;;  %v3613_v42 = vld [vmem:[#allocation2 + $0x248] sm:$0xff]  }
0x1a78   :  { %v1345_v49 = vsel %vm1344_vm11, %v1343_v47, %v4171_v12  ;;  %v3614_v12 = vld [vmem:[#allocation2 + $0x240] sm:$0xff]   ;;  %v3629_v47 = vld [vmem:[#allocation2 + $0x218] sm:$0xff]  }
0x1a79   :  { %v1347_v51 = vsel %vm1346_vm12, %v1345_v49, %v4200_v59  ;;  %v3631_v49 = vld [vmem:[#allocation2 + $0x208] sm:$0xff]  }
0x1a83   :  { %v3747_v34 = vpop.eup %3746 }
0x1a84   :  { %v1322_v35 = vrot.slane %v3747_v34, 1 }
0x1a86   :  { %v1324_v36 = vsub.f32 %v4200_v59, %v1322_v35  ;;  %v3618_v59 = vld [vmem:[#allocation2 + $0x270] sm:$0xff]  }
0x1a88   :  { %v1326_v37 = vrot.slane %v1324_v36, 7  ;;  %v1637_v36 = vld [vmem:[#allocation7 + $0x20] ss:$0 sm:$0xff] }
0x1a8a   :  { %1327 = vrot.lane.b32.xlu1 %v1326_v37, %s3898_s0 }
0x1afc   :  { %v1328_v41 = vpop.permute.xlu1 %1327 }
0x1afd   :  { %v1330_v44 = vmul.f32 %v3745_v16, %v1328_v41 }
0x1aff   :  { %1332 = vrot.lane.b32.xlu0 %v1330_v44, %s3899_s1 }
0x1b71   :  { %v1333_v48 = vpop.permute.xlu0 %1332 }
0x1b72   :  { %v1335_v50 = vadd.f32 %v3747_v34, %v1333_v48  ;;  %v3630_v48 = vld [vmem:[#allocation2 + $0x210] sm:$0xff]  }
0x1b74   :  { %v1349_v52 = vsel %vm1348_vm13, %v1347_v51, %v1335_v50  ;;  %v3632_v50 = vld [vmem:[#allocation2 + $0x200] sm:$0xff]   ;;  %v3633_v51 = vld [vmem:[#allocation2 + $0x1f8] sm:$0xff]  }
0x1b75   :  { %v1350_v53 = vpack.c.bf16 %v1349_v52, %v1349_v52  ;;  %v3634_v52 = vld [vmem:[#allocation2 + $0x1f0] sm:$0xff]  }
0x1b77   :  { %1564 = vrot.lane.b32.xlu1 %v1350_v53, %s3892_s7  ;;  %v3635_v53 = vld [vmem:[#allocation2 + $0x1e8] sm:$0xff]  }
0x1be9   :  { %v1565_v10 = vpop.permute.xlu1 %1564 }
0x1bea   :  { %3437 = vmatmul.mubr.msk.bf16.vlgmr.msra.gmra.mxu0 %vm652_vm6, %v1565_v10 }
0x1beb   :  { %3461 = vmatpush3.bf16.msra.mxu0 %v3610_v43  ;;  %3476 = vmatprep.mubr.msk.bf16.mxu0 %vm3897_vm0, %v3896_v1 }
0x1bec   :  { %3462 = vmatprep.subr.bf16.mxu0 %v3896_v1 }
0x1bef   :  { %3463 = vmatpush3.bf16.msra.mxu0 %v3611_v40 }
0x1bf0   :  { %3464 = vmatprep.subr.bf16.mxu0 %v3896_v1 }
0x1bf3   :  { %3465 = vmatpush3.bf16.msra.mxu0 %v3612_v9 }
0x1bf4   :  { %3466 = vmatprep.subr.bf16.mxu0 %v3896_v1 }
0x1bf7   :  { %3467 = vmatpush3.bf16.msra.mxu0 %v3613_v42 }
0x1bf8   :  { %3468 = vmatprep.subr.bf16.mxu0 %v3896_v1 }
0x1bfb   :  { %3469 = vmatpush3.bf16.msra.mxu0 %v3614_v12 }
0x1bfc   :  { %3470 = vmatprep.subr.bf16.mxu0 %v3896_v1 }
0x1bff   :  { %3471 = vmatpush3.bf16.msra.mxu0 %v3615_v54 }
0x1c00   :  { %3472 = vmatprep.subr.bf16.mxu0 %v3896_v1 }
0x1c03   :  { %3473 = vmatpush3.bf16.msra.mxu0 %v3616_v57  ;;  %v2036_v57 = vld [vmem:[#allocation7 + $0x25] ss:$0 sm:$0xff] }
0x1c04   :  { %3474 = vmatprep.subr.bf16.mxu0 %v3896_v1 }
0x1c07   :  { %3475 = vmatpush3.bf16.msra.mxu0 %v3617_v58 }
0x1c08   :  { %3500 = vmatprep.subr.bf16.mxu0 %v3896_v1 }
0x1c0a   :  { %3477 = vmatmul.mubr.bf16.vlgmr.msra.gmra.mxu0 %v4051_v11  ;;  %v1622_v11 = vld [vmem:[#allocation7 + $0x17] ss:$0 sm:$0xff] }
0x1c0b   :  { %3501 = vmatpush3.bf16.msra.mxu0 %v3618_v59  ;;  %3504 = vmatprep.mubr.msk.bf16.mxu0 %vm3897_vm0, %v3896_v1 }
0x1c0c   :  { %3502 = vmatprep.subr.bf16.mxu0 %v3896_v1 }
0x1c0f   :  { %3503 = vmatpush3.bf16.msra.mxu0 %v3619_v56 }
0x1c10   :  { %3508 = vmatprep.subr.bf16.mxu0 %v3896_v1 }
0x1c12   :  { %3505 = vmatmul.mubr.msk.bf16.vlgmr.msra.gmra.mxu0 %vm652_vm6, %v1565_v10 }
0x1c13   :  { %3524 = vmatprep.mubr.msk.bf16.mxu0 %vm3897_vm0, %v3896_v1 }
0x1caa   :  { %v1615_v61 = vpop.f32.mrf.mxu0 }
0x1cab   :  { %v1621_v62 = vadd.f32 %v1615_v61, %v1554_v60 }
0x1cac   :  { %v3438_v63 = vpop.f32.mrf.mxu0 }
0x1cad   :  { %v1623_v2 = vadd.f32 %v1622_v11, %v1621_v62  ;;  %v3637_v11 = vld [vmem:[#allocation2 + $0x2a8] sm:$0xff]   ;;  %v3638_v62 = vld [vmem:[#allocation2 + $0x2a0] sm:$0xff]   ;;  %v3639_v63 = vld [vmem:[#allocation2 + $0x298] sm:$0xff]  }
0x1cae   :  { %v1618_v3 = vpop.f32.mrf.mxu0 }
0x1caf   :  { %1624 = vadd.xlane.f32.xlu0 %v1623_v2  ;;  %v1627_v4 = vmul.f32 %v1623_v2, %v1623_v2  ;;  %v3641_v3 = vld [vmem:[#allocation2 + $0x288] sm:$0xff]  }
0x1cb0   :  { %v3439_v5 = vpop.f32.mrf.mxu0 }
0x1cb1   :  { %1628 = vadd.xlane.f32.xlu1 %v1627_v4  ;;  %v3642_v4 = vld [vmem:[#allocation2 + $0x280] sm:$0xff]   ;;  %v3643_v5 = vld [vmem:[#allocation2 + $0x278] sm:$0xff]  }
0x1cca   :  { %v4264_v14 = vpop.f32.mrf.mxu0 }
0x1ccc   :  { %v3478_v17 = vpop.f32.mrf.mxu0 }
0x1cce   :  { %v1888_v18 = vpop.f32.mrf.mxu0 }
0x1cd0   :  { %v3479_v20 = vpop.f32.mrf.mxu0 }
0x1cd2   :  { %v4268_v21 = vpop.f32.mrf.mxu0 }
0x1cd4   :  { %v3506_v23 = vpop.f32.mrf.mxu0 }
0x1cd6   :  { %v2032_v24 = vpop.f32.mrf.mxu0 }
0x1cd8   :  { %v3507_v25 = vpop.f32.mrf.mxu0 }
0x1d38   :  { %v1625_v26 = vpop.xlane.xlu0 %1624 }
0x1d39   :  { %v1626_v28 = vmul.f32 0.03125, %v1625_v26  ;;  %v2075_v26 = vld [vmem:[#allocation7 + $0x30] ss:$0 sm:$0xff] }
0x1d3a   :  { %v1629_v16 = vpop.xlane.xlu1 %1628 }
0x1d3b   :  { %v1631_v29 = vmul.f32 %v1626_v28, %v1626_v28  ;;  %v1630_v30 = vmul.f32 0.03125, %v1629_v16  ;;  %v1633_v34 = vsub.f32 %v1623_v2, %v1626_v28  ;;  %v3640_v2 = vld [vmem:[#allocation2 + $0x290] sm:$0xff]   ;;  %v1661_v28 = vld [vmem:[#allocation7 + $0x22] ss:$0 sm:$0xff] }
0x1d3d   :  { %v1632_v31 = vsub.f32 %v1630_v30, %v1631_v29 }
0x1d3f   :  { %v1634_v32 = vadd.f32 1e-05, %v1632_v31 }
0x1d41   :  { %3748 = vrsqrt.f32 %v1634_v32 }
0x1d4e   :  { %v3749_v35 = vpop.eup %3748 }
0x1d4f   :  { %v1636_v37 = vmul.f32 %v3749_v35, %v1633_v34 }
0x1d51   :  { %v1638_v39 = vmul.f32 %v1637_v36, %v1636_v37  ;;  %v3646_v36 = vld [vmem:[#allocation5 + $0xec] ss:$16 sps:$4 sm:$0xff]   ;;  %v3644_v37 = vld [vmem:[#allocation5 + $0xe8] ss:$16 sps:$4 sm:$0xff]  }
0x1d53   :  { %v1640_v41 = vadd.f32 %v1639_v38, %v1638_v39  ;;  %v3649_v38 = vld [vmem:[#allocation5 + $0xe4] ss:$16 sps:$4 sm:$0xff]   ;;  %v3652_v39 = vld [vmem:[#allocation5 + $0xcc] ss:$16 sps:$4 sm:$0xff]  }
0x1d55   :  { %vm1641_vm14 = vcmp.ge.f32.partialorder %v1640_v41, 0.0  ;;  %v1642_v44 = vmul.f32 0.01, %v1640_v41 }
0x1d57   :  { %v1643_v27 = vsel %vm1641_vm14, %v1640_v41, %v1642_v44  ;;  %v3647_v41 = vld [vmem:[#allocation5 + $0xe0] ss:$16 sps:$4 sm:$0xff]   ;;  %v3650_v44 = vld [vmem:[#allocation5 + $0xc8] ss:$16 sps:$4 sm:$0xff]  }
0x1d58   :  { %v1644_v46 = vpack.c.bf16 %v1643_v27, %v1643_v27  ;;  %v3655_v27 = vld [vmem:[#allocation5 + $0xc4] ss:$16 sps:$4 sm:$0xff]  }
0x1d5a   :  { %3457 = vmatmul.mubr.bf16.vlgmr.msra.gmra.mxu1 %v1644_v46  ;;  %v3653_v46 = vld [vmem:[#allocation5 + $0xc0] ss:$16 sps:$4 sm:$0xff]  }
0x1d5b   :  { %3481 = vmatpush3.bf16.msra.mxu1 %v3628_v45  ;;  %3496 = vmatprep.mubr.msk.bf16.mxu1 %vm3897_vm0, %v3896_v1  ;;  %v3658_v45 = vld [vmem:[#allocation5 + $0xac] ss:$16 sps:$4 sm:$0xff]  }
0x1d5c   :  { %3482 = vmatprep.subr.bf16.mxu1 %v3896_v1 }
0x1d5f   :  { %3483 = vmatpush3.bf16.msra.mxu1 %v3629_v47  ;;  %v3656_v47 = vld [vmem:[#allocation5 + $0xa8] ss:$16 sps:$4 sm:$0xff]  }
0x1d60   :  { %3484 = vmatprep.subr.bf16.mxu1 %v3896_v1 }
0x1d63   :  { %3485 = vmatpush3.bf16.msra.mxu1 %v3630_v48  ;;  %v3661_v48 = vld [vmem:[#allocation5 + $0xa4] ss:$16 sps:$4 sm:$0xff]  }
0x1d64   :  { %3486 = vmatprep.subr.bf16.mxu1 %v3896_v1 }
0x1d67   :  { %3487 = vmatpush3.bf16.msra.mxu1 %v3631_v49  ;;  %v3664_v49 = vld [vmem:[#allocation5 + $0x8c] ss:$16 sps:$4 sm:$0xff]  }
0x1d68   :  { %3488 = vmatprep.subr.bf16.mxu1 %v3896_v1 }
0x1d6b   :  { %3489 = vmatpush3.bf16.msra.mxu1 %v3632_v50  ;;  %v3659_v50 = vld [vmem:[#allocation5 + $0xa0] ss:$16 sps:$4 sm:$0xff]  }
0x1d6c   :  { %3490 = vmatprep.subr.bf16.mxu1 %v3896_v1 }
0x1d6f   :  { %3491 = vmatpush3.bf16.msra.mxu1 %v3633_v51  ;;  %v3662_v51 = vld [vmem:[#allocation5 + $0x88] ss:$16 sps:$4 sm:$0xff]  }
0x1d70   :  { %3492 = vmatprep.subr.bf16.mxu1 %v3896_v1 }
0x1d73   :  { %3493 = vmatpush3.bf16.msra.mxu1 %v3634_v52  ;;  %v3667_v52 = vld [vmem:[#allocation5 + $0x84] ss:$16 sps:$4 sm:$0xff]  }
0x1d74   :  { %3494 = vmatprep.subr.bf16.mxu1 %v3896_v1 }
0x1d77   :  { %3495 = vmatpush3.bf16.msra.mxu1 %v3635_v53  ;;  %v3670_v53 = vld [vmem:[#allocation5 + $0x6c] ss:$16 sps:$4 sm:$0xff]  }
0x1d78   :  { %2294 = vmatprep.subr.bf16.mxu1 %v3649_v38 }
0x1d7a   :  { %3497 = vmatmul.mubr.bf16.vlgmr.msra.gmra.mxu1 %v4032_v55  ;;  %v3636_v55 = vld [vmem:[#allocation2 + $0x2b0] sm:$0xff]  }
0x1d7b   :  { %2326 = vmatprep.mubr.bf16.mxu1 %v3895_v0  ;;  %3509 = vmatpush3.bf16.msra.mxu0 %v3636_v55  ;;  %v3686_v55 = vld [vmem:[#allocation5 + $0x8] ss:$16 sps:$4 sm:$0xff]  }
0x1d7c   :  { %3510 = vmatprep.subr.bf16.mxu0 %v3896_v1  ;;  %2295 = vmatpush1.bf16.msra.mxu1 %v3647_v41 }
0x1d7d   :  { %2296 = vmatprep.subr.bf16.mxu1 %v3655_v27 }
0x1d7f   :  { %3511 = vmatpush3.bf16.msra.mxu0 %v3637_v11  ;;  %v3691_v11 = vld [vmem:[#allocation5 + $0x4] ss:$16 sps:$4 sm:$0xff]  }
0x1d80   :  { %3512 = vmatprep.subr.bf16.mxu0 %v3896_v1  ;;  %2297 = vmatpush1.bf16.msra.mxu1 %v3653_v46 }
0x1d81   :  { %2298 = vmatprep.subr.bf16.mxu1 %v3661_v48 }
0x1d83   :  { %3513 = vmatpush3.bf16.msra.mxu0 %v3638_v62  ;;  %v3689_v62 = vld [vmem:[#allocation5] ss:$16 sps:$4 sm:$0xff]  }
0x1d84   :  { %3514 = vmatprep.subr.bf16.mxu0 %v3896_v1  ;;  %2299 = vmatpush1.bf16.msra.mxu1 %v3659_v50  ;;  %v4314_v50 = vld [vmem:[#allocation7 + $0x33] ss:$8 sm:$0x3] }
0x1d85   :  { %2300 = vmatprep.subr.bf16.mxu1 %v3667_v52 }
0x1d87   :  { %3515 = vmatpush3.bf16.msra.mxu0 %v3639_v63 }
0x1d88   :  { %3516 = vmatprep.subr.bf16.mxu0 %v3896_v1 }
0x1d8b   :  { %3517 = vmatpush3.bf16.msra.mxu0 %v3640_v2 }
0x1d8c   :  { %3518 = vmatprep.subr.bf16.mxu0 %v3896_v1 }
0x1d8f   :  { %3519 = vmatpush3.bf16.msra.mxu0 %v3641_v3 }
0x1d90   :  { %3520 = vmatprep.subr.bf16.mxu0 %v3896_v1 }
0x1d93   :  { %3521 = vmatpush3.bf16.msra.mxu0 %v3642_v4 }
0x1d94   :  { %3522 = vmatprep.subr.bf16.mxu0 %v3896_v1 }
0x1d97   :  { %3523 = vmatpush3.bf16.msra.mxu0 %v3643_v5 }
0x1d98   :  { %2444 = vmatprep.subr.bf16.mxu0 %v3646_v36 }
0x1e1a   :  { %v4283_v43 = vpop.f32.mrf.mxu1 }
0x1e1b   :  { %v4298_v31 = vadd.f32 %v4283_v43, %v1661_v28  ;;  %v3665_v43 = vld [vmem:[#allocation5 + $0x80] ss:$16 sps:$4 sm:$0xff]  }
0x1e1c   :  { %v3458_v10 = vpop.f32.mrf.mxu1  ;;  %2301 = vmatpush1.bf16.msra.mxu1 %v3665_v43 }
0x1e1d   :  { %v3668_v10 = vld [vmem:[#allocation5 + $0x68] ss:$16 sps:$4 sm:$0xff]  }
0x1e1e   :  { %v1747_v40 = vpop.f32.mrf.mxu1 }
0x1e1f   :  { %v3673_v40 = vld [vmem:[#allocation5 + $0x64] ss:$16 sps:$4 sm:$0xff]  }
0x1e20   :  { %v3459_v9 = vpop.f32.mrf.mxu1  ;;  %2302 = vmatprep.subr.bf16.mxu1 %v3673_v40 }
0x1e21   :  { %v3676_v9 = vld [vmem:[#allocation5 + $0x4c] ss:$16 sps:$4 sm:$0xff]  }
0x1e3a   :  { %v1973_v42 = vpop.f32.mrf.mxu1 }
0x1e3b   :  { %v1974_v12 = vadd.f32 %v1973_v42, %v4264_v14  ;;  %v3671_v42 = vld [vmem:[#allocation5 + $0x60] ss:$16 sps:$4 sm:$0xff]  }
0x1e3c   :  { %v3498_v54 = vpop.f32.mrf.mxu1  ;;  %2303 = vmatpush1.bf16.msra.mxu1 %v3671_v42 }
0x1e3d   :  { %v2035_v58 = vadd.f32 %v4268_v21, %v1974_v12  ;;  %v2053_v21 = vld [vmem:[#allocation7 + $0x27] ss:$0 sm:$0xff]  ;;  %v3674_v12 = vld [vmem:[#allocation5 + $0x48] ss:$16 sps:$4 sm:$0xff]  }
0x1e3e   :  { %v1976_v59 = vpop.f32.mrf.mxu1  ;;  %v3679_v54 = vld [vmem:[#allocation5 + $0x44] ss:$16 sps:$4 sm:$0xff]  }
0x1e3f   :  { %v2037_v56 = vadd.f32 %v2036_v57, %v2035_v58  ;;  %v3682_v57 = vld [vmem:[#allocation5 + $0x2c] ss:$16 sps:$4 sm:$0xff]   ;;  %v3677_v58 = vld [vmem:[#allocation5 + $0x40] ss:$16 sps:$4 sm:$0xff]   ;;  %v3680_v59 = vld [vmem:[#allocation5 + $0x28] ss:$16 sps:$4 sm:$0xff]   ;;  %2304 = vmatprep.subr.bf16.mxu1 %v3679_v54 }
0x1e40   :  { %v3499_v60 = vpop.f32.mrf.mxu1  ;;  %2305 = vmatpush1.bf16.msra.mxu1 %v3677_v58 }
0x1e41   :  { %2038 = vadd.xlane.f32.xlu0 %v2037_v56  ;;  %v2041_v61 = vmul.f32 %v2037_v56, %v2037_v56  ;;  %v3688_v60 = vld [vmem:[#allocation5 + $0xc] ss:$16 sps:$4 sm:$0xff]  }
0x1e45   :  { %2042 = vadd.xlane.f32.xlu0 %v2041_v61  ;;  %v3683_v61 = vld [vmem:[#allocation5 + $0x20] ss:$16 sps:$4 sm:$0xff]  }
0x1eca   :  { %v2039_v6 = vpop.xlane.xlu0 %2038 }
0x1ecb   :  { %v2040_v7 = vmul.f32 0.03125, %v2039_v6 }
0x1ecd   :  { %v2045_v33 = vmul.f32 %v2040_v7, %v2040_v7  ;;  %v2047_v17 = vsub.f32 %v2037_v56, %v2040_v7  ;;  %v3685_v56 = vld [vmem:[#allocation5 + $0x24] ss:$16 sps:$4 sm:$0xff]  }
0x1ece   :  { %v2043_v8 = vpop.xlane.xlu0 %2042  ;;  %2306 = vmatprep.subr.bf16.mxu1 %v3685_v56 }
0x1ecf   :  { %v2044_v13 = vmul.f32 0.03125, %v2043_v8  ;;  %2307 = vmatpush1.bf16.msra.mxu1 %v3683_v61 }
0x1ed0   :  { %2308 = vmatprep.subr.bf16.mxu1 %v3691_v11 }
0x1ed1   :  { %v2046_v14 = vsub.f32 %v2044_v13, %v2045_v33 }
0x1ed3   :  { %v2048_v15 = vadd.f32 1e-05, %v2046_v14  ;;  %2309 = vmatpush1.bf16.msra.mxu1 %v3689_v62 }
0x1ed5   :  { %3750 = vrsqrt.f32 %v2048_v15 }
0x1ee2   :  { %v3751_v18 = vpop.eup %3750 }
0x1ee3   :  { %v2050_v20 = vmul.f32 %v3751_v18, %v2047_v17 }
0x1ee5   :  { %v2052_v22 = vmul.f32 %v2051_v19, %v2050_v20 }
0x1ee7   :  { %v2054_v23 = vadd.f32 %v2053_v21, %v2052_v22  ;;  %v2177_v21 = vld [vmem:[#allocation7 + $0x31] ss:$0 sm:$0xff] }
0x1ee9   :  { %vm2055_vm15 = vcmp.ge.f32.partialorder %v2054_v23, 0.0  ;;  %v2056_v24 = vmul.f32 0.01, %v2054_v23 }
0x1eeb   :  { %v2057_v25 = vsel %vm2055_vm15, %v2054_v23, %v2056_v24  ;;  %v2179_v23 = vld [vmem:[#allocation7 + $0x32] ss:$0 sm:$0xff] }
0x1eec   :  { %v2058_v1 = vpack.c.bf16 %v2057_v25, %v2057_v25 }
0x1eee   :  { %3525 = vmatmul.mubr.bf16.vlgmr.msra.gmra.mxu0 %v2058_v1 }
0x1eef   :  { %2476 = vmatprep.mubr.bf16.mxu0 %v3895_v0  ;;  %v1753_v0 = vmul.f32 %v4298_v31, %v4298_v31  ;;  %2445 = vmatpush1.bf16.msra.mxu0 %v3644_v37 }
0x1ef0   :  { %2446 = vmatprep.subr.bf16.mxu0 %v3652_v39  ;;  %v2204_v39 = vlaneseq }
0x1ef3   :  { %2447 = vmatpush1.bf16.msra.mxu0 %v3650_v44  ;;  %v2352_v44 = vld [vmem:[#allocation7 + $0x34] ss:$8 sm:$0x3] }
0x1ef4   :  { %2448 = vmatprep.subr.bf16.mxu0 %v3658_v45 }
0x1ef7   :  { %2449 = vmatpush1.bf16.msra.mxu0 %v3656_v47 }
0x1ef8   :  { %2450 = vmatprep.subr.bf16.mxu0 %v3664_v49 }
0x1efb   :  { %2451 = vmatpush1.bf16.msra.mxu0 %v3662_v51 }
0x1efc   :  { %2452 = vmatprep.subr.bf16.mxu0 %v3670_v53 }
0x1eff   :  { %2453 = vmatpush1.bf16.msra.mxu0 %v3668_v10 }
0x1f00   :  { %2454 = vmatprep.subr.bf16.mxu0 %v3676_v9 }
0x1f03   :  { %2455 = vmatpush1.bf16.msra.mxu0 %v3674_v12 }
0x1f04   :  { %2456 = vmatprep.subr.bf16.mxu0 %v3682_v57 }
0x1f07   :  { %2457 = vmatpush1.bf16.msra.mxu0 %v3680_v59 }
0x1f08   :  { %2458 = vmatprep.subr.bf16.mxu0 %v3688_v60 }
0x1f0b   :  { %2459 = vmatpush1.bf16.msra.mxu0 %v3686_v55 }
0x1fae   :  { %v2158_v16 = vpop.f32.mrf.mxu0 }
0x1faf   :  { %v4295_v29 = vadd.f32 %v2158_v16, %v2075_v26  ;;  %v1763_v26 = vld [vmem:[#allocation7 + $0x23] ss:$0 sm:$0xff] }
0x1fb0   :  { %v3526_v30 = vpop.f32.mrf.mxu0 }
0x1fb1   :  { %2164 = vadd.xlane.f32.xlu1 %v4295_v29  ;;  %v2167_v32 = vmul.f32 %v4295_v29, %v4295_v29  ;;  %v1765_v30 = vld [vmem:[#allocation7 + $0x24] ss:$0 sm:$0xff] }
0x1fb2   :  { %v2161_v34 = vpop.f32.mrf.mxu0 }
0x1fb3   :  { %2168 = vadd.xlane.f32.xlu0 %v2167_v32 }
0x1fb4   :  { %v3527_v35 = vpop.f32.mrf.mxu0 }
0x1fb5   :  { %1750 = vadd.xlane.f32.xlu1 %v4298_v31 }
0x1fb7   :  { %1754 = vadd.xlane.f32.xlu0 %v1753_v0 }
0x203a   :  { %v2165_v63 = vpop.xlane.xlu1 %2164 }
0x203b   :  { %v2166_v2 = vmul.f32 0.03125, %v2165_v63 }
0x203c   :  { %v2169_v3 = vpop.xlane.xlu0 %2168 }
0x203d   :  { %v2171_v4 = vmul.f32 %v2166_v2, %v2166_v2  ;;  %v2170_v5 = vmul.f32 0.03125, %v2169_v3  ;;  %v2173_v19 = vsub.f32 %v4295_v29, %v2166_v2 }
0x203e   :  { %v1751_v6 = vpop.xlane.xlu1 %1750 }
0x203f   :  { %v2172_v7 = vsub.f32 %v2170_v5, %v2171_v4  ;;  %v1752_v8 = vmul.f32 0.03125, %v1751_v6 }
0x2040   :  { %v1755_v33 = vpop.xlane.xlu0 %1754 }
0x2041   :  { %v2174_v13 = vadd.f32 1e-05, %v2172_v7  ;;  %v1757_v14 = vmul.f32 %v1752_v8, %v1752_v8  ;;  %v1756_v15 = vmul.f32 0.03125, %v1755_v33  ;;  %v1759_v24 = vsub.f32 %v4298_v31, %v1752_v8 }
0x2042   :  { %v4308_v31 = vshrl.u32 %v2204_v39, 7 }
0x2043   :  { %3752 = vrsqrt.f32 %v2174_v13  ;;  %v1758_v17 = vsub.f32 %v1756_v15, %v1757_v14 }
0x2044   :  { %v2206_v41 = vsub.s32 0, %v4308_v31  ;;  %v2210_v27 = vsub.s32 1, %v4308_v31 }
0x2045   :  { %v1760_v18 = vadd.f32 1e-05, %v1758_v17 }
0x2046   :  { %v2357_v45 = vrot.slane %v2352_v44, %v2206_v41  ;;  %v2361_v46 = vrot.slane %v2352_v44, %v2210_v27  ;;  %v2211_v53 = vrot.slane %v4314_v50, %v2210_v27  ;;  %v3905_v27 = vmov 1326507024  }
0x2047   :  { %3754 = vrsqrt.f32 %v1760_v18 }
0x2050   :  { %v3753_v20 = vpop.eup %3752 }
0x2051   :  { %v2176_v22 = vmul.f32 %v3753_v20, %v2173_v19 }
0x2053   :  { %v2178_v25 = vmul.f32 %v2177_v21, %v2176_v22 }
0x2054   :  { %v3755_v1 = vpop.eup %3754 }
0x2055   :  { %v2180_v28 = vadd.f32 %v2179_v23, %v2178_v25  ;;  %v1762_v16 = vmul.f32 %v3755_v1, %v1759_v24  ;;  %v3900_v25 = vmov 683565275  }
0x2057   :  { %vm2181_vm0 = vcmp.ge.f32.partialorder %v2180_v28, 0.0  ;;  %v2182_v32 = vmul.f32 0.01, %v2180_v28  ;;  %v1764_v34 = vmul.f32 %v1763_v26, %v1762_v16  ;;  %v3901_v26 = vmov 2475754826  }
0x2058   :  { %v3902_v16 = vmov 2131351028  }
0x2059   :  { %v2183_v35 = vsel %vm2181_vm0, %v2180_v28, %v2182_v32  ;;  %v1766_v0 = vadd.f32 %v1765_v30, %v1764_v34 }
0x205a   :  { %v2184_v36 = vpack.c.bf16 %v2183_v35, %v2183_v35 }
0x205b   :  { %vm1767_vm1 = vcmp.ge.f32.partialorder %v1766_v0, 0.0  ;;  %v1768_v29 = vmul.f32 0.01, %v1766_v0 }
0x205c   :  { %2477 = vmatmul.mubr.bf16.vlgmr.msra.gmra.mxu0 %v2184_v36 }
0x205d   :  { %v1769_v37 = vsel %vm1767_vm1, %v1766_v0, %v1768_v29  ;;  %v3903_v0 = vmov 2102212464   ;;  %v3904_v29 = vmov 920167782  }
0x205e   :  { %v1770_v38 = vpack.c.bf16 %v1769_v37, %v1769_v37 }
0x2060   :  { %2327 = vmatmul.mubr.bf16.vlgmr.msra.gmra.mxu1 %v1770_v38 }
0x211c   :  { %v2478_v47 = vpop.f32.mrf.mxu0 }
0x211d   :  { %v2479_v48 = vadd.f32 %v2478_v47, %v2357_v45 }
0x211e   :  { %v2480_v49 = vpop.f32.mrf.mxu0 }
0x211f   :  { %v3102_v51 = vmul.f32 -1.442695, %v2479_v48  ;;  %v2481_v52 = vadd.f32 %v2480_v49, %v2361_v46 }
0x2120   :  { %v4317_v43 = vpop.f32.mrf.mxu1  ;;  %v2482_v10 = vpop.f32.mrf.mxu0 }
0x2121   :  { %3756 = vpow2.f32 %v3102_v51  ;;  %v3103_v40 = vmul.f32 -1.442695, %v2481_v52 }
0x2122   :  { %v2330_v9 = vpop.f32.mrf.mxu1  ;;  %v2483_v42 = vpop.f32.mrf.mxu0 }
0x2123   :  { %3758 = vpow2.f32 %v3103_v40  ;;  %v4319_v12 = vadd.f32 %v2330_v9, %v2211_v53 }
0x2124   :  { %v2332_v54 = vpop.f32.mrf.mxu1 }
0x2126   :  { %v2333_v57 = vpop.f32.mrf.mxu1 }
0x212e   :  { %v3757_v58 = vpop.eup %3756 }
0x212f   :  { %v2503_v59 = vadd.f32 1.0, %v3757_v58 }
0x2130   :  { %v3759_v56 = vpop.eup %3758 }
0x2131   :  { %3760 = vrcp.f32 %v2503_v59  ;;  %v2504_v60 = vadd.f32 1.0, %v3759_v56 }
0x2133   :  { %3762 = vrcp.f32 %v2504_v60 }
0x213e   :  { %v3761_v61 = vpop.eup %3760 }
0x213f   :  { %v4321_v55 = vmul.f32 6.2831855, %v3761_v61 }
0x2140   :  { %v3763_v11 = vpop.eup %3762 }
0x2141   :  { %v2514_v62 = vand.u32 2139095040, %v4321_v55  ;;  %v4324_v63 = vmul.f32 6.2831855, %v3763_v11  ;;  %v2511_v2 = vand.u32 2147483647, %v4321_v55  ;;  %vm2513_vm0 = vcmp.lt.s32.totalorder %v4321_v55, 0 }
0x2143   :  { %v2515_v3 = vshrl.u32 %v2514_v62, 23  ;;  %v2617_v4 = vand.u32 2139095040, %v4324_v63  ;;  %v2518_v7 = vand.u32 8388607, %v2511_v2  ;;  %v2614_v8 = vand.u32 2147483647, %v4324_v63 }
0x2144   :  { %vm2512_vm1 = vcmp.le.f32.partialorder %v2511_v2, 0.7853982 }
0x2145   :  { %v3104_v5 = vadd.s32 4294967169, %v2515_v3  ;;  %v2618_v6 = vshrl.u32 %v2617_v4, 23  ;;  %v2519_v15 = vor.u32 8388608, %v2518_v7  ;;  %v2621_v18 = vand.u32 8388607, %v2614_v8 }
0x2147   :  { %v2521_v33 = vadd.s32 1, %v3104_v5  ;;  %v3108_v13 = vadd.s32 4294967169, %v2618_v6  ;;  %v4333_v24 = vshll.u32 %v2519_v15, 8  ;;  %v2622_v32 = vor.u32 8388608, %v2621_v18 }
0x2149   :  { %vm2522_vm2 = vcmp.gt.s32.totalorder %v2521_v33, 0  ;;  %v2624_v14 = vadd.s32 1, %v3108_v13  ;;  %v2662_v62 = vshll.u32 %v2622_v32, 8 }
0x214a   :  { %v2523_v17 = vsel %vm2522_vm2, %v2521_v33, 0  ;;  %vm2616_vm2 = vcmp.lt.s32.totalorder %v4324_v63, 0 }
0x214b   :  { %v2525_v19 = vand.u32 31, %v2523_v17  ;;  %vm2625_vm3 = vcmp.gt.s32.totalorder %v2624_v14, 0  ;;  %v2524_v21 = vshrl.u32 %v2523_v17, 5 }
0x214c   :  { %v2626_v20 = vsel %vm2625_vm3, %v2624_v14, 0  ;;  %vm2615_vm3 = vcmp.le.f32.partialorder %v2614_v8, 0.7853982 }
0x214d   :  { %v2526_v22 = vsub.s32 32, %v2525_v19  ;;  %v2628_v23 = vand.u32 31, %v2626_v20  ;;  %v2528_v1 = vshll.u32 %v3900_v25, %v2525_v19  ;;  %v2531_v28 = vshll.u32 %v3901_v26, %v2525_v19 }
0x214e   :  { %v2534_v30 = vshll.u32 %v3902_v16, %v2525_v19  ;;  %v2537_v36 = vshll.u32 %v3903_v0, %v2525_v19  ;;  %v2540_v37 = vshll.u32 %v3904_v29, %v2525_v19  ;;  %vm2543_vm4 = vcmp.lt.s32.totalorder %v2524_v21, 1 }
0x214f   :  { %v2529_v34 = vshrl.u32 %v3901_v26, %v2526_v22  ;;  %v2532_v35 = vshrl.u32 %v3902_v16, %v2526_v22  ;;  %v2629_v38 = vsub.s32 32, %v2628_v23  ;;  %v2535_v39 = vshrl.u32 %v3903_v0, %v2526_v22 }
0x2150   :  { %v2538_v44 = vshrl.u32 %v3904_v29, %v2526_v22  ;;  %v2541_v45 = vshrl.u32 %v3905_v27, %v2526_v22  ;;  %v2527_v46 = vshrl.u32 %v3900_v25, %v2526_v22  ;;  %vm2544_vm5 = vcmp.lt.s32.totalorder %v2524_v21, 2 }
0x2151   :  { %v2530_v47 = vor.u32 %v2529_v34, %v2528_v1  ;;  %v2533_v48 = vor.u32 %v2532_v35, %v2531_v28  ;;  %v2536_v49 = vor.u32 %v2535_v39, %v2534_v30  ;;  %vm2545_vm6 = vcmp.lt.s32.totalorder %v2524_v21, 3 }
0x2152   :  { %v2539_v51 = vor.u32 %v2538_v44, %v2537_v36  ;;  %v2542_v52 = vor.u32 %v2541_v45, %v2540_v37  ;;  %vm2546_vm7 = vcmp.lt.s32.totalorder %v2524_v21, 4  ;;  %v2632_v56 = vshrl.u32 %v3901_v26, %v2629_v38 }
0x2153   :  { %v2547_v53 = vsel %vm2543_vm4, %v2527_v46, %v2530_v47  ;;  %v2551_v10 = vsel %vm2543_vm4, %v2530_v47, %v2533_v48  ;;  %v2548_v40 = vsel %vm2546_vm7, %v2536_v49, 2102212464  ;;  %v2555_v42 = vsel %vm2543_vm4, %v2533_v48, %v2536_v49 }
0x2154   :  { %v2552_v9 = vsel %vm2546_vm7, %v2539_v51, 920167782  ;;  %v2556_v54 = vsel %vm2546_vm7, %v2542_v52, 1326507024  ;;  %v2549_v57 = vsel %vm2545_vm6, %v2533_v48, %v2548_v40  ;;  %v2631_v11 = vshll.u32 %v3900_v25, %v2628_v23 }
0x2155   :  { %v2553_v58 = vsel %vm2545_vm6, %v2536_v49, %v2552_v9  ;;  %v2557_v59 = vsel %vm2545_vm6, %v2539_v51, %v2556_v54  ;;  %v2627_v7 = vshrl.u32 %v2626_v20, 5  ;;  %v2550_v33 = vsel %vm2544_vm5, %v2547_v53, %v2549_v57 }
0x2156   :  { %v2554_v60 = vsel %vm2544_vm5, %v2551_v10, %v2553_v58  ;;  %v2558_v61 = vsel %vm2544_vm5, %v2555_v42, %v2557_v59  ;;  %v2634_v13 = vshll.u32 %v3901_v26, %v2628_v23  ;;  %v2635_v14 = vshrl.u32 %v3902_v16, %v2629_v38 }
0x2157   :  { %v4341_v3 = vmul.u32.u64.low %v4333_v24, %v2558_v61  ;;  %v4342_v4 = vmul.u32.u64.high %v4333_v24, %v2558_v61, %v4341_v3  ;;  %v4345_v5 = vmul.u32.u64.low %v4333_v24, %v2554_v60  ;;  %v4346_v6 = vmul.u32.u64.high %v4333_v24, %v2554_v60, %v4345_v5 }
0x2158   :  { %v2633_v15 = vor.u32 %v2632_v56, %v2631_v11  ;;  %v2637_v17 = vshll.u32 %v3902_v16, %v2628_v23  ;;  %v2638_v18 = vshrl.u32 %v3903_v0, %v2629_v38  ;;  %v2641_v19 = vshrl.u32 %v3904_v29, %v2629_v38 }
0x2159   :  { %v2636_v22 = vor.u32 %v2635_v14, %v2634_v13  ;;  %v2640_v1 = vshll.u32 %v3903_v0, %v2628_v23  ;;  %v2643_v28 = vshll.u32 %v3904_v29, %v2628_v23  ;;  %v2644_v30 = vshrl.u32 %v3905_v27, %v2629_v38 }
0x215a   :  { %v2566_v32 = vmul.u32 %v4333_v24, %v2550_v33  ;;  %vm2568_vm8 = vc.u32 %v4342_v4, %v4345_v5  ;;  %v2569_v34 = vadd.s32 1, %v4346_v6  ;;  %v2639_v20 = vor.u32 %v2638_v18, %v2637_v17 }
0x215b   :  { %v2642_v21 = vor.u32 %v2641_v19, %v2640_v1  ;;  %v2645_v35 = vor.u32 %v2644_v30, %v2643_v28  ;;  %vm2646_vm9 = vcmp.lt.s32.totalorder %v2627_v7, 1  ;;  %vm2649_vm10 = vcmp.lt.s32.totalorder %v2627_v7, 4 }
0x215c   :  { %v2570_v26 = vsel %vm2568_vm8, %v2569_v34, %v4346_v6  ;;  %v2630_v16 = vshrl.u32 %v3900_v25, %v2629_v38  ;;  %v2651_v36 = vsel %vm2649_vm10, %v2639_v20, 2102212464  ;;  %v2654_v0 = vsel %vm2646_vm9, %v2633_v15, %v2636_v22 }
0x215d   :  { %v2571_v23 = vadd.s32 %v2570_v26, %v2566_v32  ;;  %vm2648_vm11 = vcmp.lt.s32.totalorder %v2627_v7, 3  ;;  %v2655_v29 = vsel %vm2649_vm10, %v2642_v21, 920167782  ;;  %v2658_v24 = vsel %vm2646_vm9, %v2636_v22, %v2639_v20 }
0x215e   :  { %vm2647_vm12 = vcmp.lt.s32.totalorder %v2627_v7, 2  ;;  %v2650_v37 = vsel %vm2646_vm9, %v2630_v16, %v2633_v15  ;;  %v2656_v39 = vsel %vm2648_vm11, %v2639_v20, %v2655_v29  ;;  %v2659_v44 = vsel %vm2649_vm10, %v2645_v35, 1326507024 }
0x215f   :  { %v2572_v27 = vadd.s32 536870912, %v2571_v23  ;;  %v2652_v45 = vsel %vm2648_vm11, %v2636_v22, %v2651_v36  ;;  %v2657_v46 = vsel %vm2647_vm12, %v2654_v0, %v2656_v39  ;;  %v2660_v47 = vsel %vm2648_vm11, %v2642_v21, %v2659_v44 }
0x2160   :  { %v2661_v48 = vsel %vm2647_vm12, %v2658_v24, %v2660_v47  ;;  %v4356_v49 = vmul.u32.u64.low %v2662_v62, %v2657_v46  ;;  %v4357_v51 = vmul.u32.u64.high %v2662_v62, %v2657_v46, %v4356_v49  ;;  %v2653_v53 = vsel %vm2647_vm12, %v2650_v37, %v2652_v45 }
0x2161   :  { %v4359_v52 = vshrl.u32 %v2572_v27, 30  ;;  %v4361_v25 = vmul.u32.u64.low %v2662_v62, %v2661_v48  ;;  %v4362_v38 = vmul.u32.u64.high %v2662_v62, %v2661_v48, %v4361_v25  ;;  %v2669_v42 = vmul.u32 %v2662_v62, %v2653_v53 }
0x2162   :  { %v2672_v40 = vadd.s32 1, %v4357_v51  ;;  %v2207_v57 = vrot.slane %v4314_v50, %v2206_v41  ;;  %v2567_v31 = vadd.s32 %v4345_v5, %v4342_v4  ;;  %v3101_v28 = vmul.f32 -1.442695, %v4319_v12 }
0x2163   :  { %v2574_v10 = vshll.u32 %v4359_v52, 30  ;;  %vm2671_vm13 = vc.u32 %v4362_v38, %v4356_v49  ;;  %v2670_v21 = vadd.s32 %v4356_v49, %v4362_v38  ;;  %v2597_v36 = vsub.s32 4, %v4359_v52 }
0x2164   :  { %v2673_v54 = vsel %vm2671_vm13, %v2672_v40, %v4357_v51  ;;  %v2329_v61 = vadd.f32 %v4317_v43, %v2207_v57  ;;  %vm2603_vm10 = vweird.f32 %v4321_v55 }
0x2165   :  { %v2575_v9 = vsub.s32 %v2571_v23, %v2574_v10  ;;  %v2674_v59 = vadd.s32 %v2673_v54, %v2669_v42  ;;  %v2598_v27 = vsel %vm2513_vm0, %v2597_v36, %v4359_v52 }
0x2166   :  { %v3100_v7 = vmul.f32 -1.442695, %v2329_v61  ;;  %v2600_v49 = vsel %vm2512_vm1, 0, %v2598_v27 }
0x2167   :  { %v2577_v58 = vsub.s32 0, %v2575_v9  ;;  %v2675_v60 = vadd.s32 536870912, %v2674_v59  ;;  %v2814_v2 = vadd.s32 3, %v2600_v49 }
0x2168   :  { %3764 = vpow2.f32 %v3100_v7 }
0x2169   :  { %v3105_v56 = vmin.u32 %v2577_v58, %v2575_v9  ;;  %v4372_v3 = vshrl.u32 %v2675_v60, 30  ;;  %3766 = vpow2.f32 %v3101_v28  ;;  %v2815_v42 = vand.u32 3, %v2814_v2 }
0x216b   :  { %v2579_v11 = vclz %v3105_v56  ;;  %v2677_v62 = vshll.u32 %v4372_v3, 30  ;;  %v2700_v53 = vsub.s32 4, %v4372_v3  ;;  %vm2820_vm5 = vcmp.eq.s32.totalorder %v2815_v42, 2 }
0x216c   :  { %vm2817_vm7 = vcmp.eq.s32.totalorder %v2815_v42, 0  ;;  %vm2816_vm9 = vcmp.lt.s32.totalorder %v2815_v42, 2 }
0x216d   :  { %v3106_v6 = vadd.s32 4294967294, %v2579_v11  ;;  %v2678_v13 = vsub.s32 %v2674_v59, %v2677_v62  ;;  %v2701_v54 = vsel %vm2616_vm2, %v2700_v53, %v4372_v3 }
0x216e   :  { %v2703_v60 = vsel %vm2615_vm3, 0, %v2701_v54 }
0x216f   :  { %vm3107_vm14 = vcmp.lt.s32.totalorder %v3106_v6, 0  ;;  %v2680_v14 = vsub.s32 0, %v2678_v13  ;;  %v2918_v7 = vadd.s32 3, %v2703_v60 }
0x2170   :  { %v2582_v33 = vsel %vm3107_vm14, 0, %v3106_v6 }
0x2171   :  { %v2583_v41 = vsub.s32 32, %v2582_v33  ;;  %v2587_v50 = vsub.s32 4294967266, %v2582_v33  ;;  %v2584_v15 = vshll.u32 %v2575_v9, %v2582_v33  ;;  %v3109_v18 = vmin.u32 %v2680_v14, %v2678_v13 }
0x2172   :  { %v2604_v9 = vand.u32 3, %v2600_v49  ;;  %v2707_v14 = vand.u32 3, %v2703_v60 }
0x2173   :  { %v2585_v17 = vshrl.u32 %v2567_v31, %v2583_v41  ;;  %v2588_v43 = vadd.s32 127, %v2587_v50  ;;  %v2682_v1 = vclz %v3109_v18 }
0x2174   :  { %vm2609_vm4 = vcmp.eq.s32.totalorder %v2604_v9, 2  ;;  %vm2606_vm6 = vcmp.eq.s32.totalorder %v2604_v9, 0  ;;  %vm2605_vm8 = vcmp.lt.s32.totalorder %v2604_v9, 2  ;;  %vm2712_vm11 = vcmp.eq.s32.totalorder %v2707_v14, 2 }
0x2175   :  { %v2586_v19 = vor.u32 %v2585_v17, %v2584_v15  ;;  %v2589_v22 = vshll.u32 %v2588_v43, 23  ;;  %v3110_v32 = vadd.s32 4294967294, %v2682_v1  ;;  %v3765_v24 = vpop.eup %3764  ;;  %v2919_v15 = vand.u32 3, %v2918_v7 }
0x2176   :  { %v2491_v46 = vadd.f32 1.0, %v3765_v24  ;;  %v3767_v25 = vpop.eup %3766  ;;  %vm2709_vm13 = vcmp.eq.s32.totalorder %v2707_v14, 0 }
0x2177   :  { %v2590_v30 = vor.u32 4788187, %v2589_v22  ;;  %v2593_v20 = vcvt.s32.f32 %v2586_v19  ;;  %vm3111_vm15 = vcmp.lt.s32.totalorder %v3110_v32, 0  ;;  %v2492_v52 = vadd.f32 1.0, %v3767_v25 }
0x2178   :  { %v2685_v5 = vsel %vm3111_vm15, 0, %v3110_v32  ;;  %vm2924_vm12 = vcmp.eq.s32.totalorder %v2919_v15, 2  ;;  %vm2921_vm14 = vcmp.eq.s32.totalorder %v2919_v15, 0  ;;  %vm2708_vm15 = vcmp.lt.s32.totalorder %v2707_v14, 2 }
0x2179   :  { %v2591_v34 = vand.u32 2147483647, %v2590_v30  ;;  %v2686_v35 = vsub.s32 32, %v2685_v5  ;;  %v2690_v26 = vsub.s32 4294967266, %v2685_v5  ;;  %v2687_v0 = vshll.u32 %v2678_v13, %v2685_v5 }
0x217b   :  { %v2594_v4 = vmul.f32 %v2593_v20, %v2591_v34  ;;  %v2688_v23 = vshrl.u32 %v2670_v21, %v2686_v35  ;;  %v2691_v12 = vadd.s32 127, %v2690_v26 }
0x217d   :  { %v2595_v16 = vxor.u32 2147483648, %v2594_v4  ;;  %v2689_v39 = vor.u32 %v2688_v23, %v2687_v0  ;;  %v2692_v44 = vshll.u32 %v2691_v12, 23 }
0x217f   :  { %v2596_v29 = vsel %vm2513_vm0, %v2595_v16, %v2594_v4  ;;  %v2693_v45 = vor.u32 4788187, %v2692_v44  ;;  %v2696_v48 = vcvt.s32.f32 %v2689_v39  ;;  %vm2920_vm0 = vcmp.lt.s32.totalorder %v2919_v15, 2 }
0x2180   :  { %v2599_v37 = vsel %vm2512_vm1, %v4321_v55, %v2596_v29  ;;  %vm2706_vm1 = vweird.f32 %v4324_v63 }
0x2181   :  { %3768 = vcosq.f32 %v2599_v37  ;;  %v2694_v47 = vand.u32 2147483647, %v2693_v45 }
0x2182   :  { %3770 = vsinq.f32 %v2599_v37 }
0x2183   :  { %v2697_v51 = vmul.f32 %v2696_v48, %v2694_v47  ;;  %3772 = vrcp.f32 %v2491_v46 }
0x2185   :  { %v2698_v38 = vxor.u32 2147483648, %v2697_v51 }
0x2187   :  { %v2699_v10 = vsel %vm2616_vm2, %v2698_v38, %v2697_v51 }
0x2188   :  { %v2702_v40 = vsel %vm2615_vm3, %v4324_v63, %v2699_v10 }
0x2189   :  { %3774 = vcosq.f32 %v2702_v40 }
0x218a   :  { %3776 = vsinq.f32 %v2702_v40 }
0x218b   :  { %3778 = vrcp.f32 %v2492_v52 }
0x218e   :  { %v3769_v57 = vpop.eup %3768 }
0x218f   :  { %v3771_v58 = vpop.eup %3770  ;;  %v2610_v59 = vxor.u32 2147483648, %v3769_v57 }
0x2190   :  { %v2607_v56 = vxor.u32 2147483648, %v3771_v58  ;;  %v3773_v33 = vpop.eup %3772 }
0x2191   :  { %v2611_v8 = vsel %vm2609_vm4, %v2610_v59, %v3771_v58  ;;  %v2822_v61 = vsel %vm2820_vm5, %v2610_v59, %v3771_v58 }
0x2192   :  { %v2608_v11 = vsel %vm2606_vm6, %v3769_v57, %v2607_v56  ;;  %v2819_v6 = vsel %vm2817_vm7, %v3769_v57, %v2607_v56 }
0x2193   :  { %v2612_v3 = vsel %vm2605_vm8, %v2608_v11, %v2611_v8  ;;  %v2823_v62 = vsel %vm2816_vm9, %v2819_v6, %v2822_v61 }
0x2194   :  { %v2613_v13 = vsel %vm2603_vm10, nan, %v2612_v3  ;;  %v2824_v31 = vsel %vm2603_vm10, nan, %v2823_v62 }
0x2195   :  { %v2717_v41 = vmul.f32 %v3773_v33, %v2613_v13  ;;  %v2929_v50 = vmul.f32 %v3773_v33, %v2824_v31 }
0x2196   :  { %v3775_v17 = vpop.eup %3774 }
0x2197   :  { %2719 = vst [vmem:[#allocation8] sm:$0xff] %v2717_v41  ;;  %2931 = vst [vmem:[#allocation9] sm:$0xff] %v2929_v50  ;;  %v3777_v43 = vpop.eup %3776  ;;  %v2713_v18 = vxor.u32 2147483648, %v3775_v17 }
0x2198   :  { %v2710_v19 = vxor.u32 2147483648, %v3777_v43  ;;  %v3779_v22 = vpop.eup %3778 }
0x2199   :  { %v2714_v55 = vsel %vm2712_vm11, %v2713_v18, %v3777_v43  ;;  %v2926_v1 = vsel %vm2924_vm12, %v2713_v18, %v3777_v43 }
0x219a   :  { %v2711_v28 = vsel %vm2709_vm13, %v3775_v17, %v2710_v19  ;;  %v2923_v30 = vsel %vm2921_vm14, %v3775_v17, %v2710_v19 }
0x219b   :  { %v2715_v32 = vsel %vm2708_vm15, %v2711_v28, %v2714_v55  ;;  %v2927_v34 = vsel %vm2920_vm0, %v2923_v30, %v2926_v1 }
0x219c   :  { %v2716_v20 = vsel %vm2706_vm1, nan, %v2715_v32  ;;  %v2928_v4 = vsel %vm2706_vm1, nan, %v2927_v34 }
0x219d   :  { %v2718_v5 = vmul.f32 %v3779_v22, %v2716_v20  ;;  %v2930_v21 = vmul.f32 %v3779_v22, %v2928_v4 }
0x219f   :  { %2720 = vst [vmem:[#allocation8 + $0x8] sm:$0xff] %v2718_v5  ;;  %2932 = vst [vmem:[#allocation9 + $0x8] sm:$0xff] %v2930_v21 }
0x21a0   :  { %3851 = shalt.err (!%p3848_p5)
}
0x21a1   :  { %2942 = dma.vmem_to_hbm [thread:$0]  %s2940_s18, 256, %s4404_s5, [#allocation4]  }
0x21a2   :  { %s3860_s24 = scalar_lea.vmem %s2950_s20, 256  ;;  %p3865_p7 = scmp.lt.s32.totalorder %s2950_s20, %s2950_s20 }
0x21a3   :  { %p3861_p6 = scmp.ne.s32.totalorder %s2950_s20, %s3860_s24  ;;  %p3866_p8 = scmp.lt.s32.totalorder %s3860_s24, %s3860_s24 }
0x21a5   :  { %p3867_p9 = por %p3866_p8, %p3865_p7 }
0x21a7   :  { %p3868_p10 = pnand %p3867_p9, %p3861_p6 }
0x21a9   :  { %3871 = shalt.err (!%p3868_p10)
}
0x21aa   :  { %2952 = dma.vmem_to_hbm [thread:$0]  %s2950_s20, 256, %s4405_s6, [#allocation10]  }
0x21ab   :  { %3884 = dma.done.wait [#allocation4], 256  }
0x21ac   :  { %3885 = vsyncadd [#allocation4], 4294967040 }
0x21ad   :  { %3886 = dma.done.wait [#allocation10], 256  }
0x21ae   :  { %3887 = vsyncadd [#allocation10], 4294967040 }
0x21af   :  { %2959 = vsyncpa [#allocation3], 1 }
0x21b0   :  { %2960 = vsyncpa [#allocation6], 1 }
0x21b1   :  { %2961 = vsyncpa [#allocation4], 1 }
0x21b2   :  { %2962 = vsyncpa [#allocation10], 1 }

</bundles_post_ra>
